<compile_context>
chip_gen: v7x
topology: tpu7x:2x2x1
jax: 0.10.0
libtpu: 0.0.40
codegen_flags: <defaults>
</compile_context>

<pallas_src>
import functools

import jax
import jax.numpy as jnp
import numpy as np
from jax.experimental import pallas as pl
from jax.experimental.pallas import tpu as pltpu


def _round_up(x, m):
    return (x + m - 1) // m * m


# ----------------------------- Pallas kernel -------------------------------

def _fast_sigmoid(z):
    # sigmoid(z) = 0.5 * tanh(0.5*z) + 0.5 : one EUP op instead of exp + recip.
    return 0.5 * jnp.tanh(0.5 * z) + 0.5


def _gate_cell(z, c, Hp):
    """Fused LSTM gate math. z: (B, 4*Hp) pre-activations, gate order i,f,g,o."""
    i = _fast_sigmoid(z[:, 0 * Hp:1 * Hp])
    f = _fast_sigmoid(z[:, 1 * Hp:2 * Hp])
    g = jnp.tanh(z[:, 2 * Hp:3 * Hp])
    o = _fast_sigmoid(z[:, 3 * Hp:4 * Hp])
    c_new = f * c + i * g
    h_new = o * jnp.tanh(c_new)
    return h_new, c_new


def lstm_model_kernel(x_ref, wih1_ref, b1_ref, whh1_ref,
                      w2cat_ref, b2_ref, wlin_ref, blin_ref,
                      out_ref,
                      xp1_ref,
                      *, T, Bp, H1p, H2p, Op, input_is_scalar, head_is_scalar):
    # ---- prologue: layer-1 input projection, batched over all T timesteps ----
    # x_ref: (T*Bp, I); wih1_ref: (I, 4*H1p); b1_ref: (1, 4*H1p)
    if input_is_scalar:
        # K == 1: rank-1 outer product -> pure VPU broadcast multiply-add.
        proj1 = x_ref[...] * wih1_ref[...] + b1_ref[...]
    else:
        proj1 = (jnp.dot(x_ref[...], wih1_ref[...],
                         preferred_element_type=jnp.float32) + b1_ref[...])
    xp1_ref[...] = proj1.reshape(T, Bp, 4 * H1p)

    w1 = whh1_ref[...]          # (H1p, 4*H1p)      bf16, stays in VMEM
    w2 = w2cat_ref[...]         # (H1p+H2p, 4*H2p)  bf16, [W_ih2; W_hh2] stacked
    b2 = b2_ref[...]            # (1, 4*H2p)        f32
    wdt = w1.dtype

    zeros1 = jnp.zeros((Bp, H1p), jnp.float32)
    zeros2 = jnp.zeros((Bp, H2p), jnp.float32)
    h1, c1 = zeros1, zeros1
    h2, c2 = zeros2, zeros2

    # ---- wavefront recurrence: iteration s = layer-1 step s + layer-2 step s-1.
    # Both dots read only last-iteration state (h1 here is h1 after step s-1,
    # which is exactly layer-2's input for its step s-1), so they are
    # independent and can be interleaved by the scheduler.
    for s in range(T + 1):
        z1 = None
        z2 = None
        if s >= 1:
            lhs2 = jnp.concatenate([h1, h2], axis=1).astype(wdt)   # (Bp, H1p+H2p)
            z2 = jnp.dot(lhs2, w2, preferred_element_type=jnp.float32) + b2
        if s < T:
            z1 = xp1_ref[s] + jnp.dot(h1.astype(wdt), w1,
                                      preferred_element_type=jnp.float32)
        if s >= 1:
            h2, c2 = _gate_cell(z2, c2, H2p)
        if s < T:
            h1, c1 = _gate_cell(z1, c1, H1p)

    # ---- head: ReLU on the last timestep of lstm2, then the Linear layer ----
    relu_h = jnp.maximum(h2, 0.0)                                   # (Bp, H2p)
    if head_is_scalar:
        # O == 1: VPU multiply + XLU lane reduction, lane-dense store.
        r = jnp.sum(relu_h * wlin_ref[...], axis=-1, keepdims=True)  # (Bp, 1)
        out_ref[...] = jnp.broadcast_to(r, (Bp, Op)) + blin_ref[...]
    else:
        out_ref[...] = (jnp.dot(relu_h, wlin_ref[...],
                                preferred_element_type=jnp.float32)
                        + blin_ref[...])


# ------------------------------ JAX wrapper --------------------------------

def _full_spec(shape):
    nd = len(shape)
    return pl.BlockSpec(shape, lambda *_, _nd=nd: (0,) * _nd)


def lstm_model_forward(x, params):
    """x: (B, T, I) batch_first float32. Returns (B, output_size)."""
    B, T, I = x.shape
    H1 = params["w_hh1"].shape[1]
    H2 = params["w_hh2"].shape[1]
    O = params["w_lin"].shape[0]

    Bp = _round_up(B, 8)        # f32 sublane count
    H1p = _round_up(H1, 128)    # lane-align each gate slot
    H2p = _round_up(H2, 128)
    Op = _round_up(O, 128)      # lane-dense output store

    # time-major, batch padded to the sublane count, flattened to (T*Bp, I)
    x_tm = jnp.transpose(x, (1, 0, 2)).astype(jnp.float32)        # (T, B, I)
    x_tm = jnp.pad(x_tm, ((0, 0), (0, Bp - B), (0, 0)))
    x_flat = x_tm.reshape(T * Bp, I)

    # torch layout: w_* is (4H, in), gate order [i, f, g, o].  Pack so that one
    # matmul produces all 4 gates at 128-aligned lane offsets; padded rows/cols
    # and padded bias lanes are zero so padded h/c lanes stay exactly 0.
    def pack_w(w, rows, rows_pad, H, Hp):
        w4 = jnp.transpose(w.astype(jnp.float32).reshape(4, H, rows), (2, 0, 1))
        w4 = jnp.pad(w4, ((0, rows_pad - rows), (0, 0), (0, Hp - H)))
        return w4.reshape(rows_pad, 4 * Hp)

    def pack_b(b_ih, b_hh, H, Hp):
        b = jnp.pad((b_ih + b_hh).astype(jnp.float32).reshape(4, H),
                    ((0, 0), (0, Hp - H)))
        return b.reshape(1, 4 * Hp)

    wdt = jnp.bfloat16  # recurrent-weight dtype (gate math stays f32)

    wih1 = pack_w(params["w_ih1"], I, I, H1, H1p)                 # (I, 4*H1p) f32
    whh1 = pack_w(params["w_hh1"], H1, H1p, H1, H1p).astype(wdt)  # (H1p, 4*H1p)
    b1 = pack_b(params["b_ih1"], params["b_hh1"], H1, H1p)        # (1, 4*H1p)

    wih2 = pack_w(params["w_ih2"], H1, H1p, H2, H2p)              # (H1p, 4*H2p)
    whh2 = pack_w(params["w_hh2"], H2, H2p, H2, H2p)              # (H2p, 4*H2p)
    w2cat = jnp.concatenate([wih2, whh2], axis=0).astype(wdt)     # (H1p+H2p, 4*H2p)
    b2 = pack_b(params["b_ih2"], params["b_hh2"], H2, H2p)        # (1, 4*H2p)

    head_is_scalar = (O == 1)
    if head_is_scalar:
        wlin = jnp.pad(params["w_lin"].astype(jnp.float32),
                       ((0, 0), (0, H2p - H2)))                   # (1, H2p)
    else:
        wlin = jnp.pad(params["w_lin"].T.astype(jnp.float32),
                       ((0, H2p - H2), (0, Op - O)))              # (H2p, Op)
    blin = jnp.pad(params["b_lin"].astype(jnp.float32).reshape(1, O),
                   ((0, 0), (0, Op - O)))                         # (1, Op)

    args = (x_flat, wih1, b1, whh1, w2cat, b2, wlin, blin)

    kernel = functools.partial(lstm_model_kernel,
                               T=T, Bp=Bp, H1p=H1p, H2p=H2p, Op=Op,
                               input_is_scalar=(I == 1),
                               head_is_scalar=head_is_scalar)

    out = pl.pallas_call(
        kernel,
        out_shape=jax.ShapeDtypeStruct((Bp, Op), jnp.float32),
        grid=(1,),
        in_specs=[_full_spec(a.shape) for a in args],
        out_specs=_full_spec((Bp, Op)),
        scratch_shapes=[
            pltpu.VMEM((T, Bp, 4 * H1p), jnp.float32),   # hoisted layer-1 input proj
        ],
        compiler_params=pltpu.CompilerParams(
            dimension_semantics=("arbitrary",)),
    )(*args)

    return out[:B, :O]


# -------------------------- deterministic params ---------------------------

def init_params(key, input_size=1, h1=50, h2=70, output_size=1):
    ks = jax.random.split(key, 10)

    def u(k, shape, scale):
        return jax.random.uniform(k, shape, jnp.float32, -scale, scale)

    s1 = 1.0 / np.sqrt(h1)
    s2 = 1.0 / np.sqrt(h2)
    s3 = 1.0 / np.sqrt(h2)
    return dict(
        w_ih1=u(ks[0], (4 * h1, input_size), s1),
        w_hh1=u(ks[1], (4 * h1, h1), s1),
        b_ih1=u(ks[2], (4 * h1,), s1),
        b_hh1=u(ks[3], (4 * h1,), s1),
        w_ih2=u(ks[4], (4 * h2, h1), s2),
        w_hh2=u(ks[5], (4 * h2, h2), s2),
        b_ih2=u(ks[6], (4 * h2,), s2),
        b_hh2=u(ks[7], (4 * h2,), s2),
        w_lin=u(ks[8], (output_size, h2), s3),
        b_lin=u(ks[9], (output_size,), s3),
    )


# ---------------------------- pure-JAX reference ---------------------------

def reference_forward(x, p):
    def run_layer(xs, w_ih, w_hh, b_ih, b_hh):
        H = w_hh.shape[1]
        B, T, _ = xs.shape
        h = jnp.zeros((B, H), jnp.float32)
        c = jnp.zeros((B, H), jnp.float32)
        hs = []
        for t in range(T):
            z = xs[:, t] @ w_ih.T + h @ w_hh.T + b_ih + b_hh
            i, f, g, o = jnp.split(z, 4, axis=1)
            i = jax.nn.sigmoid(i)
            f = jax.nn.sigmoid(f)
            g = jnp.tanh(g)
            o = jax.nn.sigmoid(o)
            c = f * c + i * g
            h = o * jnp.tanh(c)
            hs.append(h)
        return jnp.stack(hs, axis=1)

    y1 = run_layer(x, p["w_ih1"], p["w_hh1"], p["b_ih1"], p["b_hh1"])
    y2 = run_layer(y1, p["w_ih2"], p["w_hh2"], p["b_ih2"], p["b_hh2"])
    last = jnp.maximum(y2[:, -1], 0.0)
    return last @ p["w_lin"].T + p["b_lin"]


# --------------------------------- main ------------------------------------

if __name__ == "__main__":
    key = jax.random.PRNGKey(0)
    kx, kp = jax.random.split(key)

    B, T, I = 2, 8, 1                       # batch_first sequence of scalars
    x = jax.random.normal(kx, (B, T, I), jnp.float32)
    params = init_params(kp, input_size=I, h1=50, h2=70, output_size=1)

    out = jax.block_until_ready(lstm_model_forward(x, params))
    ref = jax.block_until_ready(reference_forward(x, params))
    # Tolerance loosened vs. the f32 reference because the recurrent weights
    # (and the lhs operands of the recurrent dots) are cast to bf16 in-kernel.
    np.testing.assert_allclose(np.asarray(out), np.asarray(ref),
                               rtol=2e-2, atol=2e-2)
    print("KERNEL_OK")
</pallas_src>

<mosaic_0001>
module attributes {stable_mosaic.version = 11 : i64} {
  func.func @lstm_model_kernel(%arg0: i32, %arg1: memref<64x1xf32, #tpu.memory_space<vmem>>, %arg2: memref<1x512xf32, #tpu.memory_space<vmem>>, %arg3: memref<1x512xf32, #tpu.memory_space<vmem>>, %arg4: memref<128x512xbf16, #tpu.memory_space<vmem>>, %arg5: memref<256x512xbf16, #tpu.memory_space<vmem>>, %arg6: memref<1x512xf32, #tpu.memory_space<vmem>>, %arg7: memref<1x128xf32, #tpu.memory_space<vmem>>, %arg8: memref<1x128xf32, #tpu.memory_space<vmem>>, %arg9: memref<8x128xf32, #tpu.memory_space<vmem>>, %arg10: memref<8x8x512xf32, #tpu.memory_space<vmem>>) attributes {dimension_semantics = [#tpu.dimension_semantics<arbitrary>], iteration_bounds = array<i64: 1>, scalar_prefetch = 0 : i64, scratch_operands = 1 : i64, tpu.core_type = #tpu.core_type<tc>, window_params = [{pipeline_mode = #tpu.pipeline_mode<synchronous>, transform_indices = @transform_0, window_bounds = array<i64: 64, 1>}, {pipeline_mode = #tpu.pipeline_mode<synchronous>, transform_indices = @transform_1, window_bounds = array<i64: 1, 512>}, {pipeline_mode = #tpu.pipeline_mode<synchronous>, transform_indices = @transform_2, window_bounds = array<i64: 1, 512>}, {pipeline_mode = #tpu.pipeline_mode<synchronous>, transform_indices = @transform_3, window_bounds = array<i64: 128, 512>}, {pipeline_mode = #tpu.pipeline_mode<synchronous>, transform_indices = @transform_4, window_bounds = array<i64: 256, 512>}, {pipeline_mode = #tpu.pipeline_mode<synchronous>, transform_indices = @transform_5, window_bounds = array<i64: 1, 512>}, {pipeline_mode = #tpu.pipeline_mode<synchronous>, transform_indices = @transform_6, window_bounds = array<i64: 1, 128>}, {pipeline_mode = #tpu.pipeline_mode<synchronous>, transform_indices = @transform_7, window_bounds = array<i64: 1, 128>}, {pipeline_mode = #tpu.pipeline_mode<synchronous>, transform_indices = @transform_8, window_bounds = array<i64: 8, 128>}]} {
    %c0 = arith.constant 0 : index
    %c0_0 = arith.constant 0 : index
    %0 = vector.load %arg1[%c0, %c0_0] : memref<64x1xf32, #tpu.memory_space<vmem>>, vector<64x1xf32>
    %c0_1 = arith.constant 0 : index
    %c0_2 = arith.constant 0 : index
    %1 = vector.load %arg2[%c0_1, %c0_2] : memref<1x512xf32, #tpu.memory_space<vmem>>, vector<1x512xf32>
    %2 = vector.broadcast %0 : vector<64x1xf32> to vector<64x512xf32>
    %3 = vector.broadcast %1 : vector<1x512xf32> to vector<64x512xf32>
    %4 = arith.mulf %2, %3 : vector<64x512xf32>
    %c0_3 = arith.constant 0 : index
    %c0_4 = arith.constant 0 : index
    %5 = vector.load %arg3[%c0_3, %c0_4] : memref<1x512xf32, #tpu.memory_space<vmem>>, vector<1x512xf32>
    %6 = vector.broadcast %5 : vector<1x512xf32> to vector<64x512xf32>
    %7 = arith.addf %4, %6 : vector<64x512xf32>
    %8 = vector.shape_cast %7 : vector<64x512xf32> to vector<8x8x512xf32>
    %c0_5 = arith.constant 0 : index
    %c0_6 = arith.constant 0 : index
    %c0_7 = arith.constant 0 : index
    %9 = vector.load %arg10[%c0_5, %c0_6, %c0_7] : memref<8x8x512xf32, #tpu.memory_space<vmem>>, vector<8x8x512xf32>
    tpu.vector_store %arg10[%c0_5, %c0_6, %c0_7], %8 {strides = array<i32>} : memref<8x8x512xf32, #tpu.memory_space<vmem>>, vector<8x8x512xf32>,
    %c0_8 = arith.constant 0 : index
    %c0_9 = arith.constant 0 : index
    %10 = vector.load %arg4[%c0_8, %c0_9] : memref<128x512xbf16, #tpu.memory_space<vmem>>, vector<128x512xbf16>
    %c0_10 = arith.constant 0 : index
    %c0_11 = arith.constant 0 : index
    %11 = vector.load %arg5[%c0_10, %c0_11] : memref<256x512xbf16, #tpu.memory_space<vmem>>, vector<256x512xbf16>
    %c0_12 = arith.constant 0 : index
    %c0_13 = arith.constant 0 : index
    %12 = vector.load %arg6[%c0_12, %c0_13] : memref<1x512xf32, #tpu.memory_space<vmem>>, vector<1x512xf32>
    %cst = arith.constant 0.000000e+00 : f32
    %13 = vector.broadcast %cst : f32 to vector<8x128xf32>
    %cst_14 = arith.constant 0.000000e+00 : f32
    %14 = vector.broadcast %cst_14 : f32 to vector<8x128xf32>
    %c0_15 = arith.constant 0 : index
    %c0_16 = arith.constant 0 : index
    %c0_17 = arith.constant 0 : index
    %15 = vector.load %arg10[%c0_15, %c0_16, %c0_17] : memref<8x8x512xf32, #tpu.memory_space<vmem>>, vector<1x8x512xf32>
    %16 = vector.shape_cast %15 : vector<1x8x512xf32> to vector<8x512xf32>
    %17 = arith.truncf %13 : vector<8x128xf32> to vector<8x128xbf16>
    %cst_18 = arith.constant dense<0.000000e+00> : vector<8x512xf32>
    %18 = tpu.matmul %17, %10, %cst_18 {dimension_numbers = #tpu.dot_dimension_numbers<[1], [0], [0], [1], [0, 0, 1, 1], [], []>} : vector<8x128xbf16>, vector<128x512xbf16>, vector<8x512xf32> -> vector<8x512xf32>
    %19 = arith.addf %16, %18 : vector<8x512xf32>
    %20 = vector.extract_strided_slice %19 {offsets = [0, 0], sizes = [8, 128], strides = [1, 1]} : vector<8x512xf32> to vector<8x128xf32>
    %cst_19 = arith.constant 5.000000e-01 : f32
    %21 = vector.broadcast %cst_19 : f32 to vector<8x128xf32>
    %22 = arith.mulf %21, %20 : vector<8x128xf32>
    %23 = math.tanh %22 : vector<8x128xf32>
    %cst_20 = arith.constant 5.000000e-01 : f32
    %24 = vector.broadcast %cst_20 : f32 to vector<8x128xf32>
    %25 = arith.mulf %24, %23 : vector<8x128xf32>
    %cst_21 = arith.constant 5.000000e-01 : f32
    %26 = vector.broadcast %cst_21 : f32 to vector<8x128xf32>
    %27 = arith.addf %25, %26 : vector<8x128xf32>
    %28 = vector.extract_strided_slice %19 {offsets = [0, 128], sizes = [8, 128], strides = [1, 1]} : vector<8x512xf32> to vector<8x128xf32>
    %cst_22 = arith.constant 5.000000e-01 : f32
    %29 = vector.broadcast %cst_22 : f32 to vector<8x128xf32>
    %30 = arith.mulf %29, %28 : vector<8x128xf32>
    %31 = math.tanh %30 : vector<8x128xf32>
    %cst_23 = arith.constant 5.000000e-01 : f32
    %32 = vector.broadcast %cst_23 : f32 to vector<8x128xf32>
    %33 = arith.mulf %32, %31 : vector<8x128xf32>
    %cst_24 = arith.constant 5.000000e-01 : f32
    %34 = vector.broadcast %cst_24 : f32 to vector<8x128xf32>
    %35 = arith.addf %33, %34 : vector<8x128xf32>
    %36 = vector.extract_strided_slice %19 {offsets = [0, 256], sizes = [8, 128], strides = [1, 1]} : vector<8x512xf32> to vector<8x128xf32>
    %37 = math.tanh %36 : vector<8x128xf32>
    %38 = vector.extract_strided_slice %19 {offsets = [0, 384], sizes = [8, 128], strides = [1, 1]} : vector<8x512xf32> to vector<8x128xf32>
    %cst_25 = arith.constant 5.000000e-01 : f32
    %39 = vector.broadcast %cst_25 : f32 to vector<8x128xf32>
    %40 = arith.mulf %39, %38 : vector<8x128xf32>
    %41 = math.tanh %40 : vector<8x128xf32>
    %cst_26 = arith.constant 5.000000e-01 : f32
    %42 = vector.broadcast %cst_26 : f32 to vector<8x128xf32>
    %43 = arith.mulf %42, %41 : vector<8x128xf32>
    %cst_27 = arith.constant 5.000000e-01 : f32
    %44 = vector.broadcast %cst_27 : f32 to vector<8x128xf32>
    %45 = arith.addf %43, %44 : vector<8x128xf32>
    %46 = arith.mulf %35, %13 : vector<8x128xf32>
    %47 = arith.mulf %27, %37 : vector<8x128xf32>
    %48 = arith.addf %46, %47 : vector<8x128xf32>
    %49 = math.tanh %48 : vector<8x128xf32>
    %50 = arith.mulf %45, %49 : vector<8x128xf32>
    %51 = tpu.concatenate %50, %14 in 1 : vector<8x128xf32>, vector<8x128xf32> -> vector<8x256xf32>
    %52 = arith.truncf %51 : vector<8x256xf32> to vector<8x256xbf16>
    %cst_28 = arith.constant dense<0.000000e+00> : vector<8x512xf32>
    %53 = tpu.matmul %52, %11, %cst_28 {dimension_numbers = #tpu.dot_dimension_numbers<[1], [0], [0], [1], [0, 0, 1, 1], [], []>} : vector<8x256xbf16>, vector<256x512xbf16>, vector<8x512xf32> -> vector<8x512xf32>
    %54 = vector.broadcast %12 : vector<1x512xf32> to vector<8x512xf32>
    %55 = arith.addf %53, %54 : vector<8x512xf32>
    %c1 = arith.constant 1 : index
    %c0_29 = arith.constant 0 : index
    %c0_30 = arith.constant 0 : index
    %56 = vector.load %arg10[%c1, %c0_29, %c0_30] : memref<8x8x512xf32, #tpu.memory_space<vmem>>, vector<1x8x512xf32>
    %57 = vector.shape_cast %56 : vector<1x8x512xf32> to vector<8x512xf32>
    %58 = arith.truncf %50 : vector<8x128xf32> to vector<8x128xbf16>
    %cst_31 = arith.constant dense<0.000000e+00> : vector<8x512xf32>
    %59 = tpu.matmul %58, %10, %cst_31 {dimension_numbers = #tpu.dot_dimension_numbers<[1], [0], [0], [1], [0, 0, 1, 1], [], []>} : vector<8x128xbf16>, vector<128x512xbf16>, vector<8x512xf32> -> vector<8x512xf32>
    %60 = arith.addf %57, %59 : vector<8x512xf32>
    %61 = vector.extract_strided_slice %55 {offsets = [0, 0], sizes = [8, 128], strides = [1, 1]} : vector<8x512xf32> to vector<8x128xf32>
    %cst_32 = arith.constant 5.000000e-01 : f32
    %62 = vector.broadcast %cst_32 : f32 to vector<8x128xf32>
    %63 = arith.mulf %62, %61 : vector<8x128xf32>
    %64 = math.tanh %63 : vector<8x128xf32>
    %cst_33 = arith.constant 5.000000e-01 : f32
    %65 = vector.broadcast %cst_33 : f32 to vector<8x128xf32>
    %66 = arith.mulf %65, %64 : vector<8x128xf32>
    %cst_34 = arith.constant 5.000000e-01 : f32
    %67 = vector.broadcast %cst_34 : f32 to vector<8x128xf32>
    %68 = arith.addf %66, %67 : vector<8x128xf32>
    %69 = vector.extract_strided_slice %55 {offsets = [0, 128], sizes = [8, 128], strides = [1, 1]} : vector<8x512xf32> to vector<8x128xf32>
    %cst_35 = arith.constant 5.000000e-01 : f32
    %70 = vector.broadcast %cst_35 : f32 to vector<8x128xf32>
    %71 = arith.mulf %70, %69 : vector<8x128xf32>
    %72 = math.tanh %71 : vector<8x128xf32>
    %cst_36 = arith.constant 5.000000e-01 : f32
    %73 = vector.broadcast %cst_36 : f32 to vector<8x128xf32>
    %74 = arith.mulf %73, %72 : vector<8x128xf32>
    %cst_37 = arith.constant 5.000000e-01 : f32
    %75 = vector.broadcast %cst_37 : f32 to vector<8x128xf32>
    %76 = arith.addf %74, %75 : vector<8x128xf32>
    %77 = vector.extract_strided_slice %55 {offsets = [0, 256], sizes = [8, 128], strides = [1, 1]} : vector<8x512xf32> to vector<8x128xf32>
    %78 = math.tanh %77 : vector<8x128xf32>
    %79 = vector.extract_strided_slice %55 {offsets = [0, 384], sizes = [8, 128], strides = [1, 1]} : vector<8x512xf32> to vector<8x128xf32>
    %cst_38 = arith.constant 5.000000e-01 : f32
    %80 = vector.broadcast %cst_38 : f32 to vector<8x128xf32>
    %81 = arith.mulf %80, %79 : vector<8x128xf32>
    %82 = math.tanh %81 : vector<8x128xf32>
    %cst_39 = arith.constant 5.000000e-01 : f32
    %83 = vector.broadcast %cst_39 : f32 to vector<8x128xf32>
    %84 = arith.mulf %83, %82 : vector<8x128xf32>
    %cst_40 = arith.constant 5.000000e-01 : f32
    %85 = vector.broadcast %cst_40 : f32 to vector<8x128xf32>
    %86 = arith.addf %84, %85 : vector<8x128xf32>
    %87 = arith.mulf %76, %14 : vector<8x128xf32>
    %88 = arith.mulf %68, %78 : vector<8x128xf32>
    %89 = arith.addf %87, %88 : vector<8x128xf32>
    %90 = math.tanh %89 : vector<8x128xf32>
    %91 = arith.mulf %86, %90 : vector<8x128xf32>
    %92 = vector.extract_strided_slice %60 {offsets = [0, 0], sizes = [8, 128], strides = [1, 1]} : vector<8x512xf32> to vector<8x128xf32>
    %cst_41 = arith.constant 5.000000e-01 : f32
    %93 = vector.broadcast %cst_41 : f32 to vector<8x128xf32>
    %94 = arith.mulf %93, %92 : vector<8x128xf32>
    %95 = math.tanh %94 : vector<8x128xf32>
    %cst_42 = arith.constant 5.000000e-01 : f32
    %96 = vector.broadcast %cst_42 : f32 to vector<8x128xf32>
    %97 = arith.mulf %96, %95 : vector<8x128xf32>
    %cst_43 = arith.constant 5.000000e-01 : f32
    %98 = vector.broadcast %cst_43 : f32 to vector<8x128xf32>
    %99 = arith.addf %97, %98 : vector<8x128xf32>
    %100 = vector.extract_strided_slice %60 {offsets = [0, 128], sizes = [8, 128], strides = [1, 1]} : vector<8x512xf32> to vector<8x128xf32>
    %cst_44 = arith.constant 5.000000e-01 : f32
    %101 = vector.broadcast %cst_44 : f32 to vector<8x128xf32>
    %102 = arith.mulf %101, %100 : vector<8x128xf32>
    %103 = math.tanh %102 : vector<8x128xf32>
    %cst_45 = arith.constant 5.000000e-01 : f32
    %104 = vector.broadcast %cst_45 : f32 to vector<8x128xf32>
    %105 = arith.mulf %104, %103 : vector<8x128xf32>
    %cst_46 = arith.constant 5.000000e-01 : f32
    %106 = vector.broadcast %cst_46 : f32 to vector<8x128xf32>
    %107 = arith.addf %105, %106 : vector<8x128xf32>
    %108 = vector.extract_strided_slice %60 {offsets = [0, 256], sizes = [8, 128], strides = [1, 1]} : vector<8x512xf32> to vector<8x128xf32>
    %109 = math.tanh %108 : vector<8x128xf32>
    %110 = vector.extract_strided_slice %60 {offsets = [0, 384], sizes = [8, 128], strides = [1, 1]} : vector<8x512xf32> to vector<8x128xf32>
    %cst_47 = arith.constant 5.000000e-01 : f32
    %111 = vector.broadcast %cst_47 : f32 to vector<8x128xf32>
    %112 = arith.mulf %111, %110 : vector<8x128xf32>
    %113 = math.tanh %112 : vector<8x128xf32>
    %cst_48 = arith.constant 5.000000e-01 : f32
    %114 = vector.broadcast %cst_48 : f32 to vector<8x128xf32>
    %115 = arith.mulf %114, %113 : vector<8x128xf32>
    %cst_49 = arith.constant 5.000000e-01 : f32
    %116 = vector.broadcast %cst_49 : f32 to vector<8x128xf32>
    %117 = arith.addf %115, %116 : vector<8x128xf32>
    %118 = arith.mulf %107, %48 : vector<8x128xf32>
    %119 = arith.mulf %99, %109 : vector<8x128xf32>
    %120 = arith.addf %118, %119 : vector<8x128xf32>
    %121 = math.tanh %120 : vector<8x128xf32>
    %122 = arith.mulf %117, %121 : vector<8x128xf32>
    %123 = tpu.concatenate %122, %91 in 1 : vector<8x128xf32>, vector<8x128xf32> -> vector<8x256xf32>
    %124 = arith.truncf %123 : vector<8x256xf32> to vector<8x256xbf16>
    %cst_50 = arith.constant dense<0.000000e+00> : vector<8x512xf32>
    %125 = tpu.matmul %124, %11, %cst_50 {dimension_numbers = #tpu.dot_dimension_numbers<[1], [0], [0], [1], [0, 0, 1, 1], [], []>} : vector<8x256xbf16>, vector<256x512xbf16>, vector<8x512xf32> -> vector<8x512xf32>
    %126 = vector.broadcast %12 : vector<1x512xf32> to vector<8x512xf32>
    %127 = arith.addf %125, %126 : vector<8x512xf32>
    %c2 = arith.constant 2 : index
    %c0_51 = arith.constant 0 : index
    %c0_52 = arith.constant 0 : index
    %128 = vector.load %arg10[%c2, %c0_51, %c0_52] : memref<8x8x512xf32, #tpu.memory_space<vmem>>, vector<1x8x512xf32>
    %129 = vector.shape_cast %128 : vector<1x8x512xf32> to vector<8x512xf32>
    %130 = arith.truncf %122 : vector<8x128xf32> to vector<8x128xbf16>
    %cst_53 = arith.constant dense<0.000000e+00> : vector<8x512xf32>
    %131 = tpu.matmul %130, %10, %cst_53 {dimension_numbers = #tpu.dot_dimension_numbers<[1], [0], [0], [1], [0, 0, 1, 1], [], []>} : vector<8x128xbf16>, vector<128x512xbf16>, vector<8x512xf32> -> vector<8x512xf32>
    %132 = arith.addf %129, %131 : vector<8x512xf32>
    %133 = vector.extract_strided_slice %127 {offsets = [0, 0], sizes = [8, 128], strides = [1, 1]} : vector<8x512xf32> to vector<8x128xf32>
    %cst_54 = arith.constant 5.000000e-01 : f32
    %134 = vector.broadcast %cst_54 : f32 to vector<8x128xf32>
    %135 = arith.mulf %134, %133 : vector<8x128xf32>
    %136 = math.tanh %135 : vector<8x128xf32>
    %cst_55 = arith.constant 5.000000e-01 : f32
    %137 = vector.broadcast %cst_55 : f32 to vector<8x128xf32>
    %138 = arith.mulf %137, %136 : vector<8x128xf32>
    %cst_56 = arith.constant 5.000000e-01 : f32
    %139 = vector.broadcast %cst_56 : f32 to vector<8x128xf32>
    %140 = arith.addf %138, %139 : vector<8x128xf32>
    %141 = vector.extract_strided_slice %127 {offsets = [0, 128], sizes = [8, 128], strides = [1, 1]} : vector<8x512xf32> to vector<8x128xf32>
    %cst_57 = arith.constant 5.000000e-01 : f32
    %142 = vector.broadcast %cst_57 : f32 to vector<8x128xf32>
    %143 = arith.mulf %142, %141 : vector<8x128xf32>
    %144 = math.tanh %143 : vector<8x128xf32>
    %cst_58 = arith.constant 5.000000e-01 : f32
    %145 = vector.broadcast %cst_58 : f32 to vector<8x128xf32>
    %146 = arith.mulf %145, %144 : vector<8x128xf32>
    %cst_59 = arith.constant 5.000000e-01 : f32
    %147 = vector.broadcast %cst_59 : f32 to vector<8x128xf32>
    %148 = arith.addf %146, %147 : vector<8x128xf32>
    %149 = vector.extract_strided_slice %127 {offsets = [0, 256], sizes = [8, 128], strides = [1, 1]} : vector<8x512xf32> to vector<8x128xf32>
    %150 = math.tanh %149 : vector<8x128xf32>
    %151 = vector.extract_strided_slice %127 {offsets = [0, 384], sizes = [8, 128], strides = [1, 1]} : vector<8x512xf32> to vector<8x128xf32>
    %cst_60 = arith.constant 5.000000e-01 : f32
    %152 = vector.broadcast %cst_60 : f32 to vector<8x128xf32>
    %153 = arith.mulf %152, %151 : vector<8x128xf32>
    %154 = math.tanh %153 : vector<8x128xf32>
    %cst_61 = arith.constant 5.000000e-01 : f32
    %155 = vector.broadcast %cst_61 : f32 to vector<8x128xf32>
    %156 = arith.mulf %155, %154 : vector<8x128xf32>
    %cst_62 = arith.constant 5.000000e-01 : f32
    %157 = vector.broadcast %cst_62 : f32 to vector<8x128xf32>
    %158 = arith.addf %156, %157 : vector<8x128xf32>
    %159 = arith.mulf %148, %89 : vector<8x128xf32>
    %160 = arith.mulf %140, %150 : vector<8x128xf32>
    %161 = arith.addf %159, %160 : vector<8x128xf32>
    %162 = math.tanh %161 : vector<8x128xf32>
    %163 = arith.mulf %158, %162 : vector<8x128xf32>
    %164 = vector.extract_strided_slice %132 {offsets = [0, 0], sizes = [8, 128], strides = [1, 1]} : vector<8x512xf32> to vector<8x128xf32>
    %cst_63 = arith.constant 5.000000e-01 : f32
    %165 = vector.broadcast %cst_63 : f32 to vector<8x128xf32>
    %166 = arith.mulf %165, %164 : vector<8x128xf32>
    %167 = math.tanh %166 : vector<8x128xf32>
    %cst_64 = arith.constant 5.000000e-01 : f32
    %168 = vector.broadcast %cst_64 : f32 to vector<8x128xf32>
    %169 = arith.mulf %168, %167 : vector<8x128xf32>
    %cst_65 = arith.constant 5.000000e-01 : f32
    %170 = vector.broadcast %cst_65 : f32 to vector<8x128xf32>
    %171 = arith.addf %169, %170 : vector<8x128xf32>
    %172 = vector.extract_strided_slice %132 {offsets = [0, 128], sizes = [8, 128], strides = [1, 1]} : vector<8x512xf32> to vector<8x128xf32>
    %cst_66 = arith.constant 5.000000e-01 : f32
    %173 = vector.broadcast %cst_66 : f32 to vector<8x128xf32>
    %174 = arith.mulf %173, %172 : vector<8x128xf32>
    %175 = math.tanh %174 : vector<8x128xf32>
    %cst_67 = arith.constant 5.000000e-01 : f32
    %176 = vector.broadcast %cst_67 : f32 to vector<8x128xf32>
    %177 = arith.mulf %176, %175 : vector<8x128xf32>
    %cst_68 = arith.constant 5.000000e-01 : f32
    %178 = vector.broadcast %cst_68 : f32 to vector<8x128xf32>
    %179 = arith.addf %177, %178 : vector<8x128xf32>
    %180 = vector.extract_strided_slice %132 {offsets = [0, 256], sizes = [8, 128], strides = [1, 1]} : vector<8x512xf32> to vector<8x128xf32>
    %181 = math.tanh %180 : vector<8x128xf32>
    %182 = vector.extract_strided_slice %132 {offsets = [0, 384], sizes = [8, 128], strides = [1, 1]} : vector<8x512xf32> to vector<8x128xf32>
    %cst_69 = arith.constant 5.000000e-01 : f32
    %183 = vector.broadcast %cst_69 : f32 to vector<8x128xf32>
    %184 = arith.mulf %183, %182 : vector<8x128xf32>
    %185 = math.tanh %184 : vector<8x128xf32>
    %cst_70 = arith.constant 5.000000e-01 : f32
    %186 = vector.broadcast %cst_70 : f32 to vector<8x128xf32>
    %187 = arith.mulf %186, %185 : vector<8x128xf32>
    %cst_71 = arith.constant 5.000000e-01 : f32
    %188 = vector.broadcast %cst_71 : f32 to vector<8x128xf32>
    %189 = arith.addf %187, %188 : vector<8x128xf32>
    %190 = arith.mulf %179, %120 : vector<8x128xf32>
    %191 = arith.mulf %171, %181 : vector<8x128xf32>
    %192 = arith.addf %190, %191 : vector<8x128xf32>
    %193 = math.tanh %192 : vector<8x128xf32>
    %194 = arith.mulf %189, %193 : vector<8x128xf32>
    %195 = tpu.concatenate %194, %163 in 1 : vector<8x128xf32>, vector<8x128xf32> -> vector<8x256xf32>
    %196 = arith.truncf %195 : vector<8x256xf32> to vector<8x256xbf16>
    %cst_72 = arith.constant dense<0.000000e+00> : vector<8x512xf32>
    %197 = tpu.matmul %196, %11, %cst_72 {dimension_numbers = #tpu.dot_dimension_numbers<[1], [0], [0], [1], [0, 0, 1, 1], [], []>} : vector<8x256xbf16>, vector<256x512xbf16>, vector<8x512xf32> -> vector<8x512xf32>
    %198 = vector.broadcast %12 : vector<1x512xf32> to vector<8x512xf32>
    %199 = arith.addf %197, %198 : vector<8x512xf32>
    %c3 = arith.constant 3 : index
    %c0_73 = arith.constant 0 : index
    %c0_74 = arith.constant 0 : index
    %200 = vector.load %arg10[%c3, %c0_73, %c0_74] : memref<8x8x512xf32, #tpu.memory_space<vmem>>, vector<1x8x512xf32>
    %201 = vector.shape_cast %200 : vector<1x8x512xf32> to vector<8x512xf32>
    %202 = arith.truncf %194 : vector<8x128xf32> to vector<8x128xbf16>
    %cst_75 = arith.constant dense<0.000000e+00> : vector<8x512xf32>
    %203 = tpu.matmul %202, %10, %cst_75 {dimension_numbers = #tpu.dot_dimension_numbers<[1], [0], [0], [1], [0, 0, 1, 1], [], []>} : vector<8x128xbf16>, vector<128x512xbf16>, vector<8x512xf32> -> vector<8x512xf32>
    %204 = arith.addf %201, %203 : vector<8x512xf32>
    %205 = vector.extract_strided_slice %199 {offsets = [0, 0], sizes = [8, 128], strides = [1, 1]} : vector<8x512xf32> to vector<8x128xf32>
    %cst_76 = arith.constant 5.000000e-01 : f32
    %206 = vector.broadcast %cst_76 : f32 to vector<8x128xf32>
    %207 = arith.mulf %206, %205 : vector<8x128xf32>
    %208 = math.tanh %207 : vector<8x128xf32>
    %cst_77 = arith.constant 5.000000e-01 : f32
    %209 = vector.broadcast %cst_77 : f32 to vector<8x128xf32>
    %210 = arith.mulf %209, %208 : vector<8x128xf32>
    %cst_78 = arith.constant 5.000000e-01 : f32
    %211 = vector.broadcast %cst_78 : f32 to vector<8x128xf32>
    %212 = arith.addf %210, %211 : vector<8x128xf32>
    %213 = vector.extract_strided_slice %199 {offsets = [0, 128], sizes = [8, 128], strides = [1, 1]} : vector<8x512xf32> to vector<8x128xf32>
    %cst_79 = arith.constant 5.000000e-01 : f32
    %214 = vector.broadcast %cst_79 : f32 to vector<8x128xf32>
    %215 = arith.mulf %214, %213 : vector<8x128xf32>
    %216 = math.tanh %215 : vector<8x128xf32>
    %cst_80 = arith.constant 5.000000e-01 : f32
    %217 = vector.broadcast %cst_80 : f32 to vector<8x128xf32>
    %218 = arith.mulf %217, %216 : vector<8x128xf32>
    %cst_81 = arith.constant 5.000000e-01 : f32
    %219 = vector.broadcast %cst_81 : f32 to vector<8x128xf32>
    %220 = arith.addf %218, %219 : vector<8x128xf32>
    %221 = vector.extract_strided_slice %199 {offsets = [0, 256], sizes = [8, 128], strides = [1, 1]} : vector<8x512xf32> to vector<8x128xf32>
    %222 = math.tanh %221 : vector<8x128xf32>
    %223 = vector.extract_strided_slice %199 {offsets = [0, 384], sizes = [8, 128], strides = [1, 1]} : vector<8x512xf32> to vector<8x128xf32>
    %cst_82 = arith.constant 5.000000e-01 : f32
    %224 = vector.broadcast %cst_82 : f32 to vector<8x128xf32>
    %225 = arith.mulf %224, %223 : vector<8x128xf32>
    %226 = math.tanh %225 : vector<8x128xf32>
    %cst_83 = arith.constant 5.000000e-01 : f32
    %227 = vector.broadcast %cst_83 : f32 to vector<8x128xf32>
    %228 = arith.mulf %227, %226 : vector<8x128xf32>
    %cst_84 = arith.constant 5.000000e-01 : f32
    %229 = vector.broadcast %cst_84 : f32 to vector<8x128xf32>
    %230 = arith.addf %228, %229 : vector<8x128xf32>
    %231 = arith.mulf %220, %161 : vector<8x128xf32>
    %232 = arith.mulf %212, %222 : vector<8x128xf32>
    %233 = arith.addf %231, %232 : vector<8x128xf32>
    %234 = math.tanh %233 : vector<8x128xf32>
    %235 = arith.mulf %230, %234 : vector<8x128xf32>
    %236 = vector.extract_strided_slice %204 {offsets = [0, 0], sizes = [8, 128], strides = [1, 1]} : vector<8x512xf32> to vector<8x128xf32>
    %cst_85 = arith.constant 5.000000e-01 : f32
    %237 = vector.broadcast %cst_85 : f32 to vector<8x128xf32>
    %238 = arith.mulf %237, %236 : vector<8x128xf32>
    %239 = math.tanh %238 : vector<8x128xf32>
    %cst_86 = arith.constant 5.000000e-01 : f32
    %240 = vector.broadcast %cst_86 : f32 to vector<8x128xf32>
    %241 = arith.mulf %240, %239 : vector<8x128xf32>
    %cst_87 = arith.constant 5.000000e-01 : f32
    %242 = vector.broadcast %cst_87 : f32 to vector<8x128xf32>
    %243 = arith.addf %241, %242 : vector<8x128xf32>
    %244 = vector.extract_strided_slice %204 {offsets = [0, 128], sizes = [8, 128], strides = [1, 1]} : vector<8x512xf32> to vector<8x128xf32>
    %cst_88 = arith.constant 5.000000e-01 : f32
    %245 = vector.broadcast %cst_88 : f32 to vector<8x128xf32>
    %246 = arith.mulf %245, %244 : vector<8x128xf32>
    %247 = math.tanh %246 : vector<8x128xf32>
    %cst_89 = arith.constant 5.000000e-01 : f32
    %248 = vector.broadcast %cst_89 : f32 to vector<8x128xf32>
    %249 = arith.mulf %248, %247 : vector<8x128xf32>
    %cst_90 = arith.constant 5.000000e-01 : f32
    %250 = vector.broadcast %cst_90 : f32 to vector<8x128xf32>
    %251 = arith.addf %249, %250 : vector<8x128xf32>
    %252 = vector.extract_strided_slice %204 {offsets = [0, 256], sizes = [8, 128], strides = [1, 1]} : vector<8x512xf32> to vector<8x128xf32>
    %253 = math.tanh %252 : vector<8x128xf32>
    %254 = vector.extract_strided_slice %204 {offsets = [0, 384], sizes = [8, 128], strides = [1, 1]} : vector<8x512xf32> to vector<8x128xf32>
    %cst_91 = arith.constant 5.000000e-01 : f32
    %255 = vector.broadcast %cst_91 : f32 to vector<8x128xf32>
    %256 = arith.mulf %255, %254 : vector<8x128xf32>
    %257 = math.tanh %256 : vector<8x128xf32>
    %cst_92 = arith.constant 5.000000e-01 : f32
    %258 = vector.broadcast %cst_92 : f32 to vector<8x128xf32>
    %259 = arith.mulf %258, %257 : vector<8x128xf32>
    %cst_93 = arith.constant 5.000000e-01 : f32
    %260 = vector.broadcast %cst_93 : f32 to vector<8x128xf32>
    %261 = arith.addf %259, %260 : vector<8x128xf32>
    %262 = arith.mulf %251, %192 : vector<8x128xf32>
    %263 = arith.mulf %243, %253 : vector<8x128xf32>
    %264 = arith.addf %262, %263 : vector<8x128xf32>
    %265 = math.tanh %264 : vector<8x128xf32>
    %266 = arith.mulf %261, %265 : vector<8x128xf32>
    %267 = tpu.concatenate %266, %235 in 1 : vector<8x128xf32>, vector<8x128xf32> -> vector<8x256xf32>
    %268 = arith.truncf %267 : vector<8x256xf32> to vector<8x256xbf16>
    %cst_94 = arith.constant dense<0.000000e+00> : vector<8x512xf32>
    %269 = tpu.matmul %268, %11, %cst_94 {dimension_numbers = #tpu.dot_dimension_numbers<[1], [0], [0], [1], [0, 0, 1, 1], [], []>} : vector<8x256xbf16>, vector<256x512xbf16>, vector<8x512xf32> -> vector<8x512xf32>
    %270 = vector.broadcast %12 : vector<1x512xf32> to vector<8x512xf32>
    %271 = arith.addf %269, %270 : vector<8x512xf32>
    %c4 = arith.constant 4 : index
    %c0_95 = arith.constant 0 : index
    %c0_96 = arith.constant 0 : index
    %272 = vector.load %arg10[%c4, %c0_95, %c0_96] : memref<8x8x512xf32, #tpu.memory_space<vmem>>, vector<1x8x512xf32>
    %273 = vector.shape_cast %272 : vector<1x8x512xf32> to vector<8x512xf32>
    %274 = arith.truncf %266 : vector<8x128xf32> to vector<8x128xbf16>
    %cst_97 = arith.constant dense<0.000000e+00> : vector<8x512xf32>
    %275 = tpu.matmul %274, %10, %cst_97 {dimension_numbers = #tpu.dot_dimension_numbers<[1], [0], [0], [1], [0, 0, 1, 1], [], []>} : vector<8x128xbf16>, vector<128x512xbf16>, vector<8x512xf32> -> vector<8x512xf32>
    %276 = arith.addf %273, %275 : vector<8x512xf32>
    %277 = vector.extract_strided_slice %271 {offsets = [0, 0], sizes = [8, 128], strides = [1, 1]} : vector<8x512xf32> to vector<8x128xf32>
    %cst_98 = arith.constant 5.000000e-01 : f32
    %278 = vector.broadcast %cst_98 : f32 to vector<8x128xf32>
    %279 = arith.mulf %278, %277 : vector<8x128xf32>
    %280 = math.tanh %279 : vector<8x128xf32>
    %cst_99 = arith.constant 5.000000e-01 : f32
    %281 = vector.broadcast %cst_99 : f32 to vector<8x128xf32>
    %282 = arith.mulf %281, %280 : vector<8x128xf32>
    %cst_100 = arith.constant 5.000000e-01 : f32
    %283 = vector.broadcast %cst_100 : f32 to vector<8x128xf32>
    %284 = arith.addf %282, %283 : vector<8x128xf32>
    %285 = vector.extract_strided_slice %271 {offsets = [0, 128], sizes = [8, 128], strides = [1, 1]} : vector<8x512xf32> to vector<8x128xf32>
    %cst_101 = arith.constant 5.000000e-01 : f32
    %286 = vector.broadcast %cst_101 : f32 to vector<8x128xf32>
    %287 = arith.mulf %286, %285 : vector<8x128xf32>
    %288 = math.tanh %287 : vector<8x128xf32>
    %cst_102 = arith.constant 5.000000e-01 : f32
    %289 = vector.broadcast %cst_102 : f32 to vector<8x128xf32>
    %290 = arith.mulf %289, %288 : vector<8x128xf32>
    %cst_103 = arith.constant 5.000000e-01 : f32
    %291 = vector.broadcast %cst_103 : f32 to vector<8x128xf32>
    %292 = arith.addf %290, %291 : vector<8x128xf32>
    %293 = vector.extract_strided_slice %271 {offsets = [0, 256], sizes = [8, 128], strides = [1, 1]} : vector<8x512xf32> to vector<8x128xf32>
    %294 = math.tanh %293 : vector<8x128xf32>
    %295 = vector.extract_strided_slice %271 {offsets = [0, 384], sizes = [8, 128], strides = [1, 1]} : vector<8x512xf32> to vector<8x128xf32>
    %cst_104 = arith.constant 5.000000e-01 : f32
    %296 = vector.broadcast %cst_104 : f32 to vector<8x128xf32>
    %297 = arith.mulf %296, %295 : vector<8x128xf32>
    %298 = math.tanh %297 : vector<8x128xf32>
    %cst_105 = arith.constant 5.000000e-01 : f32
    %299 = vector.broadcast %cst_105 : f32 to vector<8x128xf32>
    %300 = arith.mulf %299, %298 : vector<8x128xf32>
    %cst_106 = arith.constant 5.000000e-01 : f32
    %301 = vector.broadcast %cst_106 : f32 to vector<8x128xf32>
    %302 = arith.addf %300, %301 : vector<8x128xf32>
    %303 = arith.mulf %292, %233 : vector<8x128xf32>
    %304 = arith.mulf %284, %294 : vector<8x128xf32>
    %305 = arith.addf %303, %304 : vector<8x128xf32>
    %306 = math.tanh %305 : vector<8x128xf32>
    %307 = arith.mulf %302, %306 : vector<8x128xf32>
    %308 = vector.extract_strided_slice %276 {offsets = [0, 0], sizes = [8, 128], strides = [1, 1]} : vector<8x512xf32> to vector<8x128xf32>
    %cst_107 = arith.constant 5.000000e-01 : f32
    %309 = vector.broadcast %cst_107 : f32 to vector<8x128xf32>
    %310 = arith.mulf %309, %308 : vector<8x128xf32>
    %311 = math.tanh %310 : vector<8x128xf32>
    %cst_108 = arith.constant 5.000000e-01 : f32
    %312 = vector.broadcast %cst_108 : f32 to vector<8x128xf32>
    %313 = arith.mulf %312, %311 : vector<8x128xf32>
    %cst_109 = arith.constant 5.000000e-01 : f32
    %314 = vector.broadcast %cst_109 : f32 to vector<8x128xf32>
    %315 = arith.addf %313, %314 : vector<8x128xf32>
    %316 = vector.extract_strided_slice %276 {offsets = [0, 128], sizes = [8, 128], strides = [1, 1]} : vector<8x512xf32> to vector<8x128xf32>
    %cst_110 = arith.constant 5.000000e-01 : f32
    %317 = vector.broadcast %cst_110 : f32 to vector<8x128xf32>
    %318 = arith.mulf %317, %316 : vector<8x128xf32>
    %319 = math.tanh %318 : vector<8x128xf32>
    %cst_111 = arith.constant 5.000000e-01 : f32
    %320 = vector.broadcast %cst_111 : f32 to vector<8x128xf32>
    %321 = arith.mulf %320, %319 : vector<8x128xf32>
    %cst_112 = arith.constant 5.000000e-01 : f32
    %322 = vector.broadcast %cst_112 : f32 to vector<8x128xf32>
    %323 = arith.addf %321, %322 : vector<8x128xf32>
    %324 = vector.extract_strided_slice %276 {offsets = [0, 256], sizes = [8, 128], strides = [1, 1]} : vector<8x512xf32> to vector<8x128xf32>
    %325 = math.tanh %324 : vector<8x128xf32>
    %326 = vector.extract_strided_slice %276 {offsets = [0, 384], sizes = [8, 128], strides = [1, 1]} : vector<8x512xf32> to vector<8x128xf32>
    %cst_113 = arith.constant 5.000000e-01 : f32
    %327 = vector.broadcast %cst_113 : f32 to vector<8x128xf32>
    %328 = arith.mulf %327, %326 : vector<8x128xf32>
    %329 = math.tanh %328 : vector<8x128xf32>
    %cst_114 = arith.constant 5.000000e-01 : f32
    %330 = vector.broadcast %cst_114 : f32 to vector<8x128xf32>
    %331 = arith.mulf %330, %329 : vector<8x128xf32>
    %cst_115 = arith.constant 5.000000e-01 : f32
    %332 = vector.broadcast %cst_115 : f32 to vector<8x128xf32>
    %333 = arith.addf %331, %332 : vector<8x128xf32>
    %334 = arith.mulf %323, %264 : vector<8x128xf32>
    %335 = arith.mulf %315, %325 : vector<8x128xf32>
    %336 = arith.addf %334, %335 : vector<8x128xf32>
    %337 = math.tanh %336 : vector<8x128xf32>
    %338 = arith.mulf %333, %337 : vector<8x128xf32>
    %339 = tpu.concatenate %338, %307 in 1 : vector<8x128xf32>, vector<8x128xf32> -> vector<8x256xf32>
    %340 = arith.truncf %339 : vector<8x256xf32> to vector<8x256xbf16>
    %cst_116 = arith.constant dense<0.000000e+00> : vector<8x512xf32>
    %341 = tpu.matmul %340, %11, %cst_116 {dimension_numbers = #tpu.dot_dimension_numbers<[1], [0], [0], [1], [0, 0, 1, 1], [], []>} : vector<8x256xbf16>, vector<256x512xbf16>, vector<8x512xf32> -> vector<8x512xf32>
    %342 = vector.broadcast %12 : vector<1x512xf32> to vector<8x512xf32>
    %343 = arith.addf %341, %342 : vector<8x512xf32>
    %c5 = arith.constant 5 : index
    %c0_117 = arith.constant 0 : index
    %c0_118 = arith.constant 0 : index
    %344 = vector.load %arg10[%c5, %c0_117, %c0_118] : memref<8x8x512xf32, #tpu.memory_space<vmem>>, vector<1x8x512xf32>
    %345 = vector.shape_cast %344 : vector<1x8x512xf32> to vector<8x512xf32>
    %346 = arith.truncf %338 : vector<8x128xf32> to vector<8x128xbf16>
    %cst_119 = arith.constant dense<0.000000e+00> : vector<8x512xf32>
    %347 = tpu.matmul %346, %10, %cst_119 {dimension_numbers = #tpu.dot_dimension_numbers<[1], [0], [0], [1], [0, 0, 1, 1], [], []>} : vector<8x128xbf16>, vector<128x512xbf16>, vector<8x512xf32> -> vector<8x512xf32>
    %348 = arith.addf %345, %347 : vector<8x512xf32>
    %349 = vector.extract_strided_slice %343 {offsets = [0, 0], sizes = [8, 128], strides = [1, 1]} : vector<8x512xf32> to vector<8x128xf32>
    %cst_120 = arith.constant 5.000000e-01 : f32
    %350 = vector.broadcast %cst_120 : f32 to vector<8x128xf32>
    %351 = arith.mulf %350, %349 : vector<8x128xf32>
    %352 = math.tanh %351 : vector<8x128xf32>
    %cst_121 = arith.constant 5.000000e-01 : f32
    %353 = vector.broadcast %cst_121 : f32 to vector<8x128xf32>
    %354 = arith.mulf %353, %352 : vector<8x128xf32>
    %cst_122 = arith.constant 5.000000e-01 : f32
    %355 = vector.broadcast %cst_122 : f32 to vector<8x128xf32>
    %356 = arith.addf %354, %355 : vector<8x128xf32>
    %357 = vector.extract_strided_slice %343 {offsets = [0, 128], sizes = [8, 128], strides = [1, 1]} : vector<8x512xf32> to vector<8x128xf32>
    %cst_123 = arith.constant 5.000000e-01 : f32
    %358 = vector.broadcast %cst_123 : f32 to vector<8x128xf32>
    %359 = arith.mulf %358, %357 : vector<8x128xf32>
    %360 = math.tanh %359 : vector<8x128xf32>
    %cst_124 = arith.constant 5.000000e-01 : f32
    %361 = vector.broadcast %cst_124 : f32 to vector<8x128xf32>
    %362 = arith.mulf %361, %360 : vector<8x128xf32>
    %cst_125 = arith.constant 5.000000e-01 : f32
    %363 = vector.broadcast %cst_125 : f32 to vector<8x128xf32>
    %364 = arith.addf %362, %363 : vector<8x128xf32>
    %365 = vector.extract_strided_slice %343 {offsets = [0, 256], sizes = [8, 128], strides = [1, 1]} : vector<8x512xf32> to vector<8x128xf32>
    %366 = math.tanh %365 : vector<8x128xf32>
    %367 = vector.extract_strided_slice %343 {offsets = [0, 384], sizes = [8, 128], strides = [1, 1]} : vector<8x512xf32> to vector<8x128xf32>
    %cst_126 = arith.constant 5.000000e-01 : f32
    %368 = vector.broadcast %cst_126 : f32 to vector<8x128xf32>
    %369 = arith.mulf %368, %367 : vector<8x128xf32>
    %370 = math.tanh %369 : vector<8x128xf32>
    %cst_127 = arith.constant 5.000000e-01 : f32
    %371 = vector.broadcast %cst_127 : f32 to vector<8x128xf32>
    %372 = arith.mulf %371, %370 : vector<8x128xf32>
    %cst_128 = arith.constant 5.000000e-01 : f32
    %373 = vector.broadcast %cst_128 : f32 to vector<8x128xf32>
    %374 = arith.addf %372, %373 : vector<8x128xf32>
    %375 = arith.mulf %364, %305 : vector<8x128xf32>
    %376 = arith.mulf %356, %366 : vector<8x128xf32>
    %377 = arith.addf %375, %376 : vector<8x128xf32>
    %378 = math.tanh %377 : vector<8x128xf32>
    %379 = arith.mulf %374, %378 : vector<8x128xf32>
    %380 = vector.extract_strided_slice %348 {offsets = [0, 0], sizes = [8, 128], strides = [1, 1]} : vector<8x512xf32> to vector<8x128xf32>
    %cst_129 = arith.constant 5.000000e-01 : f32
    %381 = vector.broadcast %cst_129 : f32 to vector<8x128xf32>
    %382 = arith.mulf %381, %380 : vector<8x128xf32>
    %383 = math.tanh %382 : vector<8x128xf32>
    %cst_130 = arith.constant 5.000000e-01 : f32
    %384 = vector.broadcast %cst_130 : f32 to vector<8x128xf32>
    %385 = arith.mulf %384, %383 : vector<8x128xf32>
    %cst_131 = arith.constant 5.000000e-01 : f32
    %386 = vector.broadcast %cst_131 : f32 to vector<8x128xf32>
    %387 = arith.addf %385, %386 : vector<8x128xf32>
    %388 = vector.extract_strided_slice %348 {offsets = [0, 128], sizes = [8, 128], strides = [1, 1]} : vector<8x512xf32> to vector<8x128xf32>
    %cst_132 = arith.constant 5.000000e-01 : f32
    %389 = vector.broadcast %cst_132 : f32 to vector<8x128xf32>
    %390 = arith.mulf %389, %388 : vector<8x128xf32>
    %391 = math.tanh %390 : vector<8x128xf32>
    %cst_133 = arith.constant 5.000000e-01 : f32
    %392 = vector.broadcast %cst_133 : f32 to vector<8x128xf32>
    %393 = arith.mulf %392, %391 : vector<8x128xf32>
    %cst_134 = arith.constant 5.000000e-01 : f32
    %394 = vector.broadcast %cst_134 : f32 to vector<8x128xf32>
    %395 = arith.addf %393, %394 : vector<8x128xf32>
    %396 = vector.extract_strided_slice %348 {offsets = [0, 256], sizes = [8, 128], strides = [1, 1]} : vector<8x512xf32> to vector<8x128xf32>
    %397 = math.tanh %396 : vector<8x128xf32>
    %398 = vector.extract_strided_slice %348 {offsets = [0, 384], sizes = [8, 128], strides = [1, 1]} : vector<8x512xf32> to vector<8x128xf32>
    %cst_135 = arith.constant 5.000000e-01 : f32
    %399 = vector.broadcast %cst_135 : f32 to vector<8x128xf32>
    %400 = arith.mulf %399, %398 : vector<8x128xf32>
    %401 = math.tanh %400 : vector<8x128xf32>
    %cst_136 = arith.constant 5.000000e-01 : f32
    %402 = vector.broadcast %cst_136 : f32 to vector<8x128xf32>
    %403 = arith.mulf %402, %401 : vector<8x128xf32>
    %cst_137 = arith.constant 5.000000e-01 : f32
    %404 = vector.broadcast %cst_137 : f32 to vector<8x128xf32>
    %405 = arith.addf %403, %404 : vector<8x128xf32>
    %406 = arith.mulf %395, %336 : vector<8x128xf32>
    %407 = arith.mulf %387, %397 : vector<8x128xf32>
    %408 = arith.addf %406, %407 : vector<8x128xf32>
    %409 = math.tanh %408 : vector<8x128xf32>
    %410 = arith.mulf %405, %409 : vector<8x128xf32>
    %411 = tpu.concatenate %410, %379 in 1 : vector<8x128xf32>, vector<8x128xf32> -> vector<8x256xf32>
    %412 = arith.truncf %411 : vector<8x256xf32> to vector<8x256xbf16>
    %cst_138 = arith.constant dense<0.000000e+00> : vector<8x512xf32>
    %413 = tpu.matmul %412, %11, %cst_138 {dimension_numbers = #tpu.dot_dimension_numbers<[1], [0], [0], [1], [0, 0, 1, 1], [], []>} : vector<8x256xbf16>, vector<256x512xbf16>, vector<8x512xf32> -> vector<8x512xf32>
    %414 = vector.broadcast %12 : vector<1x512xf32> to vector<8x512xf32>
    %415 = arith.addf %413, %414 : vector<8x512xf32>
    %c6 = arith.constant 6 : index
    %c0_139 = arith.constant 0 : index
    %c0_140 = arith.constant 0 : index
    %416 = vector.load %arg10[%c6, %c0_139, %c0_140] : memref<8x8x512xf32, #tpu.memory_space<vmem>>, vector<1x8x512xf32>
    %417 = vector.shape_cast %416 : vector<1x8x512xf32> to vector<8x512xf32>
    %418 = arith.truncf %410 : vector<8x128xf32> to vector<8x128xbf16>
    %cst_141 = arith.constant dense<0.000000e+00> : vector<8x512xf32>
    %419 = tpu.matmul %418, %10, %cst_141 {dimension_numbers = #tpu.dot_dimension_numbers<[1], [0], [0], [1], [0, 0, 1, 1], [], []>} : vector<8x128xbf16>, vector<128x512xbf16>, vector<8x512xf32> -> vector<8x512xf32>
    %420 = arith.addf %417, %419 : vector<8x512xf32>
    %421 = vector.extract_strided_slice %415 {offsets = [0, 0], sizes = [8, 128], strides = [1, 1]} : vector<8x512xf32> to vector<8x128xf32>
    %cst_142 = arith.constant 5.000000e-01 : f32
    %422 = vector.broadcast %cst_142 : f32 to vector<8x128xf32>
    %423 = arith.mulf %422, %421 : vector<8x128xf32>
    %424 = math.tanh %423 : vector<8x128xf32>
    %cst_143 = arith.constant 5.000000e-01 : f32
    %425 = vector.broadcast %cst_143 : f32 to vector<8x128xf32>
    %426 = arith.mulf %425, %424 : vector<8x128xf32>
    %cst_144 = arith.constant 5.000000e-01 : f32
    %427 = vector.broadcast %cst_144 : f32 to vector<8x128xf32>
    %428 = arith.addf %426, %427 : vector<8x128xf32>
    %429 = vector.extract_strided_slice %415 {offsets = [0, 128], sizes = [8, 128], strides = [1, 1]} : vector<8x512xf32> to vector<8x128xf32>
    %cst_145 = arith.constant 5.000000e-01 : f32
    %430 = vector.broadcast %cst_145 : f32 to vector<8x128xf32>
    %431 = arith.mulf %430, %429 : vector<8x128xf32>
    %432 = math.tanh %431 : vector<8x128xf32>
    %cst_146 = arith.constant 5.000000e-01 : f32
    %433 = vector.broadcast %cst_146 : f32 to vector<8x128xf32>
    %434 = arith.mulf %433, %432 : vector<8x128xf32>
    %cst_147 = arith.constant 5.000000e-01 : f32
    %435 = vector.broadcast %cst_147 : f32 to vector<8x128xf32>
    %436 = arith.addf %434, %435 : vector<8x128xf32>
    %437 = vector.extract_strided_slice %415 {offsets = [0, 256], sizes = [8, 128], strides = [1, 1]} : vector<8x512xf32> to vector<8x128xf32>
    %438 = math.tanh %437 : vector<8x128xf32>
    %439 = vector.extract_strided_slice %415 {offsets = [0, 384], sizes = [8, 128], strides = [1, 1]} : vector<8x512xf32> to vector<8x128xf32>
    %cst_148 = arith.constant 5.000000e-01 : f32
    %440 = vector.broadcast %cst_148 : f32 to vector<8x128xf32>
    %441 = arith.mulf %440, %439 : vector<8x128xf32>
    %442 = math.tanh %441 : vector<8x128xf32>
    %cst_149 = arith.constant 5.000000e-01 : f32
    %443 = vector.broadcast %cst_149 : f32 to vector<8x128xf32>
    %444 = arith.mulf %443, %442 : vector<8x128xf32>
    %cst_150 = arith.constant 5.000000e-01 : f32
    %445 = vector.broadcast %cst_150 : f32 to vector<8x128xf32>
    %446 = arith.addf %444, %445 : vector<8x128xf32>
    %447 = arith.mulf %436, %377 : vector<8x128xf32>
    %448 = arith.mulf %428, %438 : vector<8x128xf32>
    %449 = arith.addf %447, %448 : vector<8x128xf32>
    %450 = math.tanh %449 : vector<8x128xf32>
    %451 = arith.mulf %446, %450 : vector<8x128xf32>
    %452 = vector.extract_strided_slice %420 {offsets = [0, 0], sizes = [8, 128], strides = [1, 1]} : vector<8x512xf32> to vector<8x128xf32>
    %cst_151 = arith.constant 5.000000e-01 : f32
    %453 = vector.broadcast %cst_151 : f32 to vector<8x128xf32>
    %454 = arith.mulf %453, %452 : vector<8x128xf32>
    %455 = math.tanh %454 : vector<8x128xf32>
    %cst_152 = arith.constant 5.000000e-01 : f32
    %456 = vector.broadcast %cst_152 : f32 to vector<8x128xf32>
    %457 = arith.mulf %456, %455 : vector<8x128xf32>
    %cst_153 = arith.constant 5.000000e-01 : f32
    %458 = vector.broadcast %cst_153 : f32 to vector<8x128xf32>
    %459 = arith.addf %457, %458 : vector<8x128xf32>
    %460 = vector.extract_strided_slice %420 {offsets = [0, 128], sizes = [8, 128], strides = [1, 1]} : vector<8x512xf32> to vector<8x128xf32>
    %cst_154 = arith.constant 5.000000e-01 : f32
    %461 = vector.broadcast %cst_154 : f32 to vector<8x128xf32>
    %462 = arith.mulf %461, %460 : vector<8x128xf32>
    %463 = math.tanh %462 : vector<8x128xf32>
    %cst_155 = arith.constant 5.000000e-01 : f32
    %464 = vector.broadcast %cst_155 : f32 to vector<8x128xf32>
    %465 = arith.mulf %464, %463 : vector<8x128xf32>
    %cst_156 = arith.constant 5.000000e-01 : f32
    %466 = vector.broadcast %cst_156 : f32 to vector<8x128xf32>
    %467 = arith.addf %465, %466 : vector<8x128xf32>
    %468 = vector.extract_strided_slice %420 {offsets = [0, 256], sizes = [8, 128], strides = [1, 1]} : vector<8x512xf32> to vector<8x128xf32>
    %469 = math.tanh %468 : vector<8x128xf32>
    %470 = vector.extract_strided_slice %420 {offsets = [0, 384], sizes = [8, 128], strides = [1, 1]} : vector<8x512xf32> to vector<8x128xf32>
    %cst_157 = arith.constant 5.000000e-01 : f32
    %471 = vector.broadcast %cst_157 : f32 to vector<8x128xf32>
    %472 = arith.mulf %471, %470 : vector<8x128xf32>
    %473 = math.tanh %472 : vector<8x128xf32>
    %cst_158 = arith.constant 5.000000e-01 : f32
    %474 = vector.broadcast %cst_158 : f32 to vector<8x128xf32>
    %475 = arith.mulf %474, %473 : vector<8x128xf32>
    %cst_159 = arith.constant 5.000000e-01 : f32
    %476 = vector.broadcast %cst_159 : f32 to vector<8x128xf32>
    %477 = arith.addf %475, %476 : vector<8x128xf32>
    %478 = arith.mulf %467, %408 : vector<8x128xf32>
    %479 = arith.mulf %459, %469 : vector<8x128xf32>
    %480 = arith.addf %478, %479 : vector<8x128xf32>
    %481 = math.tanh %480 : vector<8x128xf32>
    %482 = arith.mulf %477, %481 : vector<8x128xf32>
    %483 = tpu.concatenate %482, %451 in 1 : vector<8x128xf32>, vector<8x128xf32> -> vector<8x256xf32>
    %484 = arith.truncf %483 : vector<8x256xf32> to vector<8x256xbf16>
    %cst_160 = arith.constant dense<0.000000e+00> : vector<8x512xf32>
    %485 = tpu.matmul %484, %11, %cst_160 {dimension_numbers = #tpu.dot_dimension_numbers<[1], [0], [0], [1], [0, 0, 1, 1], [], []>} : vector<8x256xbf16>, vector<256x512xbf16>, vector<8x512xf32> -> vector<8x512xf32>
    %486 = vector.broadcast %12 : vector<1x512xf32> to vector<8x512xf32>
    %487 = arith.addf %485, %486 : vector<8x512xf32>
    %c7 = arith.constant 7 : index
    %c0_161 = arith.constant 0 : index
    %c0_162 = arith.constant 0 : index
    %488 = vector.load %arg10[%c7, %c0_161, %c0_162] : memref<8x8x512xf32, #tpu.memory_space<vmem>>, vector<1x8x512xf32>
    %489 = vector.shape_cast %488 : vector<1x8x512xf32> to vector<8x512xf32>
    %490 = arith.truncf %482 : vector<8x128xf32> to vector<8x128xbf16>
    %cst_163 = arith.constant dense<0.000000e+00> : vector<8x512xf32>
    %491 = tpu.matmul %490, %10, %cst_163 {dimension_numbers = #tpu.dot_dimension_numbers<[1], [0], [0], [1], [0, 0, 1, 1], [], []>} : vector<8x128xbf16>, vector<128x512xbf16>, vector<8x512xf32> -> vector<8x512xf32>
    %492 = arith.addf %489, %491 : vector<8x512xf32>
    %493 = vector.extract_strided_slice %487 {offsets = [0, 0], sizes = [8, 128], strides = [1, 1]} : vector<8x512xf32> to vector<8x128xf32>
    %cst_164 = arith.constant 5.000000e-01 : f32
    %494 = vector.broadcast %cst_164 : f32 to vector<8x128xf32>
    %495 = arith.mulf %494, %493 : vector<8x128xf32>
    %496 = math.tanh %495 : vector<8x128xf32>
    %cst_165 = arith.constant 5.000000e-01 : f32
    %497 = vector.broadcast %cst_165 : f32 to vector<8x128xf32>
    %498 = arith.mulf %497, %496 : vector<8x128xf32>
    %cst_166 = arith.constant 5.000000e-01 : f32
    %499 = vector.broadcast %cst_166 : f32 to vector<8x128xf32>
    %500 = arith.addf %498, %499 : vector<8x128xf32>
    %501 = vector.extract_strided_slice %487 {offsets = [0, 128], sizes = [8, 128], strides = [1, 1]} : vector<8x512xf32> to vector<8x128xf32>
    %cst_167 = arith.constant 5.000000e-01 : f32
    %502 = vector.broadcast %cst_167 : f32 to vector<8x128xf32>
    %503 = arith.mulf %502, %501 : vector<8x128xf32>
    %504 = math.tanh %503 : vector<8x128xf32>
    %cst_168 = arith.constant 5.000000e-01 : f32
    %505 = vector.broadcast %cst_168 : f32 to vector<8x128xf32>
    %506 = arith.mulf %505, %504 : vector<8x128xf32>
    %cst_169 = arith.constant 5.000000e-01 : f32
    %507 = vector.broadcast %cst_169 : f32 to vector<8x128xf32>
    %508 = arith.addf %506, %507 : vector<8x128xf32>
    %509 = vector.extract_strided_slice %487 {offsets = [0, 256], sizes = [8, 128], strides = [1, 1]} : vector<8x512xf32> to vector<8x128xf32>
    %510 = math.tanh %509 : vector<8x128xf32>
    %511 = vector.extract_strided_slice %487 {offsets = [0, 384], sizes = [8, 128], strides = [1, 1]} : vector<8x512xf32> to vector<8x128xf32>
    %cst_170 = arith.constant 5.000000e-01 : f32
    %512 = vector.broadcast %cst_170 : f32 to vector<8x128xf32>
    %513 = arith.mulf %512, %511 : vector<8x128xf32>
    %514 = math.tanh %513 : vector<8x128xf32>
    %cst_171 = arith.constant 5.000000e-01 : f32
    %515 = vector.broadcast %cst_171 : f32 to vector<8x128xf32>
    %516 = arith.mulf %515, %514 : vector<8x128xf32>
    %cst_172 = arith.constant 5.000000e-01 : f32
    %517 = vector.broadcast %cst_172 : f32 to vector<8x128xf32>
    %518 = arith.addf %516, %517 : vector<8x128xf32>
    %519 = arith.mulf %508, %449 : vector<8x128xf32>
    %520 = arith.mulf %500, %510 : vector<8x128xf32>
    %521 = arith.addf %519, %520 : vector<8x128xf32>
    %522 = math.tanh %521 : vector<8x128xf32>
    %523 = arith.mulf %518, %522 : vector<8x128xf32>
    %524 = vector.extract_strided_slice %492 {offsets = [0, 0], sizes = [8, 128], strides = [1, 1]} : vector<8x512xf32> to vector<8x128xf32>
    %cst_173 = arith.constant 5.000000e-01 : f32
    %525 = vector.broadcast %cst_173 : f32 to vector<8x128xf32>
    %526 = arith.mulf %525, %524 : vector<8x128xf32>
    %527 = math.tanh %526 : vector<8x128xf32>
    %cst_174 = arith.constant 5.000000e-01 : f32
    %528 = vector.broadcast %cst_174 : f32 to vector<8x128xf32>
    %529 = arith.mulf %528, %527 : vector<8x128xf32>
    %cst_175 = arith.constant 5.000000e-01 : f32
    %530 = vector.broadcast %cst_175 : f32 to vector<8x128xf32>
    %531 = arith.addf %529, %530 : vector<8x128xf32>
    %532 = vector.extract_strided_slice %492 {offsets = [0, 128], sizes = [8, 128], strides = [1, 1]} : vector<8x512xf32> to vector<8x128xf32>
    %cst_176 = arith.constant 5.000000e-01 : f32
    %533 = vector.broadcast %cst_176 : f32 to vector<8x128xf32>
    %534 = arith.mulf %533, %532 : vector<8x128xf32>
    %535 = math.tanh %534 : vector<8x128xf32>
    %cst_177 = arith.constant 5.000000e-01 : f32
    %536 = vector.broadcast %cst_177 : f32 to vector<8x128xf32>
    %537 = arith.mulf %536, %535 : vector<8x128xf32>
    %cst_178 = arith.constant 5.000000e-01 : f32
    %538 = vector.broadcast %cst_178 : f32 to vector<8x128xf32>
    %539 = arith.addf %537, %538 : vector<8x128xf32>
    %540 = vector.extract_strided_slice %492 {offsets = [0, 256], sizes = [8, 128], strides = [1, 1]} : vector<8x512xf32> to vector<8x128xf32>
    %541 = math.tanh %540 : vector<8x128xf32>
    %542 = vector.extract_strided_slice %492 {offsets = [0, 384], sizes = [8, 128], strides = [1, 1]} : vector<8x512xf32> to vector<8x128xf32>
    %cst_179 = arith.constant 5.000000e-01 : f32
    %543 = vector.broadcast %cst_179 : f32 to vector<8x128xf32>
    %544 = arith.mulf %543, %542 : vector<8x128xf32>
    %545 = math.tanh %544 : vector<8x128xf32>
    %cst_180 = arith.constant 5.000000e-01 : f32
    %546 = vector.broadcast %cst_180 : f32 to vector<8x128xf32>
    %547 = arith.mulf %546, %545 : vector<8x128xf32>
    %cst_181 = arith.constant 5.000000e-01 : f32
    %548 = vector.broadcast %cst_181 : f32 to vector<8x128xf32>
    %549 = arith.addf %547, %548 : vector<8x128xf32>
    %550 = arith.mulf %539, %480 : vector<8x128xf32>
    %551 = arith.mulf %531, %541 : vector<8x128xf32>
    %552 = arith.addf %550, %551 : vector<8x128xf32>
    %553 = math.tanh %552 : vector<8x128xf32>
    %554 = arith.mulf %549, %553 : vector<8x128xf32>
    %555 = tpu.concatenate %554, %523 in 1 : vector<8x128xf32>, vector<8x128xf32> -> vector<8x256xf32>
    %556 = arith.truncf %555 : vector<8x256xf32> to vector<8x256xbf16>
    %cst_182 = arith.constant dense<0.000000e+00> : vector<8x512xf32>
    %557 = tpu.matmul %556, %11, %cst_182 {dimension_numbers = #tpu.dot_dimension_numbers<[1], [0], [0], [1], [0, 0, 1, 1], [], []>} : vector<8x256xbf16>, vector<256x512xbf16>, vector<8x512xf32> -> vector<8x512xf32>
    %558 = vector.broadcast %12 : vector<1x512xf32> to vector<8x512xf32>
    %559 = arith.addf %557, %558 : vector<8x512xf32>
    %560 = vector.extract_strided_slice %559 {offsets = [0, 0], sizes = [8, 128], strides = [1, 1]} : vector<8x512xf32> to vector<8x128xf32>
    %cst_183 = arith.constant 5.000000e-01 : f32
    %561 = vector.broadcast %cst_183 : f32 to vector<8x128xf32>
    %562 = arith.mulf %561, %560 : vector<8x128xf32>
    %563 = math.tanh %562 : vector<8x128xf32>
    %cst_184 = arith.constant 5.000000e-01 : f32
    %564 = vector.broadcast %cst_184 : f32 to vector<8x128xf32>
    %565 = arith.mulf %564, %563 : vector<8x128xf32>
    %cst_185 = arith.constant 5.000000e-01 : f32
    %566 = vector.broadcast %cst_185 : f32 to vector<8x128xf32>
    %567 = arith.addf %565, %566 : vector<8x128xf32>
    %568 = vector.extract_strided_slice %559 {offsets = [0, 128], sizes = [8, 128], strides = [1, 1]} : vector<8x512xf32> to vector<8x128xf32>
    %cst_186 = arith.constant 5.000000e-01 : f32
    %569 = vector.broadcast %cst_186 : f32 to vector<8x128xf32>
    %570 = arith.mulf %569, %568 : vector<8x128xf32>
    %571 = math.tanh %570 : vector<8x128xf32>
    %cst_187 = arith.constant 5.000000e-01 : f32
    %572 = vector.broadcast %cst_187 : f32 to vector<8x128xf32>
    %573 = arith.mulf %572, %571 : vector<8x128xf32>
    %cst_188 = arith.constant 5.000000e-01 : f32
    %574 = vector.broadcast %cst_188 : f32 to vector<8x128xf32>
    %575 = arith.addf %573, %574 : vector<8x128xf32>
    %576 = vector.extract_strided_slice %559 {offsets = [0, 256], sizes = [8, 128], strides = [1, 1]} : vector<8x512xf32> to vector<8x128xf32>
    %577 = math.tanh %576 : vector<8x128xf32>
    %578 = vector.extract_strided_slice %559 {offsets = [0, 384], sizes = [8, 128], strides = [1, 1]} : vector<8x512xf32> to vector<8x128xf32>
    %cst_189 = arith.constant 5.000000e-01 : f32
    %579 = vector.broadcast %cst_189 : f32 to vector<8x128xf32>
    %580 = arith.mulf %579, %578 : vector<8x128xf32>
    %581 = math.tanh %580 : vector<8x128xf32>
    %cst_190 = arith.constant 5.000000e-01 : f32
    %582 = vector.broadcast %cst_190 : f32 to vector<8x128xf32>
    %583 = arith.mulf %582, %581 : vector<8x128xf32>
    %cst_191 = arith.constant 5.000000e-01 : f32
    %584 = vector.broadcast %cst_191 : f32 to vector<8x128xf32>
    %585 = arith.addf %583, %584 : vector<8x128xf32>
    %586 = arith.mulf %575, %521 : vector<8x128xf32>
    %587 = arith.mulf %567, %577 : vector<8x128xf32>
    %588 = arith.addf %586, %587 : vector<8x128xf32>
    %589 = math.tanh %588 : vector<8x128xf32>
    %590 = arith.mulf %585, %589 : vector<8x128xf32>
    %cst_192 = arith.constant 0.000000e+00 : f32
    %591 = vector.broadcast %cst_192 : f32 to vector<8x128xf32>
    %592 = arith.maximumf %590, %591 : vector<8x128xf32>
    %c0_193 = arith.constant 0 : index
    %c0_194 = arith.constant 0 : index
    %593 = vector.load %arg7[%c0_193, %c0_194] : memref<1x128xf32, #tpu.memory_space<vmem>>, vector<1x128xf32>
    %594 = vector.broadcast %593 : vector<1x128xf32> to vector<8x128xf32>
    %595 = arith.mulf %592, %594 : vector<8x128xf32>
    %cst_195 = arith.constant dense<0.000000e+00> : vector<8xf32>
    %596 = vector.multi_reduction <add>, %595, %cst_195 [1] : vector<8x128xf32> to vector<8xf32>
    %597 = vector.shape_cast %596 : vector<8xf32> to vector<8x1xf32>
    %598 = vector.shape_cast %597 : vector<8x1xf32> to vector<8x1xf32>
    %599 = vector.broadcast %598 : vector<8x1xf32> to vector<8x128xf32>
    %c0_196 = arith.constant 0 : index
    %c0_197 = arith.constant 0 : index
    %600 = vector.load %arg8[%c0_196, %c0_197] : memref<1x128xf32, #tpu.memory_space<vmem>>, vector<1x128xf32>
    %601 = vector.broadcast %600 : vector<1x128xf32> to vector<8x128xf32>
    %602 = arith.addf %599, %601 : vector<8x128xf32>
    %c0_198 = arith.constant 0 : index
    %c0_199 = arith.constant 0 : index
    %603 = vector.load %arg9[%c0_198, %c0_199] : memref<8x128xf32, #tpu.memory_space<vmem>>, vector<8x128xf32>
    tpu.vector_store %arg9[%c0_198, %c0_199], %602 {strides = array<i32>} : memref<8x128xf32, #tpu.memory_space<vmem>>, vector<8x128xf32>,
    return
  }
  func.func @transform_0(%arg0: i32) -> (i32, i32) {
    %c0_i32 = arith.constant 0 : i32
    %c0_i32_0 = arith.constant 0 : i32
    %c0_i32_1 = arith.constant 0 : i32
    return %c0_i32, %c0_i32_0 : i32, i32
  }
  func.func @transform_1(%arg0: i32) -> (i32, i32) {
    %c0_i32 = arith.constant 0 : i32
    %c0_i32_0 = arith.constant 0 : i32
    %c0_i32_1 = arith.constant 0 : i32
    return %c0_i32, %c0_i32_0 : i32, i32
  }
  func.func @transform_2(%arg0: i32) -> (i32, i32) {
    %c0_i32 = arith.constant 0 : i32
    %c0_i32_0 = arith.constant 0 : i32
    %c0_i32_1 = arith.constant 0 : i32
    return %c0_i32, %c0_i32_0 : i32, i32
  }
  func.func @transform_3(%arg0: i32) -> (i32, i32) {
    %c0_i32 = arith.constant 0 : i32
    %c0_i32_0 = arith.constant 0 : i32
    %c0_i32_1 = arith.constant 0 : i32
    return %c0_i32, %c0_i32_0 : i32, i32
  }
  func.func @transform_4(%arg0: i32) -> (i32, i32) {
    %c0_i32 = arith.constant 0 : i32
    %c0_i32_0 = arith.constant 0 : i32
    %c0_i32_1 = arith.constant 0 : i32
    return %c0_i32, %c0_i32_0 : i32, i32
  }
  func.func @transform_5(%arg0: i32) -> (i32, i32) {
    %c0_i32 = arith.constant 0 : i32
    %c0_i32_0 = arith.constant 0 : i32
    %c0_i32_1 = arith.constant 0 : i32
    return %c0_i32, %c0_i32_0 : i32, i32
  }
  func.func @transform_6(%arg0: i32) -> (i32, i32) {
    %c0_i32 = arith.constant 0 : i32
    %c0_i32_0 = arith.constant 0 : i32
    %c0_i32_1 = arith.constant 0 : i32
    return %c0_i32, %c0_i32_0 : i32, i32
  }
  func.func @transform_7(%arg0: i32) -> (i32, i32) {
    %c0_i32 = arith.constant 0 : i32
    %c0_i32_0 = arith.constant 0 : i32
    %c0_i32_1 = arith.constant 0 : i32
    return %c0_i32, %c0_i32_0 : i32, i32
  }
  func.func @transform_8(%arg0: i32) -> (i32, i32) {
    %c0_i32 = arith.constant 0 : i32
    %c0_i32_0 = arith.constant 0 : i32
    %c0_i32_1 = arith.constant 0 : i32
    return %c0_i32, %c0_i32_0 : i32, i32
  }
}

</mosaic_0001>

<bundles_post_ra>
// kernel: tpu_custom_call.1
= control target key start
LH: loop header
LB: loop body
LE: loop exit
PB: predicated region body
PF: predicated region fallthrough
CT: control target
= control target key end

     0   :  { %13 = vsyncpa [#allocation4], 0  ;;  %s4930_s0 = inlined_call_operand.vmem [shape: f32[64,1], index: 0, kind: input, shape index: {}]   ;;  %s4931_s1 = inlined_call_operand.vmem [shape: f32[1,512], index: 1, kind: input, shape index: {}]   ;;  %s4932_s2 = inlined_call_operand.vmem [shape: f32[1,512], index: 2, kind: input, shape index: {}]   ;;  %s4933_s3 = inlined_call_operand.hbm [shape: bf16[128,512], index: 3, kind: input, shape index: {}]   ;;  %s4934_s4 = inlined_call_operand.hbm [shape: bf16[256,512], index: 4, kind: input, shape index: {}]   ;;  %s4935_s5 = inlined_call_operand.vmem [shape: f32[1,512], index: 5, kind: input, shape index: {}]   ;;  %s4936_s6 = inlined_call_operand.vmem [shape: f32[1,128], index: 6, kind: input, shape index: {}]   ;;  %s4937_s7 = inlined_call_operand.vmem [shape: f32[1,128], index: 7, kind: input, shape index: {}]   ;;  %s4938_s8 = inlined_call_operand.hbm [shape: f32[8,128], index: 8, kind: output, shape index: {}]  }
   0x1   :  { %14 = vsyncpa [#allocation7], 0 }
   0x2   :  { %15 = vsyncpa [#allocation5], 0  ;;  %s3243_s27 = smov [#allocation3]   ;;  %s3171_s9 = scalar_lea.hbm %s4933_s3, 4096 }
   0x3   :  { %s27_s28 = sshll.u32 %s3243_s27, 4  ;;  %p3172_p0 = scmp.ne.s32.totalorder %s4933_s3, %s3171_s9  ;;  %s28_s28 = int_to_ptr.vmem [resolvable:$true] %s27_s28 }
   0x4   :  { %p3175_p1 = scmp.lt.u32.totalorder %s3171_s9, %s4933_s3 }
   0x6   :  { %p3177_p2 = pnand %p3175_p1, %p3172_p0 }
   0x8   :  { %3180 = shalt.err (!%p3177_p2)
}
   0x9   :  { %s3181_s14 = scalar_lea.vmem %s28_s28, 4096  ;;  %p3186_p4 = scmp.lt.s32.totalorder %s28_s28, %s28_s28 }
   0xa   :  { %p3182_p3 = scmp.ne.s32.totalorder %s28_s28, %s3181_s14  ;;  %p3187_p5 = scmp.lt.s32.totalorder %s3181_s14, %s3181_s14 }
   0xc   :  { %p3188_p6 = por %p3187_p5, %p3186_p4 }
   0xe   :  { %p3189_p7 = pnand %p3188_p6, %p3182_p3 }
  0x10   :  { %3192 = shalt.err (!%p3189_p7)
}
  0x11   :  { %s3244_s15 = smov 256   ;;  %s3245_s16 = smov 16  }
  0x12   :  { %33 = dma.hbm_to_vmem [thread:$0]  %s4933_s3, 4096, %s28_s28, [#allocation4], %s3244_s15, %s3244_s15, %s3245_s16  }
  0x13   :  { %s3246_s19 = smov [#allocation6]   ;;  %s3193_s23 = scalar_lea.hbm %s4934_s4, 8192 }
  0x14   :  { %s39_s20 = sshll.u32 %s3246_s19, 4  ;;  %p3194_p8 = scmp.ne.s32.totalorder %s4934_s4, %s3193_s23  ;;  %s40_s20 = int_to_ptr.vmem [resolvable:$true] %s39_s20 }
  0x15   :  { %p3197_p9 = scmp.lt.u32.totalorder %s3193_s23, %s4934_s4 }
  0x17   :  { %p3199_p10 = pnand %p3197_p9, %p3194_p8 }
  0x19   :  { %3202 = shalt.err (!%p3199_p10)
}
  0x1a   :  { %s3203_s29 = scalar_lea.vmem %s40_s20, 8192  ;;  %p3208_p12 = scmp.lt.s32.totalorder %s40_s20, %s40_s20 }
  0x1b   :  { %p3204_p11 = scmp.ne.s32.totalorder %s40_s20, %s3203_s29  ;;  %p3209_p13 = scmp.lt.s32.totalorder %s3203_s29, %s3203_s29 }
  0x1d   :  { %p3210_p0 = por %p3209_p13, %p3208_p12 }
  0x1f   :  { %p3211_p1 = pnand %p3210_p0, %p3204_p11 }
  0x21   :  { %3214 = shalt.err (!%p3211_p1)
}
  0x22   :  { %45 = dma.hbm_to_vmem [thread:$0]  %s4934_s4, 8192, %s40_s20, [#allocation7], %s3244_s15, %s3244_s15, %s3245_s16  }
  0x23   :  { %3237 = dma.done.wait [#allocation4], 4096  }
  0x24   :  { %3238 = vsyncadd [#allocation4], 4294963200 }
  0x25   :  { %3239 = dma.done.wait [#allocation7], 8192  }
  0x26   :  { %3240 = vsyncadd [#allocation7], 4294959104  ;;  %v4939_v0 = vmov 0   ;;  %v3323_v1 = vld [vmem:[#allocation3 + $0x4] ss:$16 sps:$4 sm:$0xff]   ;;  %v60_v29 = vld [vmem:[%s4930_s0 + $0x8] sm:$0xff] }
  0x27   :  { %540 = vmatprep.mubr.bf16.mxu0 %v4939_v0  ;;  %581 = vmatprep.mubr.bf16.mxu1 %v4939_v0  ;;  %5282 = vst [vmem:[#allocation12_spill] sm:$0xff] %v3323_v1  ;;  %v3325_v2 = vld [vmem:[#allocation3 + $0xc] ss:$16 sps:$4 sm:$0xff]   ;;  %v3328_v3 = vld [vmem:[#allocation3] ss:$16 sps:$4 sm:$0xff]   ;;  %s3249_s3 = smov [#allocation8]  }
  0x28   :  { %2673 = vset.pattern.permute.xlu0 %v4939_v0  ;;  %2674 = vset.pattern.permute.xlu1 %v4939_v0  ;;  %5283 = vst [vmem:[#allocation13_spill] sm:$0xff] %v3325_v2  ;;  %v3330_v4 = vld [vmem:[#allocation3 + $0x8] ss:$16 sps:$4 sm:$0xff]   ;;  %v3333_v5 = vld [vmem:[#allocation3 + $0x24] ss:$16 sps:$4 sm:$0xff]   ;;  %s2558_s28 = sshll.u32 %s3249_s3, 4  ;;  %s2559_s28 = int_to_ptr.vmem [resolvable:$true] %s2558_s28 }
  0x29   :  { %508 = vmatprep.subr.bf16.mxu0 %v3323_v1  ;;  %549 = vmatprep.subr.bf16.mxu1 %v3325_v2  ;;  %v3337_v6 = vld [vmem:[#allocation3 + $0x2c] ss:$16 sps:$4 sm:$0xff]   ;;  %v3339_v7 = vld [vmem:[#allocation3 + $0x20] ss:$16 sps:$4 sm:$0xff]   ;;  %v3342_v8 = vld [vmem:[#allocation3 + $0x28] ss:$16 sps:$4 sm:$0xff]   ;;  %p3220_p3 = scmp.lt.s32.totalorder %s2559_s28, %s2559_s28 }
  0x2a   :  { %509 = vmatpush1.bf16.msra.mxu0 %v3328_v3  ;;  %550 = vmatpush1.bf16.msra.mxu1 %v3330_v4  ;;  %v3345_v9 = vld [vmem:[#allocation3 + $0x44] ss:$16 sps:$4 sm:$0xff]   ;;  %v3347_v10 = vld [vmem:[#allocation3 + $0x4c] ss:$16 sps:$4 sm:$0xff]   ;;  %v3349_v11 = vld [vmem:[#allocation3 + $0x40] ss:$16 sps:$4 sm:$0xff]  }
  0x2b   :  { %510 = vmatprep.subr.bf16.mxu0 %v3333_v5  ;;  %551 = vmatprep.subr.bf16.mxu1 %v3337_v6  ;;  %v3351_v12 = vld [vmem:[#allocation3 + $0x48] ss:$16 sps:$4 sm:$0xff]   ;;  %v3355_v13 = vld [vmem:[#allocation3 + $0x64] ss:$16 sps:$4 sm:$0xff]   ;;  %v3359_v14 = vld [vmem:[#allocation3 + $0x6c] ss:$16 sps:$4 sm:$0xff]  }
  0x2c   :  { %v3361_v15 = vld [vmem:[#allocation3 + $0x60] ss:$16 sps:$4 sm:$0xff]   ;;  %v3365_v16 = vld [vmem:[#allocation3 + $0x68] ss:$16 sps:$4 sm:$0xff]   ;;  %v3367_v17 = vld [vmem:[#allocation3 + $0x84] ss:$16 sps:$4 sm:$0xff]  }
  0x2d   :  { %v3371_v18 = vld [vmem:[#allocation3 + $0x8c] ss:$16 sps:$4 sm:$0xff]   ;;  %v3373_v19 = vld [vmem:[#allocation3 + $0x80] ss:$16 sps:$4 sm:$0xff]   ;;  %v3375_v20 = vld [vmem:[#allocation3 + $0x88] ss:$16 sps:$4 sm:$0xff]  }
  0x2e   :  { %511 = vmatpush1.bf16.msra.mxu0 %v3339_v7  ;;  %552 = vmatpush1.bf16.msra.mxu1 %v3342_v8  ;;  %v3379_v21 = vld [vmem:[#allocation3 + $0xa4] ss:$16 sps:$4 sm:$0xff]   ;;  %v3383_v22 = vld [vmem:[#allocation3 + $0xac] ss:$16 sps:$4 sm:$0xff]   ;;  %v3387_v23 = vld [vmem:[#allocation3 + $0xa0] ss:$16 sps:$4 sm:$0xff]  }
  0x2f   :  { %512 = vmatprep.subr.bf16.mxu0 %v3345_v9  ;;  %553 = vmatprep.subr.bf16.mxu1 %v3347_v10  ;;  %v3389_v24 = vld [vmem:[#allocation3 + $0xa8] ss:$16 sps:$4 sm:$0xff]   ;;  %v3393_v25 = vld [vmem:[#allocation3 + $0xc4] ss:$16 sps:$4 sm:$0xff]   ;;  %v3395_v26 = vld [vmem:[#allocation3 + $0xcc] ss:$16 sps:$4 sm:$0xff]  }
  0x30   :  { %v59_v27 = vld [vmem:[%s4930_s0] sm:$0xff]  ;;  %v3407_v30 = vld [vmem:[#allocation3 + $0xc8] ss:$16 sps:$4 sm:$0xff]   ;;  %v3413_v32 = vld [vmem:[#allocation3 + $0xec] ss:$16 sps:$4 sm:$0xff]   ;;  %s3215_s4 = scalar_lea.vmem %s2559_s28, 128 }
  0x31   :  { %v3400_v28 = vld [vmem:[#allocation3 + $0xc0] ss:$16 sps:$4 sm:$0xff]   ;;  %70 = vperm.xlu0 %2673, %v59_v27   ;;  %v3409_v31 = vld [vmem:[#allocation3 + $0xe4] ss:$16 sps:$4 sm:$0xff]   ;;  %v3417_v34 = vld [vmem:[#allocation3 + $0xe8] ss:$16 sps:$4 sm:$0xff]   ;;  %p3216_p2 = scmp.ne.s32.totalorder %s2559_s28, %s3215_s4  ;;  %p3221_p4 = scmp.lt.s32.totalorder %s3215_s4, %s3215_s4 }
  0x32   :  { %513 = vmatpush1.bf16.msra.mxu0 %v3349_v11  ;;  %554 = vmatpush1.bf16.msra.mxu1 %v3351_v12  ;;  %v3415_v33 = vld [vmem:[#allocation3 + $0xe0] ss:$16 sps:$4 sm:$0xff]   ;;  %v3424_v36 = vld [vmem:[#allocation6 + $0x4] ss:$16 sps:$4 sm:$0xff]   ;;  %v3428_v37 = vld [vmem:[#allocation6 + $0xc] ss:$16 sps:$4 sm:$0xff]  }
  0x33   :  { %514 = vmatprep.subr.bf16.mxu0 %v3355_v13  ;;  %555 = vmatprep.subr.bf16.mxu1 %v3359_v14  ;;  %v63_v35 = vld [vmem:[%s4930_s0 + $0x20] sm:$0xff]  ;;  %v65_v38 = vld [vmem:[%s4930_s0 + $0x30] sm:$0xff]  ;;  %v3437_v40 = vld [vmem:[#allocation6 + $0x8] ss:$16 sps:$4 sm:$0xff]   ;;  %p3222_p5 = por %p3221_p4, %p3220_p3 }
  0x34   :  { %v3433_v39 = vld [vmem:[#allocation6] ss:$16 sps:$4 sm:$0xff]   ;;  %v3439_v41 = vld [vmem:[#allocation6 + $0x24] ss:$16 sps:$4 sm:$0xff]   ;;  %v3443_v42 = vld [vmem:[#allocation6 + $0x2c] ss:$16 sps:$4 sm:$0xff]  }
  0x35   :  { %75 = vperm.xlu0 %2673, %v60_v29   ;;  %v3447_v43 = vld [vmem:[#allocation6 + $0x20] ss:$16 sps:$4 sm:$0xff]   ;;  %v3449_v44 = vld [vmem:[#allocation6 + $0x28] ss:$16 sps:$4 sm:$0xff]   ;;  %v3453_v45 = vld [vmem:[#allocation6 + $0x44] ss:$16 sps:$4 sm:$0xff]   ;;  %p3223_p6 = pnand %p3222_p5, %p3216_p2 }
  0x36   :  { %515 = vmatpush1.bf16.msra.mxu0 %v3361_v15  ;;  %556 = vmatpush1.bf16.msra.mxu1 %v3365_v16  ;;  %v3457_v46 = vld [vmem:[#allocation6 + $0x4c] ss:$16 sps:$4 sm:$0xff]   ;;  %v3459_v47 = vld [vmem:[#allocation6 + $0x40] ss:$16 sps:$4 sm:$0xff]   ;;  %v3463_v48 = vld [vmem:[#allocation6 + $0x48] ss:$16 sps:$4 sm:$0xff]  }
  0x37   :  { %516 = vmatprep.subr.bf16.mxu0 %v3367_v17  ;;  %557 = vmatprep.subr.bf16.mxu1 %v3371_v18  ;;  %5284 = vst [vmem:[#allocation14_spill] sm:$0xff] %v3457_v46  ;;  %5285 = vst [vmem:[#allocation15_spill] sm:$0xff] %v3459_v47  ;;  %v3465_v49 = vld [vmem:[#allocation6 + $0x64] ss:$16 sps:$4 sm:$0xff]   ;;  %v3469_v50 = vld [vmem:[#allocation6 + $0x6c] ss:$16 sps:$4 sm:$0xff]  }
  0x38   :  { %5286 = vst [vmem:[#allocation16_spill] sm:$0xff] %v3463_v48  ;;  %5287 = vst [vmem:[#allocation17_spill] sm:$0xff] %v3465_v49  ;;  %v3471_v51 = vld [vmem:[#allocation6 + $0x60] ss:$16 sps:$4 sm:$0xff]   ;;  %v3473_v52 = vld [vmem:[#allocation6 + $0x68] ss:$16 sps:$4 sm:$0xff]  }
  0x39   :  { %90 = vperm.xlu0 %2673, %v63_v35   ;;  %5288 = vst [vmem:[#allocation18_spill] sm:$0xff] %v3469_v50  ;;  %5289 = vst [vmem:[#allocation19_spill] sm:$0xff] %v3471_v51  ;;  %v3475_v53 = vld [vmem:[#allocation6 + $0x84] ss:$16 sps:$4 sm:$0xff]   ;;  %v3477_v54 = vld [vmem:[#allocation6 + $0x8c] ss:$16 sps:$4 sm:$0xff]  }
  0x3a   :  { %517 = vmatpush1.bf16.msra.mxu0 %v3373_v19  ;;  %558 = vmatpush1.bf16.msra.mxu1 %v3375_v20  ;;  %5290 = vst [vmem:[#allocation20_spill] sm:$0xff] %v3473_v52  ;;  %5291 = vst [vmem:[#allocation21_spill] sm:$0xff] %v3475_v53  ;;  %v3483_v55 = vld [vmem:[#allocation6 + $0x80] ss:$16 sps:$4 sm:$0xff]   ;;  %v3485_v56 = vld [vmem:[#allocation6 + $0x88] ss:$16 sps:$4 sm:$0xff]  }
  0x3b   :  { %518 = vmatprep.subr.bf16.mxu0 %v3379_v21  ;;  %559 = vmatprep.subr.bf16.mxu1 %v3383_v22  ;;  %5292 = vst [vmem:[#allocation22_spill] sm:$0xff] %v3477_v54  ;;  %5293 = vst [vmem:[#allocation23_spill] sm:$0xff] %v3483_v55  ;;  %v3487_v57 = vld [vmem:[#allocation6 + $0xa4] ss:$16 sps:$4 sm:$0xff]   ;;  %v3489_v58 = vld [vmem:[#allocation6 + $0xac] ss:$16 sps:$4 sm:$0xff]  }
  0x3c   :  { %5294 = vst [vmem:[#allocation24_spill] sm:$0xff] %v3485_v56  ;;  %5295 = vst [vmem:[#allocation25_spill] sm:$0xff] %v3487_v57  ;;  %v3495_v59 = vld [vmem:[#allocation6 + $0xa0] ss:$16 sps:$4 sm:$0xff]   ;;  %v3497_v60 = vld [vmem:[#allocation6 + $0xa8] ss:$16 sps:$4 sm:$0xff]  }
  0x3d   :  { %100 = vperm.xlu0 %2673, %v65_v38   ;;  %5296 = vst [vmem:[#allocation26_spill] sm:$0xff] %v3489_v58  ;;  %5297 = vst [vmem:[#allocation27_spill] sm:$0xff] %v3495_v59  ;;  %v3503_v61 = vld [vmem:[#allocation6 + $0xc4] ss:$16 sps:$4 sm:$0xff]   ;;  %v3505_v62 = vld [vmem:[#allocation6 + $0xcc] ss:$16 sps:$4 sm:$0xff]  }
  0x3e   :  { %519 = vmatpush1.bf16.msra.mxu0 %v3387_v23  ;;  %560 = vmatpush1.bf16.msra.mxu1 %v3389_v24  ;;  %5298 = vst [vmem:[#allocation28_spill] sm:$0xff] %v3497_v60  ;;  %5299 = vst [vmem:[#allocation29_spill] sm:$0xff] %v3503_v61  ;;  %v3511_v63 = vld [vmem:[#allocation6 + $0xc0] ss:$16 sps:$4 sm:$0xff]   ;;  %v3513_v27 = vld [vmem:[#allocation6 + $0xc8] ss:$16 sps:$4 sm:$0xff]  }
  0x3f   :  { %520 = vmatprep.subr.bf16.mxu0 %v3393_v25  ;;  %561 = vmatprep.subr.bf16.mxu1 %v3395_v26  ;;  %5300 = vst [vmem:[#allocation30_spill] sm:$0xff] %v3505_v62  ;;  %5301 = vst [vmem:[#allocation31_spill] sm:$0xff] %v3511_v63  ;;  %v3517_v29 = vld [vmem:[#allocation6 + $0xe4] ss:$16 sps:$4 sm:$0xff]   ;;  %v3519_v35 = vld [vmem:[#allocation6 + $0xec] ss:$16 sps:$4 sm:$0xff]  }
  0x40   :  { %5302 = vst [vmem:[#allocation32_spill] sm:$0xff] %v3513_v27  ;;  %5303 = vst [vmem:[#allocation33_spill] sm:$0xff] %v3517_v29  ;;  %v3521_v38 = vld [vmem:[#allocation6 + $0xe0] ss:$16 sps:$4 sm:$0xff]  }
  0x41   :  { %5304 = vst [vmem:[#allocation34_spill] sm:$0xff] %v3519_v35  ;;  %5305 = vst [vmem:[#allocation35_spill] sm:$0xff] %v3521_v38 }
  0x42   :  { %521 = vmatpush1.bf16.msra.mxu0 %v3400_v28  ;;  %562 = vmatpush1.bf16.msra.mxu1 %v3407_v30 }
  0x43   :  { %522 = vmatprep.subr.bf16.mxu0 %v3409_v31  ;;  %563 = vmatprep.subr.bf16.mxu1 %v3413_v32 }
  0x46   :  { %523 = vmatpush1.bf16.msra.mxu0 %v3415_v33  ;;  %564 = vmatpush1.bf16.msra.mxu1 %v3417_v34 }
  0x47   :  { %955 = vmatprep.subr.bf16.mxu0 %v3424_v36  ;;  %996 = vmatprep.subr.bf16.mxu1 %v3428_v37 }
  0x49   :  { %541 = vmatmul.mubr.bf16.vlgmr.msra.gmra.mrb[0].mxu0 %v4939_v0  ;;  %582 = vmatmul.mubr.bf16.vlgmr.msra.gmra.mrb[0].mxu1 %v4939_v0  ;;  %v3523_v0 = vld [vmem:[#allocation6 + $0xe8] ss:$16 sps:$4 sm:$0xff]  }
  0x4a   :  { %956 = vmatpush1.bf16.msra.mxu0 %v3433_v39  ;;  %997 = vmatpush1.bf16.msra.mxu1 %v3437_v40  ;;  %5306 = vst [vmem:[#allocation36_spill] sm:$0xff] %v3523_v0 }
  0x4b   :  { %957 = vmatprep.subr.bf16.mxu0 %v3439_v41  ;;  %998 = vmatprep.subr.bf16.mxu1 %v3443_v42 }
  0x4e   :  { %958 = vmatpush1.bf16.msra.mxu0 %v3447_v43  ;;  %999 = vmatpush1.bf16.msra.mxu1 %v3449_v44 }
  0x4f   :  { %959 = vmatprep.subr.bf16.mxu0 %v3453_v45  ;;  %1000 = vmatprep.subr.bf16.mxu1 %v3457_v46 }
  0x52   :  { %960 = vmatpush1.bf16.msra.mxu0 %v3459_v47  ;;  %1001 = vmatpush1.bf16.msra.mxu1 %v3463_v48 }
  0x53   :  { %961 = vmatprep.subr.bf16.mxu0 %v3465_v49  ;;  %1002 = vmatprep.subr.bf16.mxu1 %v3469_v50 }
  0x56   :  { %962 = vmatpush1.bf16.msra.mxu0 %v3471_v51  ;;  %1003 = vmatpush1.bf16.msra.mxu1 %v3473_v52 }
  0x57   :  { %963 = vmatprep.subr.bf16.mxu0 %v3475_v53  ;;  %1004 = vmatprep.subr.bf16.mxu1 %v3477_v54 }
  0x5a   :  { %964 = vmatpush1.bf16.msra.mxu0 %v3483_v55  ;;  %1005 = vmatpush1.bf16.msra.mxu1 %v3485_v56 }
  0x5b   :  { %965 = vmatprep.subr.bf16.mxu0 %v3487_v57  ;;  %1006 = vmatprep.subr.bf16.mxu1 %v3489_v58 }
  0x5e   :  { %966 = vmatpush1.bf16.msra.mxu0 %v3495_v59  ;;  %1007 = vmatpush1.bf16.msra.mxu1 %v3497_v60 }
  0x5f   :  { %967 = vmatprep.subr.bf16.mxu0 %v3503_v61  ;;  %1008 = vmatprep.subr.bf16.mxu1 %v3505_v62  ;;  %v3529_v62 = vld [vmem:[#allocation6 + $0x104] ss:$16 sps:$4 sm:$0xff]   ;;  %v3535_v61 = vld [vmem:[#allocation6 + $0x108] ss:$16 sps:$4 sm:$0xff]  }
  0x60   :  { %5307 = vst [vmem:[#allocation37_spill] sm:$0xff] %v3529_v62  ;;  %5310 = vst [vmem:[#allocation40_spill] sm:$0xff] %v3535_v61 }
  0x62   :  { %968 = vmatpush1.bf16.msra.mxu0 %v3511_v63  ;;  %1009 = vmatpush1.bf16.msra.mxu1 %v3513_v27  ;;  %v3531_v63 = vld [vmem:[#allocation6 + $0x10c] ss:$16 sps:$4 sm:$0xff]   ;;  %v3533_v27 = vld [vmem:[#allocation6 + $0x100] ss:$16 sps:$4 sm:$0xff]  }
  0x63   :  { %969 = vmatprep.subr.bf16.mxu0 %v3517_v29  ;;  %1010 = vmatprep.subr.bf16.mxu1 %v3519_v35  ;;  %5308 = vst [vmem:[#allocation38_spill] sm:$0xff] %v3531_v63  ;;  %5309 = vst [vmem:[#allocation39_spill] sm:$0xff] %v3533_v27  ;;  %v3541_v35 = vld [vmem:[#allocation6 + $0x124] ss:$16 sps:$4 sm:$0xff]   ;;  %v3547_v29 = vld [vmem:[#allocation6 + $0x128] ss:$16 sps:$4 sm:$0xff]  }
  0x64   :  { %5311 = vst [vmem:[#allocation41_spill] sm:$0xff] %v3541_v35  ;;  %5314 = vst [vmem:[#allocation44_spill] sm:$0xff] %v3547_v29 }
  0x66   :  { %970 = vmatpush1.bf16.msra.mxu0 %v3521_v38  ;;  %1011 = vmatpush1.bf16.msra.mxu1 %v3523_v0  ;;  %v3543_v38 = vld [vmem:[#allocation6 + $0x12c] ss:$16 sps:$4 sm:$0xff]   ;;  %v3545_v0 = vld [vmem:[#allocation6 + $0x120] ss:$16 sps:$4 sm:$0xff]  }
  0x67   :  { %971 = vmatprep.subr.bf16.mxu0 %v3529_v62  ;;  %1012 = vmatprep.subr.bf16.mxu1 %v3531_v63  ;;  %5312 = vst [vmem:[#allocation42_spill] sm:$0xff] %v3543_v38  ;;  %5313 = vst [vmem:[#allocation43_spill] sm:$0xff] %v3545_v0  ;;  %v3553_v63 = vld [vmem:[#allocation6 + $0x144] ss:$16 sps:$4 sm:$0xff]   ;;  %v3559_v62 = vld [vmem:[#allocation6 + $0x148] ss:$16 sps:$4 sm:$0xff]  }
  0x68   :  { %5315 = vst [vmem:[#allocation45_spill] sm:$0xff] %v3553_v63  ;;  %5318 = vst [vmem:[#allocation48_spill] sm:$0xff] %v3559_v62 }
  0x6a   :  { %972 = vmatpush1.bf16.msra.mxu0 %v3533_v27  ;;  %1013 = vmatpush1.bf16.msra.mxu1 %v3535_v61  ;;  %v3555_v27 = vld [vmem:[#allocation6 + $0x14c] ss:$16 sps:$4 sm:$0xff]   ;;  %v3557_v61 = vld [vmem:[#allocation6 + $0x140] ss:$16 sps:$4 sm:$0xff]  }
  0x6b   :  { %973 = vmatprep.subr.bf16.mxu0 %v3541_v35  ;;  %1014 = vmatprep.subr.bf16.mxu1 %v3543_v38  ;;  %5316 = vst [vmem:[#allocation46_spill] sm:$0xff] %v3555_v27  ;;  %5317 = vst [vmem:[#allocation47_spill] sm:$0xff] %v3557_v61  ;;  %v3565_v38 = vld [vmem:[#allocation6 + $0x164] ss:$16 sps:$4 sm:$0xff]   ;;  %v3571_v35 = vld [vmem:[#allocation6 + $0x168] ss:$16 sps:$4 sm:$0xff]  }
  0x6c   :  { %5319 = vst [vmem:[#allocation49_spill] sm:$0xff] %v3565_v38  ;;  %5322 = vst [vmem:[#allocation52_spill] sm:$0xff] %v3571_v35 }
  0x6e   :  { %974 = vmatpush1.bf16.msra.mxu0 %v3545_v0  ;;  %1015 = vmatpush1.bf16.msra.mxu1 %v3547_v29  ;;  %v3567_v0 = vld [vmem:[#allocation6 + $0x16c] ss:$16 sps:$4 sm:$0xff]   ;;  %v3569_v29 = vld [vmem:[#allocation6 + $0x160] ss:$16 sps:$4 sm:$0xff]  }
  0x6f   :  { %975 = vmatprep.subr.bf16.mxu0 %v3553_v63  ;;  %1016 = vmatprep.subr.bf16.mxu1 %v3555_v27  ;;  %5320 = vst [vmem:[#allocation50_spill] sm:$0xff] %v3567_v0  ;;  %5321 = vst [vmem:[#allocation51_spill] sm:$0xff] %v3569_v29  ;;  %v3577_v27 = vld [vmem:[#allocation6 + $0x184] ss:$16 sps:$4 sm:$0xff]   ;;  %v3583_v63 = vld [vmem:[#allocation6 + $0x188] ss:$16 sps:$4 sm:$0xff]  }
  0x70   :  { %5323 = vst [vmem:[#allocation53_spill] sm:$0xff] %v3577_v27  ;;  %5326 = vst [vmem:[#allocation56_spill] sm:$0xff] %v3583_v63 }
  0x72   :  { %976 = vmatpush1.bf16.msra.mxu0 %v3557_v61  ;;  %1017 = vmatpush1.bf16.msra.mxu1 %v3559_v62  ;;  %v3579_v61 = vld [vmem:[#allocation6 + $0x18c] ss:$16 sps:$4 sm:$0xff]   ;;  %v3581_v62 = vld [vmem:[#allocation6 + $0x180] ss:$16 sps:$4 sm:$0xff]  }
  0x73   :  { %977 = vmatprep.subr.bf16.mxu0 %v3565_v38  ;;  %1018 = vmatprep.subr.bf16.mxu1 %v3567_v0  ;;  %5324 = vst [vmem:[#allocation54_spill] sm:$0xff] %v3579_v61  ;;  %5325 = vst [vmem:[#allocation55_spill] sm:$0xff] %v3581_v62  ;;  %v3589_v0 = vld [vmem:[#allocation6 + $0x1a4] ss:$16 sps:$4 sm:$0xff]   ;;  %v3595_v38 = vld [vmem:[#allocation6 + $0x1a8] ss:$16 sps:$4 sm:$0xff]  }
  0x74   :  { %5327 = vst [vmem:[#allocation57_spill] sm:$0xff] %v3589_v0  ;;  %5330 = vst [vmem:[#allocation60_spill] sm:$0xff] %v3595_v38 }
  0x76   :  { %978 = vmatpush1.bf16.msra.mxu0 %v3569_v29  ;;  %1019 = vmatpush1.bf16.msra.mxu1 %v3571_v35  ;;  %v3591_v29 = vld [vmem:[#allocation6 + $0x1ac] ss:$16 sps:$4 sm:$0xff]   ;;  %v3593_v35 = vld [vmem:[#allocation6 + $0x1a0] ss:$16 sps:$4 sm:$0xff]  }
  0x77   :  { %979 = vmatprep.subr.bf16.mxu0 %v3577_v27  ;;  %1020 = vmatprep.subr.bf16.mxu1 %v3579_v61  ;;  %5328 = vst [vmem:[#allocation58_spill] sm:$0xff] %v3591_v29  ;;  %5329 = vst [vmem:[#allocation59_spill] sm:$0xff] %v3593_v35  ;;  %v3601_v61 = vld [vmem:[#allocation6 + $0x1c4] ss:$16 sps:$4 sm:$0xff]   ;;  %v3607_v27 = vld [vmem:[#allocation6 + $0x1c8] ss:$16 sps:$4 sm:$0xff]  }
  0x78   :  { %5331 = vst [vmem:[#allocation61_spill] sm:$0xff] %v3601_v61  ;;  %5334 = vst [vmem:[#allocation64_spill] sm:$0xff] %v3607_v27 }
  0x7a   :  { %980 = vmatpush1.bf16.msra.mxu0 %v3581_v62  ;;  %1021 = vmatpush1.bf16.msra.mxu1 %v3583_v63  ;;  %v3603_v62 = vld [vmem:[#allocation6 + $0x1cc] ss:$16 sps:$4 sm:$0xff]   ;;  %v3605_v63 = vld [vmem:[#allocation6 + $0x1c0] ss:$16 sps:$4 sm:$0xff]  }
  0x7b   :  { %981 = vmatprep.subr.bf16.mxu0 %v3589_v0  ;;  %1022 = vmatprep.subr.bf16.mxu1 %v3591_v29  ;;  %5332 = vst [vmem:[#allocation62_spill] sm:$0xff] %v3603_v62  ;;  %5333 = vst [vmem:[#allocation63_spill] sm:$0xff] %v3605_v63  ;;  %v3613_v29 = vld [vmem:[#allocation6 + $0x1e4] ss:$16 sps:$4 sm:$0xff]   ;;  %v3619_v0 = vld [vmem:[#allocation6 + $0x1e8] ss:$16 sps:$4 sm:$0xff]  }
  0x7c   :  { %5335 = vst [vmem:[#allocation65_spill] sm:$0xff] %v3613_v29  ;;  %5338 = vst [vmem:[#allocation68_spill] sm:$0xff] %v3619_v0 }
  0x7e   :  { %982 = vmatpush1.bf16.msra.mxu0 %v3593_v35  ;;  %1023 = vmatpush1.bf16.msra.mxu1 %v3595_v38  ;;  %v3615_v35 = vld [vmem:[#allocation6 + $0x1ec] ss:$16 sps:$4 sm:$0xff]   ;;  %v3617_v38 = vld [vmem:[#allocation6 + $0x1e0] ss:$16 sps:$4 sm:$0xff]  }
  0x7f   :  { %983 = vmatprep.subr.bf16.mxu0 %v3601_v61  ;;  %1024 = vmatprep.subr.bf16.mxu1 %v3603_v62  ;;  %5336 = vst [vmem:[#allocation66_spill] sm:$0xff] %v3615_v35  ;;  %5337 = vst [vmem:[#allocation67_spill] sm:$0xff] %v3617_v38 }
  0x82   :  { %984 = vmatpush1.bf16.msra.mxu0 %v3605_v63  ;;  %1025 = vmatpush1.bf16.msra.mxu1 %v3607_v27  ;;  %v3248_v63 = vmov 0.0|0.0   ;;  %v109_v27 = vlaneseq }
  0x83   :  { %985 = vmatprep.subr.bf16.mxu0 %v3613_v29  ;;  %1026 = vmatprep.subr.bf16.mxu1 %v3615_v35  ;;  %v67_v29 = vld [vmem:[%s4931_s1] sm:$0xf] }
  0x84   :  { %987 = vmatprep.mubr.bf16.mxu0 %v3248_v63  ;;  %1028 = vmatprep.mubr.bf16.mxu1 %v3248_v63  ;;  %v110_v62 = vshrl.u32 %v109_v27, 7  ;;  %v161_v63 = vld [vmem:[%s4932_s2] sm:$0xf] }
  0x86   :  { %986 = vmatpush1.bf16.msra.mxu0 %v3617_v38  ;;  %1027 = vmatpush1.bf16.msra.mxu1 %v3619_v0  ;;  %v3627_v61 = vsub.s32 0, %v110_v62  ;;  %v3632_v35 = vsub.s32 1, %v110_v62  ;;  %v3637_v0 = vsub.s32 2, %v110_v62  ;;  %v3652_v58 = vsub.s32 3, %v110_v62 }
  0x87   :  { %1042 = vmatprep.subr.bf16.mxu0 %v3323_v1  ;;  %1083 = vmatprep.subr.bf16.mxu1 %v3325_v2 }
  0x88   :  { %5339 = vst [vmem:[#allocation69_spill] sm:$0xff] %v3627_v61  ;;  %5340 = vst [vmem:[#allocation70_spill] sm:$0xff] %v3632_v35  ;;  %v3635_v38 = vrot.slane %v67_v29, %v3627_v61  ;;  %v3643_v2 = vrot.slane %v67_v29, %v3632_v35  ;;  %v3647_v60 = vrot.slane %v161_v63, %v3627_v61 }
  0x89   :  { %5342 = vst [vmem:[#allocation72_spill] sm:$0xff] %v3637_v0  ;;  %v3650_v59 = vrot.slane %v67_v29, %v3637_v0  ;;  %v3656_v56 = vrot.slane %v161_v63, %v3632_v35  ;;  %v3661_v53 = vrot.slane %v161_v63, %v3637_v0 }
  0x8a   :  { %5341 = vst [vmem:[#allocation71_spill] sm:$0xff] %v3635_v38  ;;  %5343 = vst [vmem:[#allocation73_spill] sm:$0xff] %v3643_v2 }
  0x8b   :  { %5344 = vst [vmem:[#allocation74_spill] sm:$0xff] %v3647_v60  ;;  %5345 = vst [vmem:[#allocation75_spill] sm:$0xff] %v3650_v59 }
  0x8c   :  { %5346 = vst [vmem:[#allocation76_spill] sm:$0xff] %v3661_v53 }
  0xb0   :  { %v71_v27 = vpop.permute.xlu0 %70 }
  0xb1   :  { %v129_v1 = vmul.f32 %v3635_v38, %v71_v27  ;;  %v130_v57 = vmul.f32 %v3643_v2, %v71_v27  ;;  %v131_v54 = vmul.f32 %v3650_v59, %v71_v27  ;;  %v3664_v38 = vrot.slane %v67_v29, %v3652_v58 }
  0xb3   :  { %v183_v55 = vadd.f32 %v3647_v60, %v129_v1  ;;  %5347 = vst [vmem:[#allocation77_spill] sm:$0xff] %v3664_v38  ;;  %v184_v61 = vadd.f32 %v3656_v56, %v130_v57  ;;  %v185_v2 = vadd.f32 %v3661_v53, %v131_v54  ;;  %v132_v35 = vmul.f32 %v3664_v38, %v71_v27 }
  0xb4   :  { %v3670_v1 = vrot.slane %v161_v63, %v3652_v58 }
 0x11c   :  { %v542_v52 = vpop.f32.mrb[0].mxu0  ;;  %v583_v62 = vpop.f32.mrb[0].mxu1 }
 0x11d   :  { %v590_v51 = vadd.f32 %v542_v52, %v183_v55  ;;  %v544_v50 = vpop.f32.mrb[1].mxu0  ;;  %v585_v59 = vpop.f32.mrb[1].mxu1  ;;  %v592_v57 = vadd.f32 %v583_v62, %v185_v2  ;;  %v186_v52 = vadd.f32 %v3670_v1, %v132_v35  ;;  %v5372_v62 = vld [vmem:[#allocation37_spill] sm:$0xff] }
 0x11e   :  { %v591_v60 = vadd.f32 %v544_v50, %v184_v61  ;;  %v546_v0 = vpop.f32.mrb[2].mxu0  ;;  %v587_v49 = vpop.f32.mrb[2].mxu1 }
 0x11f   :  { %v594_v48 = vmul.f32 0.5, %v590_v51  ;;  %v547_v29 = vpop.f32.mrb[3].mxu0  ;;  %v588_v47 = vpop.f32.mrb[3].mxu1  ;;  %v593_v54 = vadd.f32 %v585_v59, %v186_v52  ;;  %v5375_v52 = vld [vmem:[#allocation40_spill] sm:$0xff] }
 0x120   :  { %v598_v46 = vmul.f32 0.5, %v591_v60  ;;  %v5373_v29 = vld [vmem:[#allocation38_spill] sm:$0xff] }
 0x121   :  { %2819 = vtanh.f32 %v594_v48  ;;  %v603_v55 = vmul.f32 0.5, %v593_v54  ;;  %v5376_v54 = vld [vmem:[#allocation41_spill] sm:$0xff] }
 0x122   :  { %2821 = vtanh.f32 %v598_v46 }
 0x123   :  { %2823 = vtanh.f32 %v592_v57  ;;  %v5374_v57 = vld [vmem:[#allocation39_spill] sm:$0xff] }
 0x124   :  { %2825 = vtanh.f32 %v603_v55  ;;  %v5377_v55 = vld [vmem:[#allocation42_spill] sm:$0xff] }
 0x12b   :  { %v2820_v27 = vpop.eup %2819 }
 0x12c   :  { %v2822_v38 = vpop.eup %2821  ;;  %v596_v63 = vmul.f32 0.5, %v2820_v27  ;;  %v5378_v27 = vld [vmem:[#allocation43_spill] sm:$0xff] }
 0x12d   :  { %v600_v53 = vmul.f32 0.5, %v2822_v38  ;;  %v2824_v0 = vpop.eup %2823  ;;  %v5371_v38 = vld [vmem:[#allocation36_spill] sm:$0xff] }
 0x12e   :  { %v597_v50 = vadd.f32 0.5, %v596_v63  ;;  %v2826_v2 = vpop.eup %2825  ;;  %v5379_v63 = vld [vmem:[#allocation44_spill] sm:$0xff] }
 0x12f   :  { %v601_v49 = vadd.f32 0.5, %v600_v53  ;;  %v605_v48 = vmul.f32 0.5, %v2826_v2  ;;  %v5348_v53 = vmov 0   ;;  %v5385_v2 = vld [vmem:[#allocation50_spill] sm:$0xff] }
 0x130   :  { %v608_v51 = vmul.f32 %v2824_v0, %v597_v50  ;;  %v5380_v50 = vld [vmem:[#allocation45_spill] sm:$0xff]  ;;  %v5381_v0 = vld [vmem:[#allocation46_spill] sm:$0xff] }
 0x131   :  { %v607_v61 = vmul.f32 0.0, %v601_v49  ;;  %v606_v46 = vadd.f32 0.5, %v605_v48  ;;  %v5382_v49 = vld [vmem:[#allocation47_spill] sm:$0xff] }
 0x132   :  { %v5386_v48 = vld [vmem:[#allocation51_spill] sm:$0xff] }
 0x133   :  { %v3673_v47 = vadd.f32 %v608_v51, %v607_v61  ;;  %v5383_v51 = vld [vmem:[#allocation48_spill] sm:$0xff]  ;;  %v5384_v61 = vld [vmem:[#allocation49_spill] sm:$0xff] }
 0x135   :  { %2827 = vtanh.f32 %v3673_v47 }
 0x13f   :  { %v2828_v60 = vpop.eup %2827 }
 0x140   :  { %v611_v59 = vmul.f32 %v2828_v60, %v606_v46  ;;  %v5387_v46 = vld [vmem:[#allocation52_spill] sm:$0xff]  ;;  %v5388_v60 = vld [vmem:[#allocation53_spill] sm:$0xff] }
 0x142   :  { %v612_v35 = vpack.c.bf16 %v611_v59, %v611_v59  ;;  %v5389_v59 = vld [vmem:[#allocation54_spill] sm:$0xff] }
 0x144   :  { %988 = vmatmul.mubr.bf16.vlgmr.msra.gmra.mrb[4].mxu0 %v612_v35  ;;  %1029 = vmatmul.mubr.bf16.vlgmr.msra.gmra.mrb[4].mxu1 %v612_v35 }
 0x145   :  { %1043 = vmatpush1.bf16.msra.mxu0 %v3328_v3  ;;  %1084 = vmatpush1.bf16.msra.mxu1 %v3330_v4  ;;  %v5349_v3 = vld [vmem:[#allocation14_spill] sm:$0xff]  ;;  %v5350_v4 = vld [vmem:[#allocation15_spill] sm:$0xff] }
 0x146   :  { %1044 = vmatprep.subr.bf16.mxu0 %v3333_v5  ;;  %1085 = vmatprep.subr.bf16.mxu1 %v3337_v6  ;;  %v5351_v5 = vld [vmem:[#allocation16_spill] sm:$0xff]  ;;  %v5352_v6 = vld [vmem:[#allocation17_spill] sm:$0xff] }
 0x147   :  { %1074 = vmatprep.mubr.bf16.mxu0 %v5348_v53  ;;  %1115 = vmatprep.mubr.bf16.mxu1 %v5348_v53 }
 0x149   :  { %1045 = vmatpush1.bf16.msra.mxu0 %v3339_v7  ;;  %1086 = vmatpush1.bf16.msra.mxu1 %v3342_v8  ;;  %v5353_v7 = vld [vmem:[#allocation18_spill] sm:$0xff]  ;;  %v5354_v8 = vld [vmem:[#allocation19_spill] sm:$0xff] }
 0x14a   :  { %1046 = vmatprep.subr.bf16.mxu0 %v3345_v9  ;;  %1087 = vmatprep.subr.bf16.mxu1 %v3347_v10  ;;  %v5355_v9 = vld [vmem:[#allocation20_spill] sm:$0xff]  ;;  %v5356_v10 = vld [vmem:[#allocation21_spill] sm:$0xff] }
 0x14d   :  { %1047 = vmatpush1.bf16.msra.mxu0 %v3349_v11  ;;  %1088 = vmatpush1.bf16.msra.mxu1 %v3351_v12  ;;  %v5357_v11 = vld [vmem:[#allocation22_spill] sm:$0xff]  ;;  %v5358_v12 = vld [vmem:[#allocation23_spill] sm:$0xff] }
 0x14e   :  { %1048 = vmatprep.subr.bf16.mxu0 %v3355_v13  ;;  %1089 = vmatprep.subr.bf16.mxu1 %v3359_v14  ;;  %v5359_v13 = vld [vmem:[#allocation24_spill] sm:$0xff]  ;;  %v5360_v14 = vld [vmem:[#allocation25_spill] sm:$0xff] }
 0x151   :  { %1049 = vmatpush1.bf16.msra.mxu0 %v3361_v15  ;;  %1090 = vmatpush1.bf16.msra.mxu1 %v3365_v16  ;;  %v5361_v15 = vld [vmem:[#allocation26_spill] sm:$0xff]  ;;  %v5362_v16 = vld [vmem:[#allocation27_spill] sm:$0xff] }
 0x152   :  { %1050 = vmatprep.subr.bf16.mxu0 %v3367_v17  ;;  %1091 = vmatprep.subr.bf16.mxu1 %v3371_v18  ;;  %v5363_v17 = vld [vmem:[#allocation28_spill] sm:$0xff]  ;;  %v5364_v18 = vld [vmem:[#allocation29_spill] sm:$0xff] }
 0x155   :  { %1051 = vmatpush1.bf16.msra.mxu0 %v3373_v19  ;;  %1092 = vmatpush1.bf16.msra.mxu1 %v3375_v20  ;;  %v5365_v19 = vld [vmem:[#allocation30_spill] sm:$0xff]  ;;  %v5366_v20 = vld [vmem:[#allocation31_spill] sm:$0xff] }
 0x156   :  { %1052 = vmatprep.subr.bf16.mxu0 %v3379_v21  ;;  %1093 = vmatprep.subr.bf16.mxu1 %v3383_v22  ;;  %v5367_v21 = vld [vmem:[#allocation32_spill] sm:$0xff]  ;;  %v5368_v22 = vld [vmem:[#allocation33_spill] sm:$0xff] }
 0x159   :  { %1053 = vmatpush1.bf16.msra.mxu0 %v3387_v23  ;;  %1094 = vmatpush1.bf16.msra.mxu1 %v3389_v24  ;;  %v5369_v23 = vld [vmem:[#allocation34_spill] sm:$0xff]  ;;  %v5370_v24 = vld [vmem:[#allocation35_spill] sm:$0xff] }
 0x15a   :  { %1054 = vmatprep.subr.bf16.mxu0 %v3393_v25  ;;  %1095 = vmatprep.subr.bf16.mxu1 %v3395_v26 }
 0x15d   :  { %1055 = vmatpush1.bf16.msra.mxu0 %v3400_v28  ;;  %1096 = vmatpush1.bf16.msra.mxu1 %v3407_v30 }
 0x15e   :  { %1056 = vmatprep.subr.bf16.mxu0 %v3409_v31  ;;  %1097 = vmatprep.subr.bf16.mxu1 %v3413_v32 }
 0x161   :  { %1057 = vmatpush1.bf16.msra.mxu0 %v3415_v33  ;;  %1098 = vmatpush1.bf16.msra.mxu1 %v3417_v34 }
 0x162   :  { %1166 = vmatprep.subr.bf16.mxu0 %v3424_v36  ;;  %1207 = vmatprep.subr.bf16.mxu1 %v3428_v37 }
 0x164   :  { %1075 = vmatmul.mubr.bf16.vlgmr.msra.gmra.mrb[8].mxu0 %v612_v35  ;;  %1116 = vmatmul.mubr.bf16.vlgmr.msra.gmra.mrb[8].mxu1 %v612_v35  ;;  %v5390_v35 = vld [vmem:[#allocation55_spill] sm:$0xff] }
 0x165   :  { %1167 = vmatpush1.bf16.msra.mxu0 %v3433_v39  ;;  %1208 = vmatpush1.bf16.msra.mxu1 %v3437_v40 }
 0x166   :  { %1168 = vmatprep.subr.bf16.mxu0 %v3439_v41  ;;  %1209 = vmatprep.subr.bf16.mxu1 %v3443_v42 }
 0x169   :  { %1169 = vmatpush1.bf16.msra.mxu0 %v3447_v43  ;;  %1210 = vmatpush1.bf16.msra.mxu1 %v3449_v44 }
 0x16a   :  { %1170 = vmatprep.subr.bf16.mxu0 %v3453_v45  ;;  %1211 = vmatprep.subr.bf16.mxu1 %v5349_v3 }
 0x16d   :  { %1171 = vmatpush1.bf16.msra.mxu0 %v5350_v4  ;;  %1212 = vmatpush1.bf16.msra.mxu1 %v5351_v5 }
 0x16e   :  { %1172 = vmatprep.subr.bf16.mxu0 %v5352_v6  ;;  %1213 = vmatprep.subr.bf16.mxu1 %v5353_v7 }
 0x171   :  { %1173 = vmatpush1.bf16.msra.mxu0 %v5354_v8  ;;  %1214 = vmatpush1.bf16.msra.mxu1 %v5355_v9 }
 0x172   :  { %1174 = vmatprep.subr.bf16.mxu0 %v5356_v10  ;;  %1215 = vmatprep.subr.bf16.mxu1 %v5357_v11 }
 0x175   :  { %1175 = vmatpush1.bf16.msra.mxu0 %v5358_v12  ;;  %1216 = vmatpush1.bf16.msra.mxu1 %v5359_v13 }
 0x176   :  { %1176 = vmatprep.subr.bf16.mxu0 %v5360_v14  ;;  %1217 = vmatprep.subr.bf16.mxu1 %v5361_v15 }
 0x179   :  { %1177 = vmatpush1.bf16.msra.mxu0 %v5362_v16  ;;  %1218 = vmatpush1.bf16.msra.mxu1 %v5363_v17 }
 0x17a   :  { %1178 = vmatprep.subr.bf16.mxu0 %v5364_v18  ;;  %1219 = vmatprep.subr.bf16.mxu1 %v5365_v19 }
 0x17d   :  { %1179 = vmatpush1.bf16.msra.mxu0 %v5366_v20  ;;  %1220 = vmatpush1.bf16.msra.mxu1 %v5367_v21 }
 0x17e   :  { %1180 = vmatprep.subr.bf16.mxu0 %v5368_v22  ;;  %1221 = vmatprep.subr.bf16.mxu1 %v5369_v23  ;;  %v5418_v23 = vld [vmem:[#allocation76_spill] sm:$0xff] }
 0x181   :  { %1181 = vmatpush1.bf16.msra.mxu0 %v5370_v24  ;;  %1222 = vmatpush1.bf16.msra.mxu1 %v5371_v38 }
 0x182   :  { %1182 = vmatprep.subr.bf16.mxu0 %v5372_v62  ;;  %1223 = vmatprep.subr.bf16.mxu1 %v5373_v29 }
 0x185   :  { %1183 = vmatpush1.bf16.msra.mxu0 %v5374_v57  ;;  %1224 = vmatpush1.bf16.msra.mxu1 %v5375_v52 }
 0x186   :  { %1184 = vmatprep.subr.bf16.mxu0 %v5376_v54  ;;  %1225 = vmatprep.subr.bf16.mxu1 %v5377_v55 }
 0x189   :  { %1185 = vmatpush1.bf16.msra.mxu0 %v5378_v27  ;;  %1226 = vmatpush1.bf16.msra.mxu1 %v5379_v63 }
 0x18a   :  { %1186 = vmatprep.subr.bf16.mxu0 %v5380_v50  ;;  %1227 = vmatprep.subr.bf16.mxu1 %v5381_v0  ;;  %v5391_v50 = vld [vmem:[#allocation56_spill] sm:$0xff]  ;;  %v5392_v0 = vld [vmem:[#allocation57_spill] sm:$0xff] }
 0x18d   :  { %1187 = vmatpush1.bf16.msra.mxu0 %v5382_v49  ;;  %1228 = vmatpush1.bf16.msra.mxu1 %v5383_v51  ;;  %v5393_v49 = vld [vmem:[#allocation58_spill] sm:$0xff]  ;;  %v5394_v51 = vld [vmem:[#allocation59_spill] sm:$0xff] }
 0x18e   :  { %1188 = vmatprep.subr.bf16.mxu0 %v5384_v61  ;;  %1229 = vmatprep.subr.bf16.mxu1 %v5385_v2  ;;  %v5395_v61 = vld [vmem:[#allocation60_spill] sm:$0xff]  ;;  %v5396_v2 = vld [vmem:[#allocation61_spill] sm:$0xff] }
 0x191   :  { %1189 = vmatpush1.bf16.msra.mxu0 %v5386_v48  ;;  %1230 = vmatpush1.bf16.msra.mxu1 %v5387_v46  ;;  %v5397_v48 = vld [vmem:[#allocation62_spill] sm:$0xff]  ;;  %v5398_v46 = vld [vmem:[#allocation63_spill] sm:$0xff] }
 0x192   :  { %1190 = vmatprep.subr.bf16.mxu0 %v5388_v60  ;;  %1231 = vmatprep.subr.bf16.mxu1 %v5389_v59  ;;  %v5399_v60 = vld [vmem:[#allocation64_spill] sm:$0xff]  ;;  %v5400_v59 = vld [vmem:[#allocation65_spill] sm:$0xff] }
 0x195   :  { %1191 = vmatpush1.bf16.msra.mxu0 %v5390_v35  ;;  %1232 = vmatpush1.bf16.msra.mxu1 %v5391_v50  ;;  %v5401_v35 = vld [vmem:[#allocation66_spill] sm:$0xff]  ;;  %v5402_v50 = vld [vmem:[#allocation67_spill] sm:$0xff] }
 0x196   :  { %1192 = vmatprep.subr.bf16.mxu0 %v5392_v0  ;;  %1233 = vmatprep.subr.bf16.mxu1 %v5393_v49  ;;  %v5403_v0 = vld [vmem:[#allocation68_spill] sm:$0xff] }
 0x197   :  { %v5404_v49 = vld [vmem:[#allocation12_spill] sm:$0xff] }
 0x199   :  { %1193 = vmatpush1.bf16.msra.mxu0 %v5394_v51  ;;  %1234 = vmatpush1.bf16.msra.mxu1 %v5395_v61  ;;  %v5405_v51 = vld [vmem:[#allocation13_spill] sm:$0xff] }
 0x19a   :  { %1194 = vmatprep.subr.bf16.mxu0 %v5396_v2  ;;  %1235 = vmatprep.subr.bf16.mxu1 %v5397_v48  ;;  %v61_v48 = vld [vmem:[%s4930_s0 + $0x10] sm:$0xff] }
 0x19b   :  { %80 = vperm.xlu1 %2674, %v61_v48   ;;  %v5406_v48 = vld [vmem:[#allocation69_spill] sm:$0xff] }
 0x19d   :  { %1195 = vmatpush1.bf16.msra.mxu0 %v5398_v46  ;;  %1236 = vmatpush1.bf16.msra.mxu1 %v5399_v60  ;;  %v62_v60 = vld [vmem:[%s4930_s0 + $0x18] sm:$0xff] }
 0x19e   :  { %1196 = vmatprep.subr.bf16.mxu0 %v5400_v59  ;;  %1237 = vmatprep.subr.bf16.mxu1 %v5401_v35  ;;  %v5408_v35 = vld [vmem:[#allocation70_spill] sm:$0xff] }
 0x19f   :  { %85 = vperm.xlu1 %2674, %v62_v60  }
 0x1a1   :  { %1197 = vmatpush1.bf16.msra.mxu0 %v5402_v50  ;;  %1238 = vmatpush1.bf16.msra.mxu1 %v5403_v0  ;;  %v64_v50 = vld [vmem:[%s4930_s0 + $0x28] sm:$0xff] }
 0x1a2   :  { %1253 = vmatprep.subr.bf16.mxu0 %v5404_v49  ;;  %1294 = vmatprep.subr.bf16.mxu1 %v5405_v51  ;;  %v66_v49 = vld [vmem:[%s4930_s0 + $0x38] sm:$0xff]  ;;  %v343_v51 = vld [vmem:[%s4935_s5] sm:$0xf] }
 0x1a3   :  { %95 = vperm.xlu1 %2674, %v64_v50   ;;  %v3790_v0 = vrot.slane %v343_v51, %v5406_v48  ;;  %v3793_v59 = vrot.slane %v343_v51, %v5408_v35  ;;  %v5410_v50 = vld [vmem:[#allocation72_spill] sm:$0xff]  ;;  %v3802_v62 = vrot.slane %v343_v51, %v3652_v58  ;;  %v76_v58 = vpop.permute.xlu0 %75 }
 0x1a4   :  { %v3797_v61 = vrot.slane %v343_v51, %v5410_v50 }
 0x1a5   :  { %5407 = vst [vmem:[#allocation14_spill] sm:$0xff] %v3790_v0  ;;  %5409 = vst [vmem:[#allocation15_spill] sm:$0xff] %v3793_v59 }
 0x1a6   :  { %5411 = vst [vmem:[#allocation16_spill] sm:$0xff] %v3797_v61  ;;  %5412 = vst [vmem:[#allocation17_spill] sm:$0xff] %v3802_v62 }
 0x1a7   :  { %105 = vperm.xlu1 %2674, %v66_v49  }
 0x217   :  { %v989_v60 = vpop.f32.mrb[4].mxu0  ;;  %v1030_v46 = vpop.f32.mrb[4].mxu1 }
 0x218   :  { %v990_v2 = vadd.f32 %v989_v60, %v3790_v0  ;;  %v991_v63 = vpop.f32.mrb[5].mxu0  ;;  %v1032_v27 = vpop.f32.mrb[5].mxu1  ;;  %v1031_v35 = vadd.f32 %v1030_v46, %v3797_v61  ;;  %v5414_v46 = vld [vmem:[#allocation71_spill] sm:$0xff] }
 0x219   :  { %v992_v49 = vadd.f32 %v991_v63, %v3793_v59  ;;  %v993_v55 = vpop.f32.mrb[6].mxu0  ;;  %v1034_v54 = vpop.f32.mrb[6].mxu1  ;;  %v1033_v60 = vadd.f32 %v1032_v27, %v3802_v62  ;;  %v133_v51 = vmul.f32 %v5414_v46, %v76_v58  ;;  %v5415_v27 = vld [vmem:[#allocation73_spill] sm:$0xff]  ;;  %v5416_v62 = vld [vmem:[#allocation74_spill] sm:$0xff] }
 0x21a   :  { %v1128_v52 = vmul.f32 0.5, %v990_v2  ;;  %v994_v57 = vpop.f32.mrb[7].mxu0  ;;  %v1035_v48 = vpop.f32.mrb[7].mxu1 }
 0x21b   :  { %v1132_v29 = vmul.f32 0.5, %v992_v49  ;;  %v1137_v50 = vmul.f32 0.5, %v1033_v60 }
 0x21c   :  { %2829 = vtanh.f32 %v1128_v52 }
 0x21d   :  { %2831 = vtanh.f32 %v1132_v29 }
 0x21e   :  { %2833 = vtanh.f32 %v1031_v35  ;;  %v134_v35 = vmul.f32 %v5415_v27, %v76_v58 }
 0x21f   :  { %2835 = vtanh.f32 %v1137_v50 }
 0x226   :  { %v2830_v0 = vpop.eup %2829 }
 0x227   :  { %v2832_v38 = vpop.eup %2831  ;;  %v1130_v63 = vmul.f32 0.5, %v2830_v0  ;;  %v187_v0 = vadd.f32 %v5416_v62, %v133_v51 }
 0x228   :  { %v1134_v55 = vmul.f32 0.5, %v2832_v38  ;;  %v2834_v57 = vpop.eup %2833  ;;  %v5417_v38 = vld [vmem:[#allocation75_spill] sm:$0xff] }
 0x229   :  { %v1131_v54 = vadd.f32 0.5, %v1130_v63  ;;  %v2836_v29 = vpop.eup %2835  ;;  %v135_v50 = vmul.f32 %v5417_v38, %v76_v58 }
 0x22a   :  { %v1135_v2 = vadd.f32 0.5, %v1134_v55  ;;  %v1139_v60 = vmul.f32 0.5, %v2836_v29  ;;  %v188_v55 = vadd.f32 %v3656_v56, %v134_v35  ;;  %v5419_v29 = vld [vmem:[#allocation77_spill] sm:$0xff] }
 0x22b   :  { %v1142_v49 = vmul.f32 %v2834_v57, %v1131_v54  ;;  %v189_v27 = vadd.f32 %v5418_v23, %v135_v50  ;;  %v136_v22 = vmul.f32 %v5419_v29, %v76_v58 }
 0x22c   :  { %v1141_v52 = vmul.f32 0.0, %v1135_v2 }
 0x22e   :  { %v3805_v48 = vadd.f32 %v1142_v49, %v1141_v52  ;;  %v1140_v49 = vadd.f32 0.5, %v1139_v60 }
 0x230   :  { %5413 = vst [vmem:[#allocation18_spill] sm:$0xff] %v3805_v48  ;;  %2837 = vtanh.f32 %v3805_v48 }
 0x237   :  { %v1076_v63 = vpop.f32.mrb[8].mxu0  ;;  %v1117_v61 = vpop.f32.mrb[8].mxu1 }
 0x238   :  { %v1124_v54 = vadd.f32 %v1076_v63, %v187_v0  ;;  %v1078_v57 = vpop.f32.mrb[9].mxu0  ;;  %v1119_v2 = vpop.f32.mrb[9].mxu1  ;;  %v1126_v20 = vadd.f32 %v1117_v61, %v189_v27  ;;  %v190_v0 = vadd.f32 %v3670_v1, %v136_v22 }
 0x239   :  { %v1125_v52 = vadd.f32 %v1078_v57, %v188_v55  ;;  %v1080_v48 = vpop.f32.mrb[10].mxu0  ;;  %v1121_v59 = vpop.f32.mrb[10].mxu1 }
 0x23a   :  { %v2838_v24 = vpop.eup %2837  ;;  %v1146_v46 = vmul.f32 0.5, %v1124_v54  ;;  %v1081_v51 = vpop.f32.mrb[11].mxu0  ;;  %v1127_v59 = vadd.f32 %v1119_v2, %v190_v0  ;;  %v3820_v2 = vld [vmem:[#allocation3] ss:$16 sps:$4 sm:$0xff]   ;;  %v3840_v0 = vld [vmem:[#allocation3 + $0x44] ss:$16 sps:$4 sm:$0xff]  }
 0x23b   :  { %v1122_v62 = vpop.f32.mrb[11].mxu1  ;;  %v1150_v38 = vmul.f32 0.5, %v1125_v52  ;;  %v1145_v21 = vmul.f32 %v2838_v24, %v1140_v49  ;;  %v3823_v49 = vld [vmem:[#allocation3 + $0x8] ss:$16 sps:$4 sm:$0xff]   ;;  %v3829_v52 = vld [vmem:[#allocation3 + $0x2c] ss:$16 sps:$4 sm:$0xff]  }
 0x23c   :  { %2839 = vtanh.f32 %v1146_v46  ;;  %v1155_v48 = vmul.f32 0.5, %v1127_v59  ;;  %v3834_v51 = vld [vmem:[#allocation3 + $0x20] ss:$16 sps:$4 sm:$0xff]   ;;  %v3843_v59 = vld [vmem:[#allocation3 + $0x4c] ss:$16 sps:$4 sm:$0xff]  }
 0x23d   :  { %2841 = vtanh.f32 %v1150_v38  ;;  %v1165_v35 = vpack.c.bf16 %v1145_v21, %v1145_v21 }
 0x23e   :  { %2843 = vtanh.f32 %v1126_v20 }
 0x23f   :  { %1198 = vmatprep.mubr.bf16.mxu0 %v1165_v35  ;;  %1239 = vmatprep.mubr.bf16.mxu1 %v1165_v35  ;;  %2845 = vtanh.f32 %v1155_v48  ;;  %v3837_v35 = vld [vmem:[#allocation3 + $0x28] ss:$16 sps:$4 sm:$0xff]   ;;  %v3846_v48 = vld [vmem:[#allocation3 + $0x40] ss:$16 sps:$4 sm:$0xff]  }
 0x246   :  { %v2840_v60 = vpop.eup %2839 }
 0x247   :  { %v2842_v63 = vpop.eup %2841  ;;  %v1148_v50 = vmul.f32 0.5, %v2840_v60  ;;  %v3849_v60 = vld [vmem:[#allocation3 + $0x48] ss:$16 sps:$4 sm:$0xff]  }
 0x248   :  { %v1152_v55 = vmul.f32 0.5, %v2842_v63  ;;  %v2844_v62 = vpop.eup %2843  ;;  %v3852_v63 = vld [vmem:[#allocation3 + $0x64] ss:$16 sps:$4 sm:$0xff]  }
 0x249   :  { %v1149_v58 = vadd.f32 0.5, %v1148_v50  ;;  %v2846_v21 = vpop.eup %2845  ;;  %v3855_v50 = vld [vmem:[#allocation3 + $0x6c] ss:$16 sps:$4 sm:$0xff]  }
 0x24a   :  { %v1153_v54 = vadd.f32 0.5, %v1152_v55  ;;  %v1157_v22 = vmul.f32 0.5, %v2846_v21  ;;  %v3858_v55 = vld [vmem:[#allocation3 + $0x60] ss:$16 sps:$4 sm:$0xff]   ;;  %v3876_v21 = vld [vmem:[#allocation3 + $0xa4] ss:$16 sps:$4 sm:$0xff]  }
 0x24b   :  { %v1160_v24 = vmul.f32 %v2844_v62, %v1149_v58  ;;  %v3861_v58 = vld [vmem:[#allocation3 + $0x68] ss:$16 sps:$4 sm:$0xff]   ;;  %v3864_v62 = vld [vmem:[#allocation3 + $0x84] ss:$16 sps:$4 sm:$0xff]  }
 0x24c   :  { %v1159_v61 = vmul.f32 %v1153_v54, %v3673_v47  ;;  %v1158_v20 = vadd.f32 0.5, %v1157_v22  ;;  %v3826_v47 = vld [vmem:[#allocation3 + $0x24] ss:$16 sps:$4 sm:$0xff]   ;;  %v3867_v54 = vld [vmem:[#allocation3 + $0x8c] ss:$16 sps:$4 sm:$0xff]  }
 0x24d   :  { %v3879_v22 = vld [vmem:[#allocation3 + $0xac] ss:$16 sps:$4 sm:$0xff]  }
 0x24e   :  { %v3817_v46 = vadd.f32 %v1160_v24, %v1159_v61  ;;  %v3870_v24 = vld [vmem:[#allocation3 + $0x80] ss:$16 sps:$4 sm:$0xff]   ;;  %v3873_v61 = vld [vmem:[#allocation3 + $0x88] ss:$16 sps:$4 sm:$0xff]  }
 0x250   :  { %2847 = vtanh.f32 %v3817_v46 }
 0x25a   :  { %v2848_v27 = vpop.eup %2847 }
 0x25b   :  { %v1163_v38 = vmul.f32 %v2848_v27, %v1158_v20  ;;  %v3882_v20 = vld [vmem:[#allocation3 + $0xa0] ss:$16 sps:$4 sm:$0xff]   ;;  %v3885_v27 = vld [vmem:[#allocation3 + $0xa8] ss:$16 sps:$4 sm:$0xff]  }
 0x25d   :  { %v1164_v57 = vpack.c.bf16 %v1163_v38, %v1163_v38  ;;  %v5454_v38 = vld [vmem:[#allocation65_spill] sm:$0xff] }
 0x25f   :  { %1199 = vmatmul.mubr.bf16.vlgmr.msra.gmra.mrb[12].mxu0 %v1164_v57  ;;  %1240 = vmatmul.mubr.bf16.vlgmr.msra.gmra.mrb[12].mxu1 %v1164_v57 }
 0x260   :  { %1254 = vmatpush1.bf16.msra.mxu0 %v3820_v2  ;;  %1295 = vmatpush1.bf16.msra.mxu1 %v3823_v49 }
 0x261   :  { %1255 = vmatprep.subr.bf16.mxu0 %v3826_v47  ;;  %1296 = vmatprep.subr.bf16.mxu1 %v3829_v52 }
 0x262   :  { %1285 = vmatprep.mubr.bf16.mxu0 %v5348_v53  ;;  %1326 = vmatprep.mubr.bf16.mxu1 %v5348_v53 }
 0x264   :  { %1256 = vmatpush1.bf16.msra.mxu0 %v3834_v51  ;;  %1297 = vmatpush1.bf16.msra.mxu1 %v3837_v35 }
 0x265   :  { %1257 = vmatprep.subr.bf16.mxu0 %v3840_v0  ;;  %1298 = vmatprep.subr.bf16.mxu1 %v3843_v59 }
 0x268   :  { %1258 = vmatpush1.bf16.msra.mxu0 %v3846_v48  ;;  %1299 = vmatpush1.bf16.msra.mxu1 %v3849_v60 }
 0x269   :  { %1259 = vmatprep.subr.bf16.mxu0 %v3852_v63  ;;  %1300 = vmatprep.subr.bf16.mxu1 %v3855_v50 }
 0x26c   :  { %1260 = vmatpush1.bf16.msra.mxu0 %v3858_v55  ;;  %1301 = vmatpush1.bf16.msra.mxu1 %v3861_v58 }
 0x26d   :  { %1261 = vmatprep.subr.bf16.mxu0 %v3864_v62  ;;  %1302 = vmatprep.subr.bf16.mxu1 %v3867_v54 }
 0x270   :  { %1262 = vmatpush1.bf16.msra.mxu0 %v3870_v24  ;;  %1303 = vmatpush1.bf16.msra.mxu1 %v3873_v61 }
 0x271   :  { %1263 = vmatprep.subr.bf16.mxu0 %v3876_v21  ;;  %1304 = vmatprep.subr.bf16.mxu1 %v3879_v22 }
 0x274   :  { %1264 = vmatpush1.bf16.msra.mxu0 %v3882_v20  ;;  %1305 = vmatpush1.bf16.msra.mxu1 %v3885_v27 }
 0x275   :  { %1265 = vmatprep.subr.bf16.mxu0 %v3393_v25  ;;  %1306 = vmatprep.subr.bf16.mxu1 %v3395_v26  ;;  %v5420_v25 = vld [vmem:[#allocation31_spill] sm:$0xff]  ;;  %v5421_v26 = vld [vmem:[#allocation32_spill] sm:$0xff] }
 0x278   :  { %1266 = vmatpush1.bf16.msra.mxu0 %v3400_v28  ;;  %1307 = vmatpush1.bf16.msra.mxu1 %v3407_v30  ;;  %v5422_v28 = vld [vmem:[#allocation33_spill] sm:$0xff]  ;;  %v5423_v30 = vld [vmem:[#allocation34_spill] sm:$0xff] }
 0x279   :  { %1267 = vmatprep.subr.bf16.mxu0 %v3409_v31  ;;  %1308 = vmatprep.subr.bf16.mxu1 %v3413_v32  ;;  %v5424_v31 = vld [vmem:[#allocation35_spill] sm:$0xff]  ;;  %v5425_v32 = vld [vmem:[#allocation36_spill] sm:$0xff] }
 0x27c   :  { %1268 = vmatpush1.bf16.msra.mxu0 %v3415_v33  ;;  %1309 = vmatpush1.bf16.msra.mxu1 %v3417_v34  ;;  %v5426_v33 = vld [vmem:[#allocation37_spill] sm:$0xff]  ;;  %v5427_v34 = vld [vmem:[#allocation38_spill] sm:$0xff] }
 0x27d   :  { %1377 = vmatprep.subr.bf16.mxu0 %v3424_v36  ;;  %1418 = vmatprep.subr.bf16.mxu1 %v3428_v37  ;;  %v5428_v36 = vld [vmem:[#allocation39_spill] sm:$0xff]  ;;  %v5429_v37 = vld [vmem:[#allocation40_spill] sm:$0xff] }
 0x27f   :  { %1286 = vmatmul.mubr.bf16.vlgmr.msra.gmra.mrb[16].mxu0 %v1164_v57  ;;  %1327 = vmatmul.mubr.bf16.vlgmr.msra.gmra.mrb[16].mxu1 %v1164_v57  ;;  %v5455_v57 = vld [vmem:[#allocation66_spill] sm:$0xff] }
 0x280   :  { %1378 = vmatpush1.bf16.msra.mxu0 %v3433_v39  ;;  %1419 = vmatpush1.bf16.msra.mxu1 %v3437_v40  ;;  %v5430_v39 = vld [vmem:[#allocation41_spill] sm:$0xff]  ;;  %v5431_v40 = vld [vmem:[#allocation42_spill] sm:$0xff] }
 0x281   :  { %1379 = vmatprep.subr.bf16.mxu0 %v3439_v41  ;;  %1420 = vmatprep.subr.bf16.mxu1 %v3443_v42  ;;  %v5432_v41 = vld [vmem:[#allocation43_spill] sm:$0xff]  ;;  %v5433_v42 = vld [vmem:[#allocation44_spill] sm:$0xff] }
 0x284   :  { %1380 = vmatpush1.bf16.msra.mxu0 %v3447_v43  ;;  %1421 = vmatpush1.bf16.msra.mxu1 %v3449_v44  ;;  %v5434_v43 = vld [vmem:[#allocation45_spill] sm:$0xff]  ;;  %v5435_v44 = vld [vmem:[#allocation46_spill] sm:$0xff] }
 0x285   :  { %1381 = vmatprep.subr.bf16.mxu0 %v3453_v45  ;;  %1422 = vmatprep.subr.bf16.mxu1 %v5349_v3  ;;  %v5436_v45 = vld [vmem:[#allocation47_spill] sm:$0xff]  ;;  %v5437_v3 = vld [vmem:[#allocation48_spill] sm:$0xff] }
 0x288   :  { %1382 = vmatpush1.bf16.msra.mxu0 %v5350_v4  ;;  %1423 = vmatpush1.bf16.msra.mxu1 %v5351_v5  ;;  %v5438_v4 = vld [vmem:[#allocation49_spill] sm:$0xff]  ;;  %v5439_v5 = vld [vmem:[#allocation50_spill] sm:$0xff] }
 0x289   :  { %1383 = vmatprep.subr.bf16.mxu0 %v5352_v6  ;;  %1424 = vmatprep.subr.bf16.mxu1 %v5353_v7  ;;  %v5440_v6 = vld [vmem:[#allocation51_spill] sm:$0xff]  ;;  %v5441_v7 = vld [vmem:[#allocation52_spill] sm:$0xff] }
 0x28c   :  { %1384 = vmatpush1.bf16.msra.mxu0 %v5354_v8  ;;  %1425 = vmatpush1.bf16.msra.mxu1 %v5355_v9  ;;  %v5442_v8 = vld [vmem:[#allocation53_spill] sm:$0xff]  ;;  %v5443_v9 = vld [vmem:[#allocation54_spill] sm:$0xff] }
 0x28d   :  { %1385 = vmatprep.subr.bf16.mxu0 %v5356_v10  ;;  %1426 = vmatprep.subr.bf16.mxu1 %v5357_v11  ;;  %v5444_v10 = vld [vmem:[#allocation55_spill] sm:$0xff]  ;;  %v5445_v11 = vld [vmem:[#allocation56_spill] sm:$0xff] }
 0x290   :  { %1386 = vmatpush1.bf16.msra.mxu0 %v5358_v12  ;;  %1427 = vmatpush1.bf16.msra.mxu1 %v5359_v13  ;;  %v5446_v12 = vld [vmem:[#allocation57_spill] sm:$0xff]  ;;  %v5447_v13 = vld [vmem:[#allocation58_spill] sm:$0xff] }
 0x291   :  { %1387 = vmatprep.subr.bf16.mxu0 %v5360_v14  ;;  %1428 = vmatprep.subr.bf16.mxu1 %v5361_v15  ;;  %v5448_v14 = vld [vmem:[#allocation59_spill] sm:$0xff]  ;;  %v5449_v15 = vld [vmem:[#allocation60_spill] sm:$0xff] }
 0x294   :  { %1388 = vmatpush1.bf16.msra.mxu0 %v5362_v16  ;;  %1429 = vmatpush1.bf16.msra.mxu1 %v5363_v17  ;;  %v5450_v16 = vld [vmem:[#allocation61_spill] sm:$0xff]  ;;  %v5451_v17 = vld [vmem:[#allocation62_spill] sm:$0xff] }
 0x295   :  { %1389 = vmatprep.subr.bf16.mxu0 %v5364_v18  ;;  %1430 = vmatprep.subr.bf16.mxu1 %v5365_v19  ;;  %v5452_v18 = vld [vmem:[#allocation63_spill] sm:$0xff]  ;;  %v5453_v19 = vld [vmem:[#allocation64_spill] sm:$0xff] }
 0x298   :  { %1390 = vmatpush1.bf16.msra.mxu0 %v5420_v25  ;;  %1431 = vmatpush1.bf16.msra.mxu1 %v5421_v26  ;;  %v5456_v25 = vld [vmem:[#allocation67_spill] sm:$0xff]  ;;  %v5457_v26 = vld [vmem:[#allocation68_spill] sm:$0xff] }
 0x299   :  { %1391 = vmatprep.subr.bf16.mxu0 %v5422_v28  ;;  %1432 = vmatprep.subr.bf16.mxu1 %v5423_v30  ;;  %v3960_v28 = vld [vmem:[#allocation3 + $0x4] ss:$16 sps:$4 sm:$0xff]   ;;  %v3963_v30 = vld [vmem:[#allocation3 + $0xc] ss:$16 sps:$4 sm:$0xff]  }
 0x29a   :  { %5458 = vst [vmem:[#allocation19_spill] sm:$0xff] %v3960_v28  ;;  %5459 = vst [vmem:[#allocation20_spill] sm:$0xff] %v3963_v30 }
 0x29c   :  { %1392 = vmatpush1.bf16.msra.mxu0 %v5424_v31  ;;  %1433 = vmatpush1.bf16.msra.mxu1 %v5425_v32 }
 0x29d   :  { %1393 = vmatprep.subr.bf16.mxu0 %v5426_v33  ;;  %1434 = vmatprep.subr.bf16.mxu1 %v5427_v34  ;;  %v5460_v33 = vld [vmem:[#allocation14_spill] sm:$0xff] }
 0x2a0   :  { %1394 = vmatpush1.bf16.msra.mxu0 %v5428_v36  ;;  %1435 = vmatpush1.bf16.msra.mxu1 %v5429_v37 }
 0x2a1   :  { %1395 = vmatprep.subr.bf16.mxu0 %v5430_v39  ;;  %1436 = vmatprep.subr.bf16.mxu1 %v5431_v40  ;;  %v5461_v39 = vld [vmem:[#allocation15_spill] sm:$0xff] }
 0x2a4   :  { %1396 = vmatpush1.bf16.msra.mxu0 %v5432_v41  ;;  %1437 = vmatpush1.bf16.msra.mxu1 %v5433_v42 }
 0x2a5   :  { %1397 = vmatprep.subr.bf16.mxu0 %v5434_v43  ;;  %1438 = vmatprep.subr.bf16.mxu1 %v5435_v44 }
 0x2a8   :  { %1398 = vmatpush1.bf16.msra.mxu0 %v5436_v45  ;;  %1439 = vmatpush1.bf16.msra.mxu1 %v5437_v3 }
 0x2a9   :  { %1399 = vmatprep.subr.bf16.mxu0 %v5438_v4  ;;  %1440 = vmatprep.subr.bf16.mxu1 %v5439_v5  ;;  %v5462_v4 = vld [vmem:[#allocation16_spill] sm:$0xff] }
 0x2ac   :  { %1400 = vmatpush1.bf16.msra.mxu0 %v5440_v6  ;;  %1441 = vmatpush1.bf16.msra.mxu1 %v5441_v7  ;;  %v5463_v6 = vld [vmem:[#allocation17_spill] sm:$0xff] }
 0x2ad   :  { %1401 = vmatprep.subr.bf16.mxu0 %v5442_v8  ;;  %1442 = vmatprep.subr.bf16.mxu1 %v5443_v9 }
 0x2b0   :  { %1402 = vmatpush1.bf16.msra.mxu0 %v5444_v10  ;;  %1443 = vmatpush1.bf16.msra.mxu1 %v5445_v11 }
 0x2b1   :  { %1403 = vmatprep.subr.bf16.mxu0 %v5446_v12  ;;  %1444 = vmatprep.subr.bf16.mxu1 %v5447_v13 }
 0x2b4   :  { %1404 = vmatpush1.bf16.msra.mxu0 %v5448_v14  ;;  %1445 = vmatpush1.bf16.msra.mxu1 %v5449_v15 }
 0x2b5   :  { %1405 = vmatprep.subr.bf16.mxu0 %v5450_v16  ;;  %1446 = vmatprep.subr.bf16.mxu1 %v5451_v17  ;;  %v5464_v17 = vld [vmem:[#allocation18_spill] sm:$0xff] }
 0x2b8   :  { %1406 = vmatpush1.bf16.msra.mxu0 %v5452_v18  ;;  %1447 = vmatpush1.bf16.msra.mxu1 %v5453_v19 }
 0x2b9   :  { %1407 = vmatprep.subr.bf16.mxu0 %v5454_v38  ;;  %1448 = vmatprep.subr.bf16.mxu1 %v5455_v57  ;;  %v81_v38 = vpop.permute.xlu1 %80  ;;  %v5465_v57 = vld [vmem:[#allocation71_spill] sm:$0xff] }
 0x2bc   :  { %1408 = vmatpush1.bf16.msra.mxu0 %v5456_v25  ;;  %1449 = vmatpush1.bf16.msra.mxu1 %v5457_v26  ;;  %v137_v25 = vmul.f32 %v5465_v57, %v81_v38  ;;  %v5466_v26 = vld [vmem:[#allocation73_spill] sm:$0xff] }
 0x2bd   :  { %1464 = vmatprep.subr.bf16.mxu0 %v3960_v28  ;;  %1505 = vmatprep.subr.bf16.mxu1 %v3963_v30 }
 0x332   :  { %v1200_v31 = vpop.f32.mrb[12].mxu0  ;;  %v1241_v32 = vpop.f32.mrb[12].mxu1 }
 0x333   :  { %v1201_v34 = vadd.f32 %v1200_v31, %v5460_v33  ;;  %v1202_v36 = vpop.f32.mrb[13].mxu0  ;;  %v1243_v37 = vpop.f32.mrb[13].mxu1  ;;  %v1242_v5 = vadd.f32 %v1241_v32, %v5462_v4  ;;  %v138_v31 = vmul.f32 %v5466_v26, %v81_v38 }
 0x334   :  { %v1203_v40 = vadd.f32 %v1202_v36, %v5461_v39  ;;  %v1204_v41 = vpop.f32.mrb[14].mxu0  ;;  %v1245_v42 = vpop.f32.mrb[14].mxu1  ;;  %v1244_v7 = vadd.f32 %v1243_v37, %v5463_v6  ;;  %v5468_v37 = vld [vmem:[#allocation75_spill] sm:$0xff] }
 0x335   :  { %v1339_v43 = vmul.f32 0.5, %v1201_v34  ;;  %v1205_v44 = vpop.f32.mrb[15].mxu0  ;;  %v1246_v45 = vpop.f32.mrb[15].mxu1  ;;  %v5467_v34 = vld [vmem:[#allocation74_spill] sm:$0xff]  ;;  %v192_v42 = vadd.f32 %v3656_v56, %v138_v31 }
 0x336   :  { %v1343_v3 = vmul.f32 0.5, %v1203_v40  ;;  %v1348_v8 = vmul.f32 0.5, %v1244_v7  ;;  %v191_v36 = vadd.f32 %v5467_v34, %v137_v25  ;;  %v139_v40 = vmul.f32 %v5468_v37, %v81_v38 }
 0x337   :  { %2849 = vtanh.f32 %v1339_v43  ;;  %v140_v7 = vmul.f32 %v5419_v29, %v81_v38 }
 0x338   :  { %2851 = vtanh.f32 %v1343_v3  ;;  %v193_v3 = vadd.f32 %v5418_v23, %v139_v40 }
 0x339   :  { %2853 = vtanh.f32 %v1242_v5  ;;  %v194_v31 = vadd.f32 %v3670_v1, %v140_v7 }
 0x33a   :  { %2855 = vtanh.f32 %v1348_v8 }
 0x341   :  { %v2850_v9 = vpop.eup %2849 }
 0x342   :  { %v2852_v10 = vpop.eup %2851  ;;  %v1341_v11 = vmul.f32 0.5, %v2850_v9 }
 0x343   :  { %v1345_v12 = vmul.f32 0.5, %v2852_v10  ;;  %v2854_v14 = vpop.eup %2853 }
 0x344   :  { %v1342_v13 = vadd.f32 0.5, %v1341_v11  ;;  %v2856_v32 = vpop.eup %2855 }
 0x345   :  { %v1346_v15 = vadd.f32 0.5, %v1345_v12  ;;  %v1350_v41 = vmul.f32 0.5, %v2856_v32 }
 0x346   :  { %v1353_v16 = vmul.f32 %v2854_v14, %v1342_v13 }
 0x347   :  { %v1352_v18 = vmul.f32 %v1346_v15, %v5464_v17  ;;  %v1351_v9 = vadd.f32 0.5, %v1350_v41 }
 0x349   :  { %v3971_v19 = vadd.f32 %v1353_v16, %v1352_v18 }
 0x34b   :  { %2857 = vtanh.f32 %v3971_v19 }
 0x352   :  { %v1287_v43 = vpop.f32.mrb[16].mxu0  ;;  %v1328_v44 = vpop.f32.mrb[16].mxu1 }
 0x353   :  { %v1335_v45 = vadd.f32 %v1287_v43, %v191_v36  ;;  %v1289_v5 = vpop.f32.mrb[17].mxu0  ;;  %v1330_v8 = vpop.f32.mrb[17].mxu1  ;;  %v1337_v25 = vadd.f32 %v1328_v44, %v193_v3 }
 0x354   :  { %v1336_v10 = vadd.f32 %v1289_v5, %v192_v42  ;;  %v1291_v11 = vpop.f32.mrb[18].mxu0  ;;  %v1332_v12 = vpop.f32.mrb[18].mxu1  ;;  %v1338_v38 = vadd.f32 %v1330_v8, %v194_v31  ;;  %v4028_v31 = vld [vmem:[#allocation3 + $0xe0] ss:$16 sps:$4 sm:$0xff]  }
 0x355   :  { %v2858_v13 = vpop.eup %2857  ;;  %v1357_v14 = vmul.f32 0.5, %v1335_v45  ;;  %v1292_v15 = vpop.f32.mrb[19].mxu0 }
 0x356   :  { %v1333_v16 = vpop.f32.mrb[19].mxu1  ;;  %v1361_v17 = vmul.f32 0.5, %v1336_v10  ;;  %v1356_v18 = vmul.f32 %v2858_v13, %v1351_v9  ;;  %v1366_v36 = vmul.f32 0.5, %v1338_v38  ;;  %v4013_v15 = vld [vmem:[#allocation3 + $0xcc] ss:$16 sps:$4 sm:$0xff]  }
 0x357   :  { %2859 = vtanh.f32 %v1357_v14  ;;  %v4016_v16 = vld [vmem:[#allocation3 + $0xc0] ss:$16 sps:$4 sm:$0xff]   ;;  %v4034_v38 = vld [vmem:[#allocation6 + $0x4] ss:$16 sps:$4 sm:$0xff]  }
 0x358   :  { %2861 = vtanh.f32 %v1361_v17  ;;  %v1376_v32 = vpack.c.bf16 %v1356_v18, %v1356_v18  ;;  %v4019_v17 = vld [vmem:[#allocation3 + $0xc8] ss:$16 sps:$4 sm:$0xff]   ;;  %v4022_v18 = vld [vmem:[#allocation3 + $0xe4] ss:$16 sps:$4 sm:$0xff]  }
 0x359   :  { %2863 = vtanh.f32 %v1337_v25  ;;  %v4025_v25 = vld [vmem:[#allocation3 + $0xec] ss:$16 sps:$4 sm:$0xff]  }
 0x35a   :  { %1409 = vmatprep.mubr.bf16.mxu0 %v1376_v32  ;;  %1450 = vmatprep.mubr.bf16.mxu1 %v1376_v32  ;;  %2865 = vtanh.f32 %v1366_v36  ;;  %v4031_v32 = vld [vmem:[#allocation3 + $0xe8] ss:$16 sps:$4 sm:$0xff]   ;;  %v4037_v36 = vld [vmem:[#allocation6 + $0xc] ss:$16 sps:$4 sm:$0xff]  }
 0x361   :  { %v2860_v40 = vpop.eup %2859 }
 0x362   :  { %v2862_v41 = vpop.eup %2861  ;;  %v1359_v42 = vmul.f32 0.5, %v2860_v40  ;;  %v4040_v40 = vld [vmem:[#allocation6] ss:$16 sps:$4 sm:$0xff]  }
 0x363   :  { %v1363_v43 = vmul.f32 0.5, %v2862_v41  ;;  %v2864_v5 = vpop.eup %2863  ;;  %5469 = vst [vmem:[#allocation21_spill] sm:$0xff] %v4040_v40  ;;  %v4043_v41 = vld [vmem:[#allocation6 + $0x8] ss:$16 sps:$4 sm:$0xff]  }
 0x364   :  { %v1360_v45 = vadd.f32 0.5, %v1359_v42  ;;  %v2866_v7 = vpop.eup %2865  ;;  %5470 = vst [vmem:[#allocation22_spill] sm:$0xff] %v4043_v41  ;;  %v4046_v42 = vld [vmem:[#allocation6 + $0x24] ss:$16 sps:$4 sm:$0xff]  }
 0x365   :  { %v1364_v10 = vadd.f32 0.5, %v1363_v43  ;;  %v1368_v11 = vmul.f32 0.5, %v2866_v7  ;;  %5471 = vst [vmem:[#allocation23_spill] sm:$0xff] %v4046_v42  ;;  %v4049_v43 = vld [vmem:[#allocation6 + $0x2c] ss:$16 sps:$4 sm:$0xff]  }
 0x366   :  { %v1371_v9 = vmul.f32 %v2864_v5, %v1360_v45  ;;  %5472 = vst [vmem:[#allocation24_spill] sm:$0xff] %v4049_v43  ;;  %v4052_v45 = vld [vmem:[#allocation6 + $0x20] ss:$16 sps:$4 sm:$0xff]   ;;  %v4055_v5 = vld [vmem:[#allocation6 + $0x28] ss:$16 sps:$4 sm:$0xff]  }
 0x367   :  { %v1370_v44 = vmul.f32 %v1364_v10, %v3817_v46  ;;  %v1369_v12 = vadd.f32 0.5, %v1368_v11  ;;  %v4010_v46 = vld [vmem:[#allocation3 + $0xc4] ss:$16 sps:$4 sm:$0xff]   ;;  %5473 = vst [vmem:[#allocation25_spill] sm:$0xff] %v4052_v45  ;;  %5474 = vst [vmem:[#allocation26_spill] sm:$0xff] %v4055_v5 }
 0x368   :  { %v4058_v10 = vld [vmem:[#allocation6 + $0x44] ss:$16 sps:$4 sm:$0xff]   ;;  %v4067_v7 = vld [vmem:[#allocation6 + $0x48] ss:$16 sps:$4 sm:$0xff]  }
 0x369   :  { %v3983_v3 = vadd.f32 %v1371_v9, %v1370_v44  ;;  %5475 = vst [vmem:[#allocation27_spill] sm:$0xff] %v4058_v10  ;;  %v4061_v9 = vld [vmem:[#allocation6 + $0x4c] ss:$16 sps:$4 sm:$0xff]   ;;  %v4064_v44 = vld [vmem:[#allocation6 + $0x40] ss:$16 sps:$4 sm:$0xff]   ;;  %5478 = vst [vmem:[#allocation30_spill] sm:$0xff] %v4067_v7 }
 0x36a   :  { %5476 = vst [vmem:[#allocation28_spill] sm:$0xff] %v4061_v9  ;;  %5477 = vst [vmem:[#allocation29_spill] sm:$0xff] %v4064_v44  ;;  %v4070_v11 = vld [vmem:[#allocation6 + $0x64] ss:$16 sps:$4 sm:$0xff]  }
 0x36b   :  { %2867 = vtanh.f32 %v3983_v3  ;;  %5479 = vst [vmem:[#allocation12_spill] sm:$0xff] %v4070_v11 }
 0x375   :  { %v2868_v8 = vpop.eup %2867 }
 0x376   :  { %v1374_v13 = vmul.f32 %v2868_v8, %v1369_v12  ;;  %v4073_v12 = vld [vmem:[#allocation6 + $0x6c] ss:$16 sps:$4 sm:$0xff]   ;;  %v4076_v8 = vld [vmem:[#allocation6 + $0x60] ss:$16 sps:$4 sm:$0xff]  }
 0x377   :  { %5480 = vst [vmem:[#allocation13_spill] sm:$0xff] %v4073_v12  ;;  %5481 = vst [vmem:[#allocation69_spill] sm:$0xff] %v4076_v8 }
 0x378   :  { %v1375_v14 = vpack.c.bf16 %v1374_v13, %v1374_v13  ;;  %v4079_v13 = vld [vmem:[#allocation6 + $0x68] ss:$16 sps:$4 sm:$0xff]  }
 0x379   :  { %5482 = vst [vmem:[#allocation70_spill] sm:$0xff] %v4079_v13 }
 0x37a   :  { %1410 = vmatmul.mubr.bf16.vlgmr.msra.gmra.mrb[20].mxu0 %v1375_v14  ;;  %1451 = vmatmul.mubr.bf16.vlgmr.msra.gmra.mrb[20].mxu1 %v1375_v14 }
 0x37b   :  { %1465 = vmatpush1.bf16.msra.mxu0 %v3820_v2  ;;  %1506 = vmatpush1.bf16.msra.mxu1 %v3823_v49 }
 0x37c   :  { %1466 = vmatprep.subr.bf16.mxu0 %v3826_v47  ;;  %1507 = vmatprep.subr.bf16.mxu1 %v3829_v52 }
 0x37d   :  { %1496 = vmatprep.mubr.bf16.mxu0 %v5348_v53  ;;  %1537 = vmatprep.mubr.bf16.mxu1 %v5348_v53 }
 0x37f   :  { %1467 = vmatpush1.bf16.msra.mxu0 %v3834_v51  ;;  %1508 = vmatpush1.bf16.msra.mxu1 %v3837_v35 }
 0x380   :  { %1468 = vmatprep.subr.bf16.mxu0 %v3840_v0  ;;  %1509 = vmatprep.subr.bf16.mxu1 %v3843_v59 }
 0x383   :  { %1469 = vmatpush1.bf16.msra.mxu0 %v3846_v48  ;;  %1510 = vmatpush1.bf16.msra.mxu1 %v3849_v60 }
 0x384   :  { %1470 = vmatprep.subr.bf16.mxu0 %v3852_v63  ;;  %1511 = vmatprep.subr.bf16.mxu1 %v3855_v50 }
 0x387   :  { %1471 = vmatpush1.bf16.msra.mxu0 %v3858_v55  ;;  %1512 = vmatpush1.bf16.msra.mxu1 %v3861_v58 }
 0x388   :  { %1472 = vmatprep.subr.bf16.mxu0 %v3864_v62  ;;  %1513 = vmatprep.subr.bf16.mxu1 %v3867_v54 }
 0x38b   :  { %1473 = vmatpush1.bf16.msra.mxu0 %v3870_v24  ;;  %1514 = vmatpush1.bf16.msra.mxu1 %v3873_v61 }
 0x38c   :  { %1474 = vmatprep.subr.bf16.mxu0 %v3876_v21  ;;  %1515 = vmatprep.subr.bf16.mxu1 %v3879_v22 }
 0x38f   :  { %1475 = vmatpush1.bf16.msra.mxu0 %v3882_v20  ;;  %1516 = vmatpush1.bf16.msra.mxu1 %v3885_v27 }
 0x390   :  { %1476 = vmatprep.subr.bf16.mxu0 %v4010_v46  ;;  %1517 = vmatprep.subr.bf16.mxu1 %v4013_v15 }
 0x393   :  { %1477 = vmatpush1.bf16.msra.mxu0 %v4016_v16  ;;  %1518 = vmatpush1.bf16.msra.mxu1 %v4019_v17 }
 0x394   :  { %1478 = vmatprep.subr.bf16.mxu0 %v4022_v18  ;;  %1519 = vmatprep.subr.bf16.mxu1 %v4025_v25 }
 0x397   :  { %1479 = vmatpush1.bf16.msra.mxu0 %v4028_v31  ;;  %1520 = vmatpush1.bf16.msra.mxu1 %v4031_v32 }
 0x398   :  { %1588 = vmatprep.subr.bf16.mxu0 %v4034_v38  ;;  %1629 = vmatprep.subr.bf16.mxu1 %v4037_v36 }
 0x39a   :  { %1497 = vmatmul.mubr.bf16.vlgmr.msra.gmra.mrb[24].mxu0 %v1375_v14  ;;  %1538 = vmatmul.mubr.bf16.vlgmr.msra.gmra.mrb[24].mxu1 %v1375_v14  ;;  %v4082_v14 = vld [vmem:[#allocation6 + $0x84] ss:$16 sps:$4 sm:$0xff]  }
 0x39b   :  { %1589 = vmatpush1.bf16.msra.mxu0 %v4040_v40  ;;  %1630 = vmatpush1.bf16.msra.mxu1 %v4043_v41  ;;  %5483 = vst [vmem:[#allocation72_spill] sm:$0xff] %v4082_v14 }
 0x39c   :  { %1590 = vmatprep.subr.bf16.mxu0 %v4046_v42  ;;  %1631 = vmatprep.subr.bf16.mxu1 %v4049_v43 }
 0x39f   :  { %1591 = vmatpush1.bf16.msra.mxu0 %v4052_v45  ;;  %1632 = vmatpush1.bf16.msra.mxu1 %v4055_v5 }
 0x3a0   :  { %1592 = vmatprep.subr.bf16.mxu0 %v4058_v10  ;;  %1633 = vmatprep.subr.bf16.mxu1 %v4061_v9 }
 0x3a3   :  { %1593 = vmatpush1.bf16.msra.mxu0 %v4064_v44  ;;  %1634 = vmatpush1.bf16.msra.mxu1 %v4067_v7  ;;  %v4085_v7 = vld [vmem:[#allocation6 + $0x8c] ss:$16 sps:$4 sm:$0xff]  }
 0x3a4   :  { %1594 = vmatprep.subr.bf16.mxu0 %v4070_v11  ;;  %1635 = vmatprep.subr.bf16.mxu1 %v4073_v12  ;;  %5484 = vst [vmem:[#allocation76_spill] sm:$0xff] %v4085_v7  ;;  %v4088_v11 = vld [vmem:[#allocation6 + $0x80] ss:$16 sps:$4 sm:$0xff]   ;;  %v4091_v12 = vld [vmem:[#allocation6 + $0x88] ss:$16 sps:$4 sm:$0xff]  }
 0x3a5   :  { %5485 = vst [vmem:[#allocation77_spill] sm:$0xff] %v4088_v11  ;;  %5486 = vst [vmem:[#allocation31_spill] sm:$0xff] %v4091_v12 }
 0x3a7   :  { %1595 = vmatpush1.bf16.msra.mxu0 %v4076_v8  ;;  %1636 = vmatpush1.bf16.msra.mxu1 %v4079_v13  ;;  %v4094_v8 = vld [vmem:[#allocation6 + $0xa4] ss:$16 sps:$4 sm:$0xff]   ;;  %v4097_v13 = vld [vmem:[#allocation6 + $0xac] ss:$16 sps:$4 sm:$0xff]  }
 0x3a8   :  { %1596 = vmatprep.subr.bf16.mxu0 %v4082_v14  ;;  %1637 = vmatprep.subr.bf16.mxu1 %v4085_v7  ;;  %5487 = vst [vmem:[#allocation32_spill] sm:$0xff] %v4094_v8  ;;  %5488 = vst [vmem:[#allocation33_spill] sm:$0xff] %v4097_v13  ;;  %v4100_v14 = vld [vmem:[#allocation6 + $0xa0] ss:$16 sps:$4 sm:$0xff]   ;;  %v4103_v7 = vld [vmem:[#allocation6 + $0xa8] ss:$16 sps:$4 sm:$0xff]  }
 0x3a9   :  { %5489 = vst [vmem:[#allocation34_spill] sm:$0xff] %v4100_v14  ;;  %5490 = vst [vmem:[#allocation35_spill] sm:$0xff] %v4103_v7 }
 0x3ab   :  { %1597 = vmatpush1.bf16.msra.mxu0 %v4088_v11  ;;  %1638 = vmatpush1.bf16.msra.mxu1 %v4091_v12  ;;  %v4106_v11 = vld [vmem:[#allocation6 + $0xc4] ss:$16 sps:$4 sm:$0xff]   ;;  %v4109_v12 = vld [vmem:[#allocation6 + $0xcc] ss:$16 sps:$4 sm:$0xff]  }
 0x3ac   :  { %1598 = vmatprep.subr.bf16.mxu0 %v4094_v8  ;;  %1639 = vmatprep.subr.bf16.mxu1 %v4097_v13  ;;  %5491 = vst [vmem:[#allocation36_spill] sm:$0xff] %v4106_v11  ;;  %5492 = vst [vmem:[#allocation37_spill] sm:$0xff] %v4109_v12  ;;  %v4112_v8 = vld [vmem:[#allocation6 + $0xc0] ss:$16 sps:$4 sm:$0xff]   ;;  %v4115_v13 = vld [vmem:[#allocation6 + $0xc8] ss:$16 sps:$4 sm:$0xff]  }
 0x3ad   :  { %5493 = vst [vmem:[#allocation38_spill] sm:$0xff] %v4112_v8  ;;  %5494 = vst [vmem:[#allocation39_spill] sm:$0xff] %v4115_v13 }
 0x3af   :  { %1599 = vmatpush1.bf16.msra.mxu0 %v4100_v14  ;;  %1640 = vmatpush1.bf16.msra.mxu1 %v4103_v7  ;;  %v4118_v14 = vld [vmem:[#allocation6 + $0xe4] ss:$16 sps:$4 sm:$0xff]   ;;  %v4121_v7 = vld [vmem:[#allocation6 + $0xec] ss:$16 sps:$4 sm:$0xff]  }
 0x3b0   :  { %1600 = vmatprep.subr.bf16.mxu0 %v4106_v11  ;;  %1641 = vmatprep.subr.bf16.mxu1 %v4109_v12  ;;  %5495 = vst [vmem:[#allocation40_spill] sm:$0xff] %v4118_v14  ;;  %5496 = vst [vmem:[#allocation41_spill] sm:$0xff] %v4121_v7  ;;  %v4124_v11 = vld [vmem:[#allocation6 + $0xe0] ss:$16 sps:$4 sm:$0xff]   ;;  %v4127_v12 = vld [vmem:[#allocation6 + $0xe8] ss:$16 sps:$4 sm:$0xff]  }
 0x3b1   :  { %5497 = vst [vmem:[#allocation42_spill] sm:$0xff] %v4124_v11  ;;  %5498 = vst [vmem:[#allocation43_spill] sm:$0xff] %v4127_v12 }
 0x3b3   :  { %1601 = vmatpush1.bf16.msra.mxu0 %v4112_v8  ;;  %1642 = vmatpush1.bf16.msra.mxu1 %v4115_v13  ;;  %v4130_v8 = vld [vmem:[#allocation6 + $0x104] ss:$16 sps:$4 sm:$0xff]   ;;  %v4133_v13 = vld [vmem:[#allocation6 + $0x10c] ss:$16 sps:$4 sm:$0xff]  }
 0x3b4   :  { %1602 = vmatprep.subr.bf16.mxu0 %v4118_v14  ;;  %1643 = vmatprep.subr.bf16.mxu1 %v4121_v7  ;;  %5499 = vst [vmem:[#allocation44_spill] sm:$0xff] %v4130_v8  ;;  %5500 = vst [vmem:[#allocation45_spill] sm:$0xff] %v4133_v13  ;;  %v4136_v14 = vld [vmem:[#allocation6 + $0x100] ss:$16 sps:$4 sm:$0xff]   ;;  %v4139_v7 = vld [vmem:[#allocation6 + $0x108] ss:$16 sps:$4 sm:$0xff]  }
 0x3b5   :  { %5501 = vst [vmem:[#allocation46_spill] sm:$0xff] %v4136_v14  ;;  %5502 = vst [vmem:[#allocation47_spill] sm:$0xff] %v4139_v7 }
 0x3b7   :  { %1603 = vmatpush1.bf16.msra.mxu0 %v4124_v11  ;;  %1644 = vmatpush1.bf16.msra.mxu1 %v4127_v12  ;;  %v4142_v11 = vld [vmem:[#allocation6 + $0x124] ss:$16 sps:$4 sm:$0xff]   ;;  %v4145_v12 = vld [vmem:[#allocation6 + $0x12c] ss:$16 sps:$4 sm:$0xff]  }
 0x3b8   :  { %1604 = vmatprep.subr.bf16.mxu0 %v4130_v8  ;;  %1645 = vmatprep.subr.bf16.mxu1 %v4133_v13  ;;  %5503 = vst [vmem:[#allocation48_spill] sm:$0xff] %v4142_v11  ;;  %5504 = vst [vmem:[#allocation49_spill] sm:$0xff] %v4145_v12  ;;  %v4148_v8 = vld [vmem:[#allocation6 + $0x120] ss:$16 sps:$4 sm:$0xff]   ;;  %v4151_v13 = vld [vmem:[#allocation6 + $0x128] ss:$16 sps:$4 sm:$0xff]  }
 0x3b9   :  { %5505 = vst [vmem:[#allocation50_spill] sm:$0xff] %v4148_v8  ;;  %5506 = vst [vmem:[#allocation51_spill] sm:$0xff] %v4151_v13 }
 0x3bb   :  { %1605 = vmatpush1.bf16.msra.mxu0 %v4136_v14  ;;  %1646 = vmatpush1.bf16.msra.mxu1 %v4139_v7  ;;  %v4154_v14 = vld [vmem:[#allocation6 + $0x144] ss:$16 sps:$4 sm:$0xff]   ;;  %v4157_v7 = vld [vmem:[#allocation6 + $0x14c] ss:$16 sps:$4 sm:$0xff]  }
 0x3bc   :  { %1606 = vmatprep.subr.bf16.mxu0 %v4142_v11  ;;  %1647 = vmatprep.subr.bf16.mxu1 %v4145_v12  ;;  %5507 = vst [vmem:[#allocation52_spill] sm:$0xff] %v4154_v14  ;;  %5508 = vst [vmem:[#allocation53_spill] sm:$0xff] %v4157_v7  ;;  %v4160_v11 = vld [vmem:[#allocation6 + $0x140] ss:$16 sps:$4 sm:$0xff]   ;;  %v4163_v12 = vld [vmem:[#allocation6 + $0x148] ss:$16 sps:$4 sm:$0xff]  }
 0x3bd   :  { %5509 = vst [vmem:[#allocation54_spill] sm:$0xff] %v4160_v11  ;;  %5510 = vst [vmem:[#allocation55_spill] sm:$0xff] %v4163_v12 }
 0x3bf   :  { %1607 = vmatpush1.bf16.msra.mxu0 %v4148_v8  ;;  %1648 = vmatpush1.bf16.msra.mxu1 %v4151_v13  ;;  %v4166_v8 = vld [vmem:[#allocation6 + $0x164] ss:$16 sps:$4 sm:$0xff]   ;;  %v4169_v13 = vld [vmem:[#allocation6 + $0x16c] ss:$16 sps:$4 sm:$0xff]  }
 0x3c0   :  { %1608 = vmatprep.subr.bf16.mxu0 %v4154_v14  ;;  %1649 = vmatprep.subr.bf16.mxu1 %v4157_v7  ;;  %5511 = vst [vmem:[#allocation56_spill] sm:$0xff] %v4166_v8  ;;  %5512 = vst [vmem:[#allocation57_spill] sm:$0xff] %v4169_v13  ;;  %v4172_v14 = vld [vmem:[#allocation6 + $0x160] ss:$16 sps:$4 sm:$0xff]   ;;  %v4175_v7 = vld [vmem:[#allocation6 + $0x168] ss:$16 sps:$4 sm:$0xff]  }
 0x3c1   :  { %5513 = vst [vmem:[#allocation58_spill] sm:$0xff] %v4172_v14  ;;  %5514 = vst [vmem:[#allocation59_spill] sm:$0xff] %v4175_v7 }
 0x3c3   :  { %1609 = vmatpush1.bf16.msra.mxu0 %v4160_v11  ;;  %1650 = vmatpush1.bf16.msra.mxu1 %v4163_v12  ;;  %v4178_v11 = vld [vmem:[#allocation6 + $0x184] ss:$16 sps:$4 sm:$0xff]   ;;  %v4181_v12 = vld [vmem:[#allocation6 + $0x18c] ss:$16 sps:$4 sm:$0xff]  }
 0x3c4   :  { %1610 = vmatprep.subr.bf16.mxu0 %v4166_v8  ;;  %1651 = vmatprep.subr.bf16.mxu1 %v4169_v13  ;;  %5515 = vst [vmem:[#allocation60_spill] sm:$0xff] %v4178_v11  ;;  %5516 = vst [vmem:[#allocation61_spill] sm:$0xff] %v4181_v12  ;;  %v4184_v8 = vld [vmem:[#allocation6 + $0x180] ss:$16 sps:$4 sm:$0xff]   ;;  %v4187_v13 = vld [vmem:[#allocation6 + $0x188] ss:$16 sps:$4 sm:$0xff]  }
 0x3c5   :  { %5517 = vst [vmem:[#allocation62_spill] sm:$0xff] %v4184_v8  ;;  %5518 = vst [vmem:[#allocation63_spill] sm:$0xff] %v4187_v13 }
 0x3c7   :  { %1611 = vmatpush1.bf16.msra.mxu0 %v4172_v14  ;;  %1652 = vmatpush1.bf16.msra.mxu1 %v4175_v7  ;;  %v4190_v14 = vld [vmem:[#allocation6 + $0x1a4] ss:$16 sps:$4 sm:$0xff]   ;;  %v4193_v7 = vld [vmem:[#allocation6 + $0x1ac] ss:$16 sps:$4 sm:$0xff]  }
 0x3c8   :  { %1612 = vmatprep.subr.bf16.mxu0 %v4178_v11  ;;  %1653 = vmatprep.subr.bf16.mxu1 %v4181_v12  ;;  %5519 = vst [vmem:[#allocation64_spill] sm:$0xff] %v4190_v14  ;;  %5520 = vst [vmem:[#allocation65_spill] sm:$0xff] %v4193_v7  ;;  %v4196_v11 = vld [vmem:[#allocation6 + $0x1a0] ss:$16 sps:$4 sm:$0xff]   ;;  %v4199_v12 = vld [vmem:[#allocation6 + $0x1a8] ss:$16 sps:$4 sm:$0xff]  }
 0x3c9   :  { %5521 = vst [vmem:[#allocation66_spill] sm:$0xff] %v4196_v11  ;;  %5522 = vst [vmem:[#allocation67_spill] sm:$0xff] %v4199_v12 }
 0x3cb   :  { %1613 = vmatpush1.bf16.msra.mxu0 %v4184_v8  ;;  %1654 = vmatpush1.bf16.msra.mxu1 %v4187_v13  ;;  %v4202_v8 = vld [vmem:[#allocation6 + $0x1c4] ss:$16 sps:$4 sm:$0xff]   ;;  %v4205_v13 = vld [vmem:[#allocation6 + $0x1cc] ss:$16 sps:$4 sm:$0xff]  }
 0x3cc   :  { %1614 = vmatprep.subr.bf16.mxu0 %v4190_v14  ;;  %1655 = vmatprep.subr.bf16.mxu1 %v4193_v7  ;;  %5523 = vst [vmem:[#allocation68_spill] sm:$0xff] %v4202_v8  ;;  %5524 = vst [vmem:[#allocation18_spill] sm:$0xff] %v4205_v13  ;;  %v4208_v14 = vld [vmem:[#allocation6 + $0x1c0] ss:$16 sps:$4 sm:$0xff]   ;;  %v4211_v7 = vld [vmem:[#allocation6 + $0x1c8] ss:$16 sps:$4 sm:$0xff]  }
 0x3cd   :  { %5525 = vst [vmem:[#allocation78_spill] sm:$0xff] %v4208_v14  ;;  %5526 = vst [vmem:[#allocation79_spill] sm:$0xff] %v4211_v7 }
 0x3cf   :  { %1615 = vmatpush1.bf16.msra.mxu0 %v4196_v11  ;;  %1656 = vmatpush1.bf16.msra.mxu1 %v4199_v12  ;;  %v4214_v11 = vld [vmem:[#allocation6 + $0x1e4] ss:$16 sps:$4 sm:$0xff]   ;;  %v4217_v12 = vld [vmem:[#allocation6 + $0x1ec] ss:$16 sps:$4 sm:$0xff]  }
 0x3d0   :  { %1616 = vmatprep.subr.bf16.mxu0 %v4202_v8  ;;  %1657 = vmatprep.subr.bf16.mxu1 %v4205_v13  ;;  %5527 = vst [vmem:[#allocation80_spill] sm:$0xff] %v4214_v11  ;;  %5528 = vst [vmem:[#allocation81_spill] sm:$0xff] %v4217_v12  ;;  %v4220_v8 = vld [vmem:[#allocation6 + $0x1e0] ss:$16 sps:$4 sm:$0xff]   ;;  %v4223_v13 = vld [vmem:[#allocation6 + $0x1e8] ss:$16 sps:$4 sm:$0xff]  }
 0x3d1   :  { %5529 = vst [vmem:[#allocation82_spill] sm:$0xff] %v4220_v8  ;;  %5530 = vst [vmem:[#allocation83_spill] sm:$0xff] %v4223_v13 }
 0x3d3   :  { %1617 = vmatpush1.bf16.msra.mxu0 %v4208_v14  ;;  %1658 = vmatpush1.bf16.msra.mxu1 %v4211_v7 }
 0x3d4   :  { %1618 = vmatprep.subr.bf16.mxu0 %v4214_v11  ;;  %1659 = vmatprep.subr.bf16.mxu1 %v4217_v12 }
 0x3d7   :  { %1619 = vmatpush1.bf16.msra.mxu0 %v4220_v8  ;;  %1660 = vmatpush1.bf16.msra.mxu1 %v4223_v13 }
 0x3d8   :  { %1675 = vmatprep.subr.bf16.mxu0 %v3960_v28  ;;  %1716 = vmatprep.subr.bf16.mxu1 %v3963_v30 }
 0x44d   :  { %v1411_v7 = vpop.f32.mrb[20].mxu0  ;;  %v1452_v14 = vpop.f32.mrb[20].mxu1 }
 0x44e   :  { %v1412_v11 = vadd.f32 %v1411_v7, %v5460_v33  ;;  %v1413_v44 = vpop.f32.mrb[21].mxu0  ;;  %v1454_v9 = vpop.f32.mrb[21].mxu1  ;;  %v1453_v13 = vadd.f32 %v1452_v14, %v5462_v4 }
 0x44f   :  { %v1414_v12 = vadd.f32 %v1413_v44, %v5461_v39  ;;  %v1415_v10 = vpop.f32.mrb[22].mxu0  ;;  %v1456_v5 = vpop.f32.mrb[22].mxu1  ;;  %v1455_v30 = vadd.f32 %v1454_v9, %v5463_v6 }
 0x450   :  { %v1550_v45 = vmul.f32 0.5, %v1412_v11  ;;  %v1416_v8 = vpop.f32.mrb[23].mxu0  ;;  %v1457_v43 = vpop.f32.mrb[23].mxu1 }
 0x451   :  { %v1554_v42 = vmul.f32 0.5, %v1414_v12  ;;  %v1559_v28 = vmul.f32 0.5, %v1455_v30 }
 0x452   :  { %2869 = vtanh.f32 %v1550_v45 }
 0x453   :  { %2871 = vtanh.f32 %v1554_v42  ;;  %v86_v42 = vpop.permute.xlu1 %85 }
 0x454   :  { %2873 = vtanh.f32 %v1453_v13  ;;  %v141_v9 = vmul.f32 %v5465_v57, %v86_v42  ;;  %v142_v30 = vmul.f32 %v5466_v26, %v86_v42 }
 0x455   :  { %2875 = vtanh.f32 %v1559_v28  ;;  %v143_v28 = vmul.f32 %v5468_v37, %v86_v42 }
 0x456   :  { %v196_v13 = vadd.f32 %v3656_v56, %v142_v30 }
 0x457   :  { %v197_v26 = vadd.f32 %v5418_v23, %v143_v28 }
 0x45c   :  { %v2870_v41 = vpop.eup %2869 }
 0x45d   :  { %v2872_v7 = vpop.eup %2871  ;;  %v1552_v33 = vmul.f32 0.5, %v2870_v41  ;;  %v195_v41 = vadd.f32 %v5467_v34, %v141_v9 }
 0x45e   :  { %v1556_v40 = vmul.f32 0.5, %v2872_v7  ;;  %v2874_v10 = vpop.eup %2873 }
 0x45f   :  { %v1553_v44 = vadd.f32 0.5, %v1552_v33  ;;  %v2876_v45 = vpop.eup %2875 }
 0x460   :  { %v1557_v5 = vadd.f32 0.5, %v1556_v40  ;;  %v1561_v8 = vmul.f32 0.5, %v2876_v45  ;;  %v144_v45 = vmul.f32 %v5419_v29, %v86_v42 }
 0x461   :  { %v1564_v11 = vmul.f32 %v2874_v10, %v1553_v44 }
 0x462   :  { %v1563_v43 = vmul.f32 %v1557_v5, %v3971_v19  ;;  %v1562_v44 = vadd.f32 0.5, %v1561_v8 }
 0x464   :  { %v4233_v12 = vadd.f32 %v1564_v11, %v1563_v43 }
 0x466   :  { %5531 = vst [vmem:[#allocation84_spill] sm:$0xff] %v4233_v12  ;;  %2877 = vtanh.f32 %v4233_v12 }
 0x46d   :  { %v1498_v33 = vpop.f32.mrb[24].mxu0  ;;  %v1539_v40 = vpop.f32.mrb[24].mxu1 }
 0x46e   :  { %v1546_v19 = vadd.f32 %v1498_v33, %v195_v41  ;;  %v1500_v14 = vpop.f32.mrb[25].mxu0  ;;  %v1541_v7 = vpop.f32.mrb[25].mxu1  ;;  %v1548_v6 = vadd.f32 %v1539_v40, %v197_v26  ;;  %v198_v41 = vadd.f32 %v3670_v1, %v144_v45  ;;  %v5557_v45 = vld [vmem:[#allocation39_spill] sm:$0xff] }
 0x46f   :  { %v1547_v10 = vadd.f32 %v1500_v14, %v196_v13  ;;  %v1502_v5 = vpop.f32.mrb[26].mxu0  ;;  %v1543_v11 = vpop.f32.mrb[26].mxu1 }
 0x470   :  { %v2878_v43 = vpop.eup %2877  ;;  %v1568_v57 = vmul.f32 0.5, %v1546_v19  ;;  %v1503_v9 = vpop.f32.mrb[27].mxu0  ;;  %v1549_v8 = vadd.f32 %v1541_v7, %v198_v41  ;;  %v5555_v11 = vld [vmem:[#allocation37_spill] sm:$0xff]  ;;  %v5560_v41 = vld [vmem:[#allocation42_spill] sm:$0xff] }
 0x471   :  { %v1544_v34 = vpop.f32.mrb[27].mxu1  ;;  %v1572_v37 = vmul.f32 0.5, %v1547_v10  ;;  %v1567_v12 = vmul.f32 %v2878_v43, %v1562_v44  ;;  %v5556_v43 = vld [vmem:[#allocation38_spill] sm:$0xff]  ;;  %v5558_v9 = vld [vmem:[#allocation40_spill] sm:$0xff] }
 0x472   :  { %2879 = vtanh.f32 %v1568_v57  ;;  %v1577_v33 = vmul.f32 0.5, %v1549_v8  ;;  %v5561_v8 = vld [vmem:[#allocation43_spill] sm:$0xff] }
 0x473   :  { %2881 = vtanh.f32 %v1572_v37  ;;  %v1587_v30 = vpack.c.bf16 %v1567_v12, %v1567_v12 }
 0x474   :  { %2883 = vtanh.f32 %v1548_v6 }
 0x475   :  { %1620 = vmatprep.mubr.bf16.mxu0 %v1587_v30  ;;  %1661 = vmatprep.mubr.bf16.mxu1 %v1587_v30  ;;  %2885 = vtanh.f32 %v1577_v33  ;;  %v5559_v30 = vld [vmem:[#allocation41_spill] sm:$0xff]  ;;  %v5562_v33 = vld [vmem:[#allocation44_spill] sm:$0xff] }
 0x47c   :  { %v2880_v13 = vpop.eup %2879 }
 0x47d   :  { %v2882_v19 = vpop.eup %2881  ;;  %v1570_v28 = vmul.f32 0.5, %v2880_v13  ;;  %v5563_v13 = vld [vmem:[#allocation45_spill] sm:$0xff] }
 0x47e   :  { %v1574_v14 = vmul.f32 0.5, %v2882_v19  ;;  %v2884_v34 = vpop.eup %2883  ;;  %v5564_v19 = vld [vmem:[#allocation46_spill] sm:$0xff] }
 0x47f   :  { %v1571_v42 = vadd.f32 0.5, %v1570_v28  ;;  %v2886_v37 = vpop.eup %2885  ;;  %v5565_v28 = vld [vmem:[#allocation47_spill] sm:$0xff] }
 0x480   :  { %v1575_v10 = vadd.f32 0.5, %v1574_v14  ;;  %v1579_v12 = vmul.f32 0.5, %v2886_v37  ;;  %v5566_v14 = vld [vmem:[#allocation48_spill] sm:$0xff]  ;;  %v5572_v37 = vld [vmem:[#allocation54_spill] sm:$0xff] }
 0x481   :  { %v1582_v44 = vmul.f32 %v2884_v34, %v1571_v42  ;;  %v5567_v42 = vld [vmem:[#allocation49_spill] sm:$0xff]  ;;  %v5568_v34 = vld [vmem:[#allocation50_spill] sm:$0xff] }
 0x482   :  { %v1581_v57 = vmul.f32 %v1575_v10, %v3983_v3  ;;  %v1580_v6 = vadd.f32 0.5, %v1579_v12  ;;  %v5554_v3 = vld [vmem:[#allocation36_spill] sm:$0xff]  ;;  %v5569_v10 = vld [vmem:[#allocation51_spill] sm:$0xff] }
 0x483   :  { %v5573_v12 = vld [vmem:[#allocation55_spill] sm:$0xff] }
 0x484   :  { %v4245_v26 = vadd.f32 %v1582_v44, %v1581_v57  ;;  %v5570_v44 = vld [vmem:[#allocation52_spill] sm:$0xff]  ;;  %v5571_v57 = vld [vmem:[#allocation53_spill] sm:$0xff] }
 0x486   :  { %2887 = vtanh.f32 %v4245_v26 }
 0x490   :  { %v2888_v40 = vpop.eup %2887 }
 0x491   :  { %v1585_v7 = vmul.f32 %v2888_v40, %v1580_v6  ;;  %v5574_v6 = vld [vmem:[#allocation56_spill] sm:$0xff]  ;;  %v5575_v40 = vld [vmem:[#allocation57_spill] sm:$0xff] }
 0x493   :  { %v1586_v5 = vpack.c.bf16 %v1585_v7, %v1585_v7  ;;  %v5576_v7 = vld [vmem:[#allocation58_spill] sm:$0xff] }
 0x495   :  { %1621 = vmatmul.mubr.bf16.vlgmr.msra.gmra.mrb[28].mxu0 %v1586_v5  ;;  %1662 = vmatmul.mubr.bf16.vlgmr.msra.gmra.mrb[28].mxu1 %v1586_v5 }
 0x496   :  { %1676 = vmatpush1.bf16.msra.mxu0 %v3820_v2  ;;  %1717 = vmatpush1.bf16.msra.mxu1 %v3823_v49  ;;  %v5532_v2 = vld [vmem:[#allocation21_spill] sm:$0xff]  ;;  %v5533_v49 = vld [vmem:[#allocation22_spill] sm:$0xff] }
 0x497   :  { %1677 = vmatprep.subr.bf16.mxu0 %v3826_v47  ;;  %1718 = vmatprep.subr.bf16.mxu1 %v3829_v52  ;;  %v5534_v47 = vld [vmem:[#allocation23_spill] sm:$0xff]  ;;  %v5535_v52 = vld [vmem:[#allocation24_spill] sm:$0xff] }
 0x498   :  { %1707 = vmatprep.mubr.bf16.mxu0 %v5348_v53  ;;  %1748 = vmatprep.mubr.bf16.mxu1 %v5348_v53 }
 0x49a   :  { %1678 = vmatpush1.bf16.msra.mxu0 %v3834_v51  ;;  %1719 = vmatpush1.bf16.msra.mxu1 %v3837_v35  ;;  %v5536_v51 = vld [vmem:[#allocation25_spill] sm:$0xff]  ;;  %v5537_v35 = vld [vmem:[#allocation26_spill] sm:$0xff] }
 0x49b   :  { %1679 = vmatprep.subr.bf16.mxu0 %v3840_v0  ;;  %1720 = vmatprep.subr.bf16.mxu1 %v3843_v59  ;;  %v5538_v0 = vld [vmem:[#allocation27_spill] sm:$0xff]  ;;  %v5539_v59 = vld [vmem:[#allocation28_spill] sm:$0xff] }
 0x49e   :  { %1680 = vmatpush1.bf16.msra.mxu0 %v3846_v48  ;;  %1721 = vmatpush1.bf16.msra.mxu1 %v3849_v60  ;;  %v5540_v48 = vld [vmem:[#allocation29_spill] sm:$0xff]  ;;  %v5541_v60 = vld [vmem:[#allocation30_spill] sm:$0xff] }
 0x49f   :  { %1681 = vmatprep.subr.bf16.mxu0 %v3852_v63  ;;  %1722 = vmatprep.subr.bf16.mxu1 %v3855_v50  ;;  %v5542_v63 = vld [vmem:[#allocation12_spill] sm:$0xff]  ;;  %v5543_v50 = vld [vmem:[#allocation13_spill] sm:$0xff] }
 0x4a2   :  { %1682 = vmatpush1.bf16.msra.mxu0 %v3858_v55  ;;  %1723 = vmatpush1.bf16.msra.mxu1 %v3861_v58  ;;  %v5544_v55 = vld [vmem:[#allocation69_spill] sm:$0xff]  ;;  %v5545_v58 = vld [vmem:[#allocation70_spill] sm:$0xff] }
 0x4a3   :  { %1683 = vmatprep.subr.bf16.mxu0 %v3864_v62  ;;  %1724 = vmatprep.subr.bf16.mxu1 %v3867_v54  ;;  %v5546_v62 = vld [vmem:[#allocation72_spill] sm:$0xff] }
 0x4a4   :  { %v5547_v54 = vld [vmem:[#allocation76_spill] sm:$0xff] }
 0x4a6   :  { %1684 = vmatpush1.bf16.msra.mxu0 %v3870_v24  ;;  %1725 = vmatpush1.bf16.msra.mxu1 %v3873_v61  ;;  %v5548_v24 = vld [vmem:[#allocation77_spill] sm:$0xff]  ;;  %v5549_v61 = vld [vmem:[#allocation31_spill] sm:$0xff] }
 0x4a7   :  { %1685 = vmatprep.subr.bf16.mxu0 %v3876_v21  ;;  %1726 = vmatprep.subr.bf16.mxu1 %v3879_v22  ;;  %v5550_v21 = vld [vmem:[#allocation32_spill] sm:$0xff]  ;;  %v5551_v22 = vld [vmem:[#allocation33_spill] sm:$0xff] }
 0x4aa   :  { %1686 = vmatpush1.bf16.msra.mxu0 %v3882_v20  ;;  %1727 = vmatpush1.bf16.msra.mxu1 %v3885_v27  ;;  %v5552_v20 = vld [vmem:[#allocation34_spill] sm:$0xff]  ;;  %v5553_v27 = vld [vmem:[#allocation35_spill] sm:$0xff] }
 0x4ab   :  { %1687 = vmatprep.subr.bf16.mxu0 %v4010_v46  ;;  %1728 = vmatprep.subr.bf16.mxu1 %v4013_v15 }
 0x4ae   :  { %1688 = vmatpush1.bf16.msra.mxu0 %v4016_v16  ;;  %1729 = vmatpush1.bf16.msra.mxu1 %v4019_v17 }
 0x4af   :  { %1689 = vmatprep.subr.bf16.mxu0 %v4022_v18  ;;  %1730 = vmatprep.subr.bf16.mxu1 %v4025_v25 }
 0x4b2   :  { %1690 = vmatpush1.bf16.msra.mxu0 %v4028_v31  ;;  %1731 = vmatpush1.bf16.msra.mxu1 %v4031_v32 }
 0x4b3   :  { %1799 = vmatprep.subr.bf16.mxu0 %v4034_v38  ;;  %1840 = vmatprep.subr.bf16.mxu1 %v4037_v36 }
 0x4b5   :  { %1708 = vmatmul.mubr.bf16.vlgmr.msra.gmra.mrb[32].mxu0 %v1586_v5  ;;  %1749 = vmatmul.mubr.bf16.vlgmr.msra.gmra.mrb[32].mxu1 %v1586_v5  ;;  %v5577_v5 = vld [vmem:[#allocation59_spill] sm:$0xff] }
 0x4b6   :  { %1800 = vmatpush1.bf16.msra.mxu0 %v5532_v2  ;;  %1841 = vmatpush1.bf16.msra.mxu1 %v5533_v49 }
 0x4b7   :  { %1801 = vmatprep.subr.bf16.mxu0 %v5534_v47  ;;  %1842 = vmatprep.subr.bf16.mxu1 %v5535_v52 }
 0x4ba   :  { %1802 = vmatpush1.bf16.msra.mxu0 %v5536_v51  ;;  %1843 = vmatpush1.bf16.msra.mxu1 %v5537_v35 }
 0x4bb   :  { %1803 = vmatprep.subr.bf16.mxu0 %v5538_v0  ;;  %1844 = vmatprep.subr.bf16.mxu1 %v5539_v59 }
 0x4be   :  { %1804 = vmatpush1.bf16.msra.mxu0 %v5540_v48  ;;  %1845 = vmatpush1.bf16.msra.mxu1 %v5541_v60 }
 0x4bf   :  { %1805 = vmatprep.subr.bf16.mxu0 %v5542_v63  ;;  %1846 = vmatprep.subr.bf16.mxu1 %v5543_v50 }
 0x4c2   :  { %1806 = vmatpush1.bf16.msra.mxu0 %v5544_v55  ;;  %1847 = vmatpush1.bf16.msra.mxu1 %v5545_v58 }
 0x4c3   :  { %1807 = vmatprep.subr.bf16.mxu0 %v5546_v62  ;;  %1848 = vmatprep.subr.bf16.mxu1 %v5547_v54 }
 0x4c6   :  { %1808 = vmatpush1.bf16.msra.mxu0 %v5548_v24  ;;  %1849 = vmatpush1.bf16.msra.mxu1 %v5549_v61 }
 0x4c7   :  { %1809 = vmatprep.subr.bf16.mxu0 %v5550_v21  ;;  %1850 = vmatprep.subr.bf16.mxu1 %v5551_v22 }
 0x4ca   :  { %1810 = vmatpush1.bf16.msra.mxu0 %v5552_v20  ;;  %1851 = vmatpush1.bf16.msra.mxu1 %v5553_v27 }
 0x4cb   :  { %1811 = vmatprep.subr.bf16.mxu0 %v5554_v3  ;;  %1852 = vmatprep.subr.bf16.mxu1 %v5555_v11 }
 0x4ce   :  { %1812 = vmatpush1.bf16.msra.mxu0 %v5556_v43  ;;  %1853 = vmatpush1.bf16.msra.mxu1 %v5557_v45 }
 0x4cf   :  { %1813 = vmatprep.subr.bf16.mxu0 %v5558_v9  ;;  %1854 = vmatprep.subr.bf16.mxu1 %v5559_v30 }
 0x4d2   :  { %1814 = vmatpush1.bf16.msra.mxu0 %v5560_v41  ;;  %1855 = vmatpush1.bf16.msra.mxu1 %v5561_v8 }
 0x4d3   :  { %1815 = vmatprep.subr.bf16.mxu0 %v5562_v33  ;;  %1856 = vmatprep.subr.bf16.mxu1 %v5563_v13 }
 0x4d6   :  { %1816 = vmatpush1.bf16.msra.mxu0 %v5564_v19  ;;  %1857 = vmatpush1.bf16.msra.mxu1 %v5565_v28 }
 0x4d7   :  { %1817 = vmatprep.subr.bf16.mxu0 %v5566_v14  ;;  %1858 = vmatprep.subr.bf16.mxu1 %v5567_v42  ;;  %v5578_v42 = vld [vmem:[#allocation60_spill] sm:$0xff]  ;;  %v5596_v14 = vld [vmem:[#allocation14_spill] sm:$0xff] }
 0x4da   :  { %1818 = vmatpush1.bf16.msra.mxu0 %v5568_v34  ;;  %1859 = vmatpush1.bf16.msra.mxu1 %v5569_v10  ;;  %v5579_v34 = vld [vmem:[#allocation61_spill] sm:$0xff]  ;;  %v5580_v10 = vld [vmem:[#allocation62_spill] sm:$0xff] }
 0x4db   :  { %1819 = vmatprep.subr.bf16.mxu0 %v5570_v44  ;;  %1860 = vmatprep.subr.bf16.mxu1 %v5571_v57  ;;  %v5581_v44 = vld [vmem:[#allocation63_spill] sm:$0xff]  ;;  %v5582_v57 = vld [vmem:[#allocation64_spill] sm:$0xff] }
 0x4de   :  { %1820 = vmatpush1.bf16.msra.mxu0 %v5572_v37  ;;  %1861 = vmatpush1.bf16.msra.mxu1 %v5573_v12  ;;  %v5583_v37 = vld [vmem:[#allocation65_spill] sm:$0xff]  ;;  %v5584_v12 = vld [vmem:[#allocation66_spill] sm:$0xff] }
 0x4df   :  { %1821 = vmatprep.subr.bf16.mxu0 %v5574_v6  ;;  %1862 = vmatprep.subr.bf16.mxu1 %v5575_v40  ;;  %v5585_v6 = vld [vmem:[#allocation67_spill] sm:$0xff]  ;;  %v5586_v40 = vld [vmem:[#allocation68_spill] sm:$0xff] }
 0x4e2   :  { %1822 = vmatpush1.bf16.msra.mxu0 %v5576_v7  ;;  %1863 = vmatpush1.bf16.msra.mxu1 %v5577_v5  ;;  %v5587_v7 = vld [vmem:[#allocation18_spill] sm:$0xff] }
 0x4e3   :  { %1823 = vmatprep.subr.bf16.mxu0 %v5578_v42  ;;  %1864 = vmatprep.subr.bf16.mxu1 %v5579_v34  ;;  %v5588_v5 = vld [vmem:[#allocation78_spill] sm:$0xff]  ;;  %v5589_v42 = vld [vmem:[#allocation79_spill] sm:$0xff]  ;;  %v5590_v34 = vld [vmem:[#allocation80_spill] sm:$0xff] }
 0x4e6   :  { %1824 = vmatpush1.bf16.msra.mxu0 %v5580_v10  ;;  %1865 = vmatpush1.bf16.msra.mxu1 %v5581_v44  ;;  %v5591_v10 = vld [vmem:[#allocation81_spill] sm:$0xff]  ;;  %v5592_v44 = vld [vmem:[#allocation82_spill] sm:$0xff] }
 0x4e7   :  { %1825 = vmatprep.subr.bf16.mxu0 %v5582_v57  ;;  %1866 = vmatprep.subr.bf16.mxu1 %v5583_v37  ;;  %v5593_v57 = vld [vmem:[#allocation83_spill] sm:$0xff] }
 0x4e8   :  { %v5594_v37 = vld [vmem:[#allocation19_spill] sm:$0xff] }
 0x4ea   :  { %1826 = vmatpush1.bf16.msra.mxu0 %v5584_v12  ;;  %1867 = vmatpush1.bf16.msra.mxu1 %v5585_v6  ;;  %v5595_v12 = vld [vmem:[#allocation20_spill] sm:$0xff] }
 0x4eb   :  { %1827 = vmatprep.subr.bf16.mxu0 %v5586_v40  ;;  %1868 = vmatprep.subr.bf16.mxu1 %v5587_v7 }
 0x4ee   :  { %1828 = vmatpush1.bf16.msra.mxu0 %v5588_v5  ;;  %1869 = vmatpush1.bf16.msra.mxu1 %v5589_v42 }
 0x4ef   :  { %1829 = vmatprep.subr.bf16.mxu0 %v5590_v34  ;;  %1870 = vmatprep.subr.bf16.mxu1 %v5591_v10 }
 0x4f2   :  { %1830 = vmatpush1.bf16.msra.mxu0 %v5592_v44  ;;  %1871 = vmatpush1.bf16.msra.mxu1 %v5593_v57 }
 0x4f3   :  { %1886 = vmatprep.subr.bf16.mxu0 %v5594_v37  ;;  %1927 = vmatprep.subr.bf16.mxu1 %v5595_v12  ;;  %v5597_v37 = vld [vmem:[#allocation17_spill] sm:$0xff] }
 0x568   :  { %v1622_v6 = vpop.f32.mrb[28].mxu0  ;;  %v1663_v40 = vpop.f32.mrb[28].mxu1 }
 0x569   :  { %v1623_v7 = vadd.f32 %v1622_v6, %v5596_v14  ;;  %v1624_v28 = vpop.f32.mrb[29].mxu0  ;;  %v1665_v5 = vpop.f32.mrb[29].mxu1  ;;  %v1664_v57 = vadd.f32 %v1663_v40, %v5462_v4 }
 0x56a   :  { %v1625_v42 = vadd.f32 %v1624_v28, %v5461_v39  ;;  %v1626_v19 = vpop.f32.mrb[30].mxu0  ;;  %v1667_v34 = vpop.f32.mrb[30].mxu1  ;;  %v1666_v12 = vadd.f32 %v1665_v5, %v5597_v37  ;;  %v5601_v5 = vld [vmem:[#allocation73_spill] sm:$0xff] }
 0x56b   :  { %v1761_v13 = vmul.f32 0.5, %v1623_v7  ;;  %v1627_v10 = vpop.f32.mrb[31].mxu0  ;;  %v1668_v33 = vpop.f32.mrb[31].mxu1 }
 0x56c   :  { %v1765_v44 = vmul.f32 0.5, %v1625_v42  ;;  %v1770_v8 = vmul.f32 0.5, %v1666_v12  ;;  %v5598_v10 = vld [vmem:[#allocation84_spill] sm:$0xff] }
 0x56d   :  { %2889 = vtanh.f32 %v1761_v13  ;;  %v91_v13 = vpop.permute.xlu0 %90 }
 0x56e   :  { %2891 = vtanh.f32 %v1765_v44  ;;  %v146_v12 = vmul.f32 %v5601_v5, %v91_v13 }
 0x56f   :  { %2893 = vtanh.f32 %v1664_v57  ;;  %v5600_v57 = vld [vmem:[#allocation71_spill] sm:$0xff] }
 0x570   :  { %2895 = vtanh.f32 %v1770_v8  ;;  %v145_v40 = vmul.f32 %v5600_v57, %v91_v13  ;;  %v5603_v8 = vld [vmem:[#allocation75_spill] sm:$0xff] }
 0x577   :  { %v2890_v41 = vpop.eup %2889 }
 0x578   :  { %v2892_v6 = vpop.eup %2891  ;;  %v1763_v14 = vmul.f32 0.5, %v2890_v41  ;;  %v5602_v41 = vld [vmem:[#allocation74_spill] sm:$0xff] }
 0x579   :  { %v1767_v30 = vmul.f32 0.5, %v2892_v6  ;;  %v2894_v19 = vpop.eup %2893  ;;  %v199_v6 = vadd.f32 %v5602_v41, %v145_v40 }
 0x57a   :  { %v1764_v28 = vadd.f32 0.5, %v1763_v14  ;;  %v2896_v44 = vpop.eup %2895  ;;  %v147_v14 = vmul.f32 %v5603_v8, %v91_v13 }
 0x57b   :  { %v1768_v34 = vadd.f32 0.5, %v1767_v30  ;;  %v1772_v37 = vmul.f32 0.5, %v2896_v44  ;;  %v148_v44 = vmul.f32 %v5419_v29, %v91_v13 }
 0x57c   :  { %v1775_v7 = vmul.f32 %v2894_v19, %v1764_v28  ;;  %v200_v28 = vadd.f32 %v3656_v56, %v146_v12  ;;  %v201_v5 = vadd.f32 %v5418_v23, %v147_v14 }
 0x57d   :  { %v1774_v33 = vmul.f32 %v1768_v34, %v5598_v10  ;;  %v1773_v10 = vadd.f32 0.5, %v1772_v37  ;;  %v202_v12 = vadd.f32 %v3670_v1, %v148_v44  ;;  %v4375_v44 = vld [vmem:[#allocation3 + $0x2c] ss:$16 sps:$4 sm:$0xff]  }
 0x57f   :  { %v4351_v42 = vadd.f32 %v1775_v7, %v1774_v33 }
 0x581   :  { %5599 = vst [vmem:[#allocation21_spill] sm:$0xff] %v4351_v42  ;;  %2897 = vtanh.f32 %v4351_v42 }
 0x588   :  { %v1709_v4 = vpop.f32.mrb[32].mxu0  ;;  %v1750_v30 = vpop.f32.mrb[32].mxu1 }
 0x589   :  { %v1757_v19 = vadd.f32 %v1709_v4, %v199_v6  ;;  %v1711_v34 = vpop.f32.mrb[33].mxu0  ;;  %v1752_v7 = vpop.f32.mrb[33].mxu1  ;;  %v1759_v43 = vadd.f32 %v1750_v30, %v201_v5 }
 0x58a   :  { %v1758_v33 = vadd.f32 %v1711_v34, %v200_v28  ;;  %v1713_v42 = vpop.f32.mrb[34].mxu0  ;;  %v1754_v39 = vpop.f32.mrb[34].mxu1 }
 0x58b   :  { %v2898_v9 = vpop.eup %2897  ;;  %v1779_v57 = vmul.f32 0.5, %v1757_v19  ;;  %v1714_v40 = vpop.f32.mrb[35].mxu0  ;;  %v1760_v39 = vadd.f32 %v1752_v7, %v202_v12  ;;  %v4386_v12 = vld [vmem:[#allocation3 + $0x44] ss:$16 sps:$4 sm:$0xff]  }
 0x58c   :  { %v1755_v41 = vpop.f32.mrb[35].mxu1  ;;  %v1783_v8 = vmul.f32 0.5, %v1758_v33  ;;  %v1778_v45 = vmul.f32 %v2898_v9, %v1773_v10  ;;  %v4366_v10 = vld [vmem:[#allocation3] ss:$16 sps:$4 sm:$0xff]   ;;  %v4369_v33 = vld [vmem:[#allocation3 + $0x8] ss:$16 sps:$4 sm:$0xff]  }
 0x58d   :  { %2899 = vtanh.f32 %v1779_v57  ;;  %v1788_v37 = vmul.f32 0.5, %v1760_v39  ;;  %v4380_v40 = vld [vmem:[#allocation3 + $0x20] ss:$16 sps:$4 sm:$0xff]   ;;  %v4389_v39 = vld [vmem:[#allocation3 + $0x4c] ss:$16 sps:$4 sm:$0xff]  }
 0x58e   :  { %2901 = vtanh.f32 %v1783_v8  ;;  %v1798_v4 = vpack.c.bf16 %v1778_v45, %v1778_v45 }
 0x58f   :  { %2903 = vtanh.f32 %v1759_v43 }
 0x590   :  { %1831 = vmatprep.mubr.bf16.mxu0 %v1798_v4  ;;  %1872 = vmatprep.mubr.bf16.mxu1 %v1798_v4  ;;  %2905 = vtanh.f32 %v1788_v37  ;;  %v4383_v4 = vld [vmem:[#allocation3 + $0x28] ss:$16 sps:$4 sm:$0xff]   ;;  %v4392_v37 = vld [vmem:[#allocation3 + $0x40] ss:$16 sps:$4 sm:$0xff]  }
 0x597   :  { %v2900_v42 = vpop.eup %2899 }
 0x598   :  { %v2902_v6 = vpop.eup %2901  ;;  %v1781_v14 = vmul.f32 0.5, %v2900_v42  ;;  %v4395_v42 = vld [vmem:[#allocation3 + $0x48] ss:$16 sps:$4 sm:$0xff]  }
 0x599   :  { %v1785_v28 = vmul.f32 0.5, %v2902_v6  ;;  %v2904_v41 = vpop.eup %2903  ;;  %v4398_v6 = vld [vmem:[#allocation3 + $0x64] ss:$16 sps:$4 sm:$0xff]  }
 0x59a   :  { %v1782_v13 = vadd.f32 0.5, %v1781_v14  ;;  %v2906_v45 = vpop.eup %2905  ;;  %v4401_v14 = vld [vmem:[#allocation3 + $0x6c] ss:$16 sps:$4 sm:$0xff]  }
 0x59b   :  { %v1786_v19 = vadd.f32 0.5, %v1785_v28  ;;  %v1790_v8 = vmul.f32 0.5, %v2906_v45  ;;  %v4404_v28 = vld [vmem:[#allocation3 + $0x60] ss:$16 sps:$4 sm:$0xff]   ;;  %v4422_v45 = vld [vmem:[#allocation3 + $0xa4] ss:$16 sps:$4 sm:$0xff]  }
 0x59c   :  { %v1793_v9 = vmul.f32 %v2904_v41, %v1782_v13  ;;  %v4407_v13 = vld [vmem:[#allocation3 + $0x68] ss:$16 sps:$4 sm:$0xff]   ;;  %v4410_v41 = vld [vmem:[#allocation3 + $0x84] ss:$16 sps:$4 sm:$0xff]  }
 0x59d   :  { %v1792_v57 = vmul.f32 %v1786_v19, %v4245_v26  ;;  %v1791_v43 = vadd.f32 0.5, %v1790_v8  ;;  %v4372_v26 = vld [vmem:[#allocation3 + $0x24] ss:$16 sps:$4 sm:$0xff]   ;;  %v4413_v19 = vld [vmem:[#allocation3 + $0x8c] ss:$16 sps:$4 sm:$0xff]  }
 0x59e   :  { %v4425_v8 = vld [vmem:[#allocation3 + $0xac] ss:$16 sps:$4 sm:$0xff]  }
 0x59f   :  { %v4363_v5 = vadd.f32 %v1793_v9, %v1792_v57  ;;  %v4416_v9 = vld [vmem:[#allocation3 + $0x80] ss:$16 sps:$4 sm:$0xff]   ;;  %v4419_v57 = vld [vmem:[#allocation3 + $0x88] ss:$16 sps:$4 sm:$0xff]  }
 0x5a1   :  { %2907 = vtanh.f32 %v4363_v5 }
 0x5ab   :  { %v2908_v30 = vpop.eup %2907 }
 0x5ac   :  { %v1796_v34 = vmul.f32 %v2908_v30, %v1791_v43  ;;  %v4428_v43 = vld [vmem:[#allocation3 + $0xa0] ss:$16 sps:$4 sm:$0xff]   ;;  %v4431_v30 = vld [vmem:[#allocation3 + $0xa8] ss:$16 sps:$4 sm:$0xff]  }
 0x5ae   :  { %v1797_v7 = vpack.c.bf16 %v1796_v34, %v1796_v34  ;;  %v5638_v34 = vld [vmem:[#allocation80_spill] sm:$0xff] }
 0x5b0   :  { %1832 = vmatmul.mubr.bf16.vlgmr.msra.gmra.mrb[36].mxu0 %v1797_v7  ;;  %1873 = vmatmul.mubr.bf16.vlgmr.msra.gmra.mrb[36].mxu1 %v1797_v7 }
 0x5b1   :  { %1887 = vmatpush1.bf16.msra.mxu0 %v4366_v10  ;;  %1928 = vmatpush1.bf16.msra.mxu1 %v4369_v33 }
 0x5b2   :  { %1888 = vmatprep.subr.bf16.mxu0 %v4372_v26  ;;  %1929 = vmatprep.subr.bf16.mxu1 %v4375_v44 }
 0x5b3   :  { %1918 = vmatprep.mubr.bf16.mxu0 %v5348_v53  ;;  %1959 = vmatprep.mubr.bf16.mxu1 %v5348_v53 }
 0x5b5   :  { %1889 = vmatpush1.bf16.msra.mxu0 %v4380_v40  ;;  %1930 = vmatpush1.bf16.msra.mxu1 %v4383_v4 }
 0x5b6   :  { %1890 = vmatprep.subr.bf16.mxu0 %v4386_v12  ;;  %1931 = vmatprep.subr.bf16.mxu1 %v4389_v39 }
 0x5b9   :  { %1891 = vmatpush1.bf16.msra.mxu0 %v4392_v37  ;;  %1932 = vmatpush1.bf16.msra.mxu1 %v4395_v42 }
 0x5ba   :  { %1892 = vmatprep.subr.bf16.mxu0 %v4398_v6  ;;  %1933 = vmatprep.subr.bf16.mxu1 %v4401_v14 }
 0x5bd   :  { %1893 = vmatpush1.bf16.msra.mxu0 %v4404_v28  ;;  %1934 = vmatpush1.bf16.msra.mxu1 %v4407_v13 }
 0x5be   :  { %1894 = vmatprep.subr.bf16.mxu0 %v4410_v41  ;;  %1935 = vmatprep.subr.bf16.mxu1 %v4413_v19 }
 0x5c1   :  { %1895 = vmatpush1.bf16.msra.mxu0 %v4416_v9  ;;  %1936 = vmatpush1.bf16.msra.mxu1 %v4419_v57 }
 0x5c2   :  { %1896 = vmatprep.subr.bf16.mxu0 %v4422_v45  ;;  %1937 = vmatprep.subr.bf16.mxu1 %v4425_v8 }
 0x5c5   :  { %1897 = vmatpush1.bf16.msra.mxu0 %v4428_v43  ;;  %1938 = vmatpush1.bf16.msra.mxu1 %v4431_v30 }
 0x5c6   :  { %1898 = vmatprep.subr.bf16.mxu0 %v4010_v46  ;;  %1939 = vmatprep.subr.bf16.mxu1 %v4013_v15  ;;  %v5604_v46 = vld [vmem:[#allocation38_spill] sm:$0xff]  ;;  %v5605_v15 = vld [vmem:[#allocation39_spill] sm:$0xff] }
 0x5c9   :  { %1899 = vmatpush1.bf16.msra.mxu0 %v4016_v16  ;;  %1940 = vmatpush1.bf16.msra.mxu1 %v4019_v17  ;;  %v5606_v16 = vld [vmem:[#allocation40_spill] sm:$0xff]  ;;  %v5607_v17 = vld [vmem:[#allocation41_spill] sm:$0xff] }
 0x5ca   :  { %1900 = vmatprep.subr.bf16.mxu0 %v4022_v18  ;;  %1941 = vmatprep.subr.bf16.mxu1 %v4025_v25  ;;  %v5608_v18 = vld [vmem:[#allocation42_spill] sm:$0xff]  ;;  %v5609_v25 = vld [vmem:[#allocation43_spill] sm:$0xff] }
 0x5cd   :  { %1901 = vmatpush1.bf16.msra.mxu0 %v4028_v31  ;;  %1942 = vmatpush1.bf16.msra.mxu1 %v4031_v32  ;;  %v5610_v31 = vld [vmem:[#allocation44_spill] sm:$0xff]  ;;  %v5611_v32 = vld [vmem:[#allocation45_spill] sm:$0xff] }
 0x5ce   :  { %2010 = vmatprep.subr.bf16.mxu0 %v4034_v38  ;;  %2051 = vmatprep.subr.bf16.mxu1 %v4037_v36  ;;  %v5612_v38 = vld [vmem:[#allocation46_spill] sm:$0xff]  ;;  %v5613_v36 = vld [vmem:[#allocation47_spill] sm:$0xff] }
 0x5d0   :  { %1919 = vmatmul.mubr.bf16.vlgmr.msra.gmra.mrb[40].mxu0 %v1797_v7  ;;  %1960 = vmatmul.mubr.bf16.vlgmr.msra.gmra.mrb[40].mxu1 %v1797_v7  ;;  %v5639_v7 = vld [vmem:[#allocation81_spill] sm:$0xff] }
 0x5d1   :  { %2011 = vmatpush1.bf16.msra.mxu0 %v5532_v2  ;;  %2052 = vmatpush1.bf16.msra.mxu1 %v5533_v49  ;;  %v5614_v2 = vld [vmem:[#allocation48_spill] sm:$0xff]  ;;  %v5615_v49 = vld [vmem:[#allocation49_spill] sm:$0xff] }
 0x5d2   :  { %2012 = vmatprep.subr.bf16.mxu0 %v5534_v47  ;;  %2053 = vmatprep.subr.bf16.mxu1 %v5535_v52  ;;  %v5616_v47 = vld [vmem:[#allocation50_spill] sm:$0xff]  ;;  %v5617_v52 = vld [vmem:[#allocation51_spill] sm:$0xff] }
 0x5d5   :  { %2013 = vmatpush1.bf16.msra.mxu0 %v5536_v51  ;;  %2054 = vmatpush1.bf16.msra.mxu1 %v5537_v35  ;;  %v5618_v51 = vld [vmem:[#allocation52_spill] sm:$0xff]  ;;  %v5619_v35 = vld [vmem:[#allocation53_spill] sm:$0xff] }
 0x5d6   :  { %2014 = vmatprep.subr.bf16.mxu0 %v5538_v0  ;;  %2055 = vmatprep.subr.bf16.mxu1 %v5539_v59  ;;  %v5620_v0 = vld [vmem:[#allocation54_spill] sm:$0xff]  ;;  %v5621_v59 = vld [vmem:[#allocation55_spill] sm:$0xff] }
 0x5d9   :  { %2015 = vmatpush1.bf16.msra.mxu0 %v5540_v48  ;;  %2056 = vmatpush1.bf16.msra.mxu1 %v5541_v60  ;;  %v5622_v48 = vld [vmem:[#allocation56_spill] sm:$0xff]  ;;  %v5623_v60 = vld [vmem:[#allocation57_spill] sm:$0xff] }
 0x5da   :  { %2016 = vmatprep.subr.bf16.mxu0 %v5542_v63  ;;  %2057 = vmatprep.subr.bf16.mxu1 %v5543_v50  ;;  %v5624_v63 = vld [vmem:[#allocation58_spill] sm:$0xff]  ;;  %v5625_v50 = vld [vmem:[#allocation59_spill] sm:$0xff] }
 0x5dd   :  { %2017 = vmatpush1.bf16.msra.mxu0 %v5544_v55  ;;  %2058 = vmatpush1.bf16.msra.mxu1 %v5545_v58  ;;  %v5626_v55 = vld [vmem:[#allocation60_spill] sm:$0xff]  ;;  %v5627_v58 = vld [vmem:[#allocation61_spill] sm:$0xff] }
 0x5de   :  { %2018 = vmatprep.subr.bf16.mxu0 %v5546_v62  ;;  %2059 = vmatprep.subr.bf16.mxu1 %v5547_v54  ;;  %v5628_v62 = vld [vmem:[#allocation62_spill] sm:$0xff]  ;;  %v5629_v54 = vld [vmem:[#allocation63_spill] sm:$0xff] }
 0x5e1   :  { %2019 = vmatpush1.bf16.msra.mxu0 %v5548_v24  ;;  %2060 = vmatpush1.bf16.msra.mxu1 %v5549_v61  ;;  %v5630_v24 = vld [vmem:[#allocation64_spill] sm:$0xff]  ;;  %v5631_v61 = vld [vmem:[#allocation65_spill] sm:$0xff] }
 0x5e2   :  { %2020 = vmatprep.subr.bf16.mxu0 %v5550_v21  ;;  %2061 = vmatprep.subr.bf16.mxu1 %v5551_v22  ;;  %v5632_v21 = vld [vmem:[#allocation66_spill] sm:$0xff]  ;;  %v5633_v22 = vld [vmem:[#allocation67_spill] sm:$0xff] }
 0x5e5   :  { %2021 = vmatpush1.bf16.msra.mxu0 %v5552_v20  ;;  %2062 = vmatpush1.bf16.msra.mxu1 %v5553_v27  ;;  %v5634_v20 = vld [vmem:[#allocation68_spill] sm:$0xff]  ;;  %v5635_v27 = vld [vmem:[#allocation18_spill] sm:$0xff] }
 0x5e6   :  { %2022 = vmatprep.subr.bf16.mxu0 %v5554_v3  ;;  %2063 = vmatprep.subr.bf16.mxu1 %v5555_v11  ;;  %v5636_v3 = vld [vmem:[#allocation78_spill] sm:$0xff]  ;;  %v5637_v11 = vld [vmem:[#allocation79_spill] sm:$0xff] }
 0x5e9   :  { %2023 = vmatpush1.bf16.msra.mxu0 %v5604_v46  ;;  %2064 = vmatpush1.bf16.msra.mxu1 %v5605_v15  ;;  %v5640_v46 = vld [vmem:[#allocation82_spill] sm:$0xff]  ;;  %v5641_v15 = vld [vmem:[#allocation83_spill] sm:$0xff] }
 0x5ea   :  { %2024 = vmatprep.subr.bf16.mxu0 %v5606_v16  ;;  %2065 = vmatprep.subr.bf16.mxu1 %v5607_v17  ;;  %v4506_v16 = vld [vmem:[#allocation3 + $0x4] ss:$16 sps:$4 sm:$0xff]   ;;  %v4509_v17 = vld [vmem:[#allocation3 + $0xc] ss:$16 sps:$4 sm:$0xff]  }
 0x5ed   :  { %2025 = vmatpush1.bf16.msra.mxu0 %v5608_v18  ;;  %2066 = vmatpush1.bf16.msra.mxu1 %v5609_v25 }
 0x5ee   :  { %2026 = vmatprep.subr.bf16.mxu0 %v5610_v31  ;;  %2067 = vmatprep.subr.bf16.mxu1 %v5611_v32  ;;  %v5642_v31 = vld [vmem:[#allocation14_spill] sm:$0xff] }
 0x5f1   :  { %2027 = vmatpush1.bf16.msra.mxu0 %v5612_v38  ;;  %2068 = vmatpush1.bf16.msra.mxu1 %v5613_v36 }
 0x5f2   :  { %2028 = vmatprep.subr.bf16.mxu0 %v5614_v2  ;;  %2069 = vmatprep.subr.bf16.mxu1 %v5615_v49  ;;  %v5643_v2 = vld [vmem:[#allocation15_spill] sm:$0xff] }
 0x5f5   :  { %2029 = vmatpush1.bf16.msra.mxu0 %v5616_v47  ;;  %2070 = vmatpush1.bf16.msra.mxu1 %v5617_v52 }
 0x5f6   :  { %2030 = vmatprep.subr.bf16.mxu0 %v5618_v51  ;;  %2071 = vmatprep.subr.bf16.mxu1 %v5619_v35 }
 0x5f9   :  { %2031 = vmatpush1.bf16.msra.mxu0 %v5620_v0  ;;  %2072 = vmatpush1.bf16.msra.mxu1 %v5621_v59 }
 0x5fa   :  { %2032 = vmatprep.subr.bf16.mxu0 %v5622_v48  ;;  %2073 = vmatprep.subr.bf16.mxu1 %v5623_v60  ;;  %v5644_v48 = vld [vmem:[#allocation16_spill] sm:$0xff] }
 0x5fd   :  { %2033 = vmatpush1.bf16.msra.mxu0 %v5624_v63  ;;  %2074 = vmatpush1.bf16.msra.mxu1 %v5625_v50  ;;  %v5645_v63 = vld [vmem:[#allocation17_spill] sm:$0xff] }
 0x5fe   :  { %2034 = vmatprep.subr.bf16.mxu0 %v5626_v55  ;;  %2075 = vmatprep.subr.bf16.mxu1 %v5627_v58 }
 0x601   :  { %2035 = vmatpush1.bf16.msra.mxu0 %v5628_v62  ;;  %2076 = vmatpush1.bf16.msra.mxu1 %v5629_v54 }
 0x602   :  { %2036 = vmatprep.subr.bf16.mxu0 %v5630_v24  ;;  %2077 = vmatprep.subr.bf16.mxu1 %v5631_v61 }
 0x605   :  { %2037 = vmatpush1.bf16.msra.mxu0 %v5632_v21  ;;  %2078 = vmatpush1.bf16.msra.mxu1 %v5633_v22 }
 0x606   :  { %2038 = vmatprep.subr.bf16.mxu0 %v5634_v20  ;;  %2079 = vmatprep.subr.bf16.mxu1 %v5635_v27  ;;  %v5646_v27 = vld [vmem:[#allocation21_spill] sm:$0xff] }
 0x609   :  { %2039 = vmatpush1.bf16.msra.mxu0 %v5636_v3  ;;  %2080 = vmatpush1.bf16.msra.mxu1 %v5637_v11 }
 0x60a   :  { %2040 = vmatprep.subr.bf16.mxu0 %v5638_v34  ;;  %2081 = vmatprep.subr.bf16.mxu1 %v5639_v7  ;;  %v96_v34 = vpop.permute.xlu1 %95 }
 0x60d   :  { %2041 = vmatpush1.bf16.msra.mxu0 %v5640_v46  ;;  %2082 = vmatpush1.bf16.msra.mxu1 %v5641_v15  ;;  %v5647_v46 = vld [vmem:[#allocation71_spill] sm:$0xff] }
 0x60e   :  { %2097 = vmatprep.subr.bf16.mxu0 %v4506_v16  ;;  %2138 = vmatprep.subr.bf16.mxu1 %v4509_v17  ;;  %v149_v15 = vmul.f32 %v5647_v46, %v96_v34 }
 0x683   :  { %v1833_v18 = vpop.f32.mrb[36].mxu0  ;;  %v1874_v25 = vpop.f32.mrb[36].mxu1 }
 0x684   :  { %v1834_v32 = vadd.f32 %v1833_v18, %v5642_v31  ;;  %v1835_v38 = vpop.f32.mrb[37].mxu0  ;;  %v1876_v36 = vpop.f32.mrb[37].mxu1  ;;  %v1875_v60 = vadd.f32 %v1874_v25, %v5644_v48  ;;  %v5648_v18 = vld [vmem:[#allocation73_spill] sm:$0xff] }
 0x685   :  { %v1836_v49 = vadd.f32 %v1835_v38, %v5643_v2  ;;  %v1837_v47 = vpop.f32.mrb[38].mxu0  ;;  %v1878_v52 = vpop.f32.mrb[38].mxu1  ;;  %v1877_v50 = vadd.f32 %v1876_v36, %v5645_v63  ;;  %v150_v25 = vmul.f32 %v5648_v18, %v96_v34  ;;  %v5649_v38 = vld [vmem:[#allocation74_spill] sm:$0xff] }
 0x686   :  { %v1972_v51 = vmul.f32 0.5, %v1834_v32  ;;  %v1838_v35 = vpop.f32.mrb[39].mxu0  ;;  %v1879_v0 = vpop.f32.mrb[39].mxu1  ;;  %v203_v36 = vadd.f32 %v5649_v38, %v149_v15 }
 0x687   :  { %v1976_v59 = vmul.f32 0.5, %v1836_v49  ;;  %v1981_v55 = vmul.f32 0.5, %v1877_v50  ;;  %v5650_v49 = vld [vmem:[#allocation75_spill] sm:$0xff]  ;;  %v204_v35 = vadd.f32 %v3656_v56, %v150_v25 }
 0x688   :  { %2909 = vtanh.f32 %v1972_v51  ;;  %v151_v47 = vmul.f32 %v5650_v49, %v96_v34 }
 0x689   :  { %2911 = vtanh.f32 %v1976_v59 }
 0x68a   :  { %2913 = vtanh.f32 %v1875_v60 }
 0x68b   :  { %2915 = vtanh.f32 %v1981_v55 }
 0x692   :  { %v2910_v58 = vpop.eup %2909 }
 0x693   :  { %v2912_v62 = vpop.eup %2911  ;;  %v1974_v54 = vmul.f32 0.5, %v2910_v58 }
 0x694   :  { %v1978_v24 = vmul.f32 0.5, %v2912_v62  ;;  %v2914_v21 = vpop.eup %2913 }
 0x695   :  { %v1975_v61 = vadd.f32 0.5, %v1974_v54  ;;  %v2916_v7 = vpop.eup %2915 }
 0x696   :  { %v1979_v22 = vadd.f32 0.5, %v1978_v24  ;;  %v1983_v32 = vmul.f32 0.5, %v2916_v7 }
 0x697   :  { %v1986_v20 = vmul.f32 %v2914_v21, %v1975_v61  ;;  %v205_v61 = vadd.f32 %v5418_v23, %v151_v47  ;;  %v152_v21 = vmul.f32 %v5419_v29, %v96_v34 }
 0x698   :  { %v1985_v3 = vmul.f32 %v1979_v22, %v5646_v27  ;;  %v1984_v50 = vadd.f32 0.5, %v1983_v32 }
 0x699   :  { %v206_v25 = vadd.f32 %v3670_v1, %v152_v21 }
 0x69a   :  { %v4517_v11 = vadd.f32 %v1986_v20, %v1985_v3 }
 0x69c   :  { %2917 = vtanh.f32 %v4517_v11 }
 0x6a3   :  { %v1920_v52 = vpop.f32.mrb[40].mxu0  ;;  %v1961_v51 = vpop.f32.mrb[40].mxu1 }
 0x6a4   :  { %v1968_v0 = vadd.f32 %v1920_v52, %v203_v36  ;;  %v1922_v59 = vpop.f32.mrb[41].mxu0  ;;  %v1963_v60 = vpop.f32.mrb[41].mxu1  ;;  %v1970_v7 = vadd.f32 %v1961_v51, %v205_v61 }
 0x6a5   :  { %v1969_v55 = vadd.f32 %v1922_v59, %v204_v35  ;;  %v1924_v58 = vpop.f32.mrb[42].mxu0  ;;  %v1965_v62 = vpop.f32.mrb[42].mxu1  ;;  %v1971_v32 = vadd.f32 %v1963_v60, %v206_v25  ;;  %v4577_v25 = vld [vmem:[#allocation3 + $0xe8] ss:$16 sps:$4 sm:$0xff]  }
 0x6a6   :  { %v2918_v54 = vpop.eup %2917  ;;  %v1990_v24 = vmul.f32 0.5, %v1968_v0  ;;  %v1925_v22 = vpop.f32.mrb[43].mxu0 }
 0x6a7   :  { %v1966_v20 = vpop.f32.mrb[43].mxu1  ;;  %v1994_v27 = vmul.f32 0.5, %v1969_v55  ;;  %v1989_v3 = vmul.f32 %v2918_v54, %v1984_v50  ;;  %v1999_v36 = vmul.f32 0.5, %v1971_v32  ;;  %v4559_v22 = vld [vmem:[#allocation3 + $0xcc] ss:$16 sps:$4 sm:$0xff]  }
 0x6a8   :  { %2919 = vtanh.f32 %v1990_v24  ;;  %v4562_v20 = vld [vmem:[#allocation3 + $0xc0] ss:$16 sps:$4 sm:$0xff]   ;;  %v4580_v32 = vld [vmem:[#allocation6 + $0x4] ss:$16 sps:$4 sm:$0xff]  }
 0x6a9   :  { %2921 = vtanh.f32 %v1994_v27  ;;  %v2009_v15 = vpack.c.bf16 %v1989_v3, %v1989_v3  ;;  %v4565_v27 = vld [vmem:[#allocation3 + $0xc8] ss:$16 sps:$4 sm:$0xff]   ;;  %v4568_v3 = vld [vmem:[#allocation3 + $0xe4] ss:$16 sps:$4 sm:$0xff]  }
 0x6aa   :  { %2923 = vtanh.f32 %v1970_v7  ;;  %v4571_v7 = vld [vmem:[#allocation3 + $0xec] ss:$16 sps:$4 sm:$0xff]  }
 0x6ab   :  { %2042 = vmatprep.mubr.bf16.mxu0 %v2009_v15  ;;  %2083 = vmatprep.mubr.bf16.mxu1 %v2009_v15  ;;  %2925 = vtanh.f32 %v1999_v36  ;;  %v4574_v15 = vld [vmem:[#allocation3 + $0xe0] ss:$16 sps:$4 sm:$0xff]   ;;  %v4583_v36 = vld [vmem:[#allocation6 + $0xc] ss:$16 sps:$4 sm:$0xff]  }
 0x6b2   :  { %v2920_v52 = vpop.eup %2919 }
 0x6b3   :  { %v2922_v35 = vpop.eup %2921  ;;  %v1992_v47 = vmul.f32 0.5, %v2920_v52  ;;  %v4586_v52 = vld [vmem:[#allocation6] ss:$16 sps:$4 sm:$0xff]  }
 0x6b4   :  { %v1996_v0 = vmul.f32 0.5, %v2922_v35  ;;  %v2924_v59 = vpop.eup %2923  ;;  %5651 = vst [vmem:[#allocation22_spill] sm:$0xff] %v4586_v52  ;;  %v4589_v35 = vld [vmem:[#allocation6 + $0x8] ss:$16 sps:$4 sm:$0xff]  }
 0x6b5   :  { %v1993_v34 = vadd.f32 0.5, %v1992_v47  ;;  %v2926_v62 = vpop.eup %2925  ;;  %5652 = vst [vmem:[#allocation23_spill] sm:$0xff] %v4589_v35  ;;  %v4592_v47 = vld [vmem:[#allocation6 + $0x24] ss:$16 sps:$4 sm:$0xff]  }
 0x6b6   :  { %v1997_v55 = vadd.f32 0.5, %v1996_v0  ;;  %v2001_v54 = vmul.f32 0.5, %v2926_v62  ;;  %5653 = vst [vmem:[#allocation24_spill] sm:$0xff] %v4592_v47  ;;  %v4595_v0 = vld [vmem:[#allocation6 + $0x2c] ss:$16 sps:$4 sm:$0xff]  }
 0x6b7   :  { %v2004_v50 = vmul.f32 %v2924_v59, %v1993_v34  ;;  %5654 = vst [vmem:[#allocation25_spill] sm:$0xff] %v4595_v0  ;;  %v4598_v34 = vld [vmem:[#allocation6 + $0x20] ss:$16 sps:$4 sm:$0xff]   ;;  %v4601_v59 = vld [vmem:[#allocation6 + $0x28] ss:$16 sps:$4 sm:$0xff]  }
 0x6b8   :  { %v2003_v51 = vmul.f32 %v1997_v55, %v4363_v5  ;;  %v2002_v24 = vadd.f32 0.5, %v2001_v54  ;;  %v4556_v5 = vld [vmem:[#allocation3 + $0xc4] ss:$16 sps:$4 sm:$0xff]   ;;  %5655 = vst [vmem:[#allocation26_spill] sm:$0xff] %v4598_v34  ;;  %5656 = vst [vmem:[#allocation27_spill] sm:$0xff] %v4601_v59 }
 0x6b9   :  { %v4604_v55 = vld [vmem:[#allocation6 + $0x44] ss:$16 sps:$4 sm:$0xff]   ;;  %v4613_v62 = vld [vmem:[#allocation6 + $0x48] ss:$16 sps:$4 sm:$0xff]  }
 0x6ba   :  { %v4529_v58 = vadd.f32 %v2004_v50, %v2003_v51  ;;  %5657 = vst [vmem:[#allocation28_spill] sm:$0xff] %v4604_v55  ;;  %v4607_v50 = vld [vmem:[#allocation6 + $0x4c] ss:$16 sps:$4 sm:$0xff]   ;;  %v4610_v51 = vld [vmem:[#allocation6 + $0x40] ss:$16 sps:$4 sm:$0xff]   ;;  %5660 = vst [vmem:[#allocation12_spill] sm:$0xff] %v4613_v62 }
 0x6bb   :  { %5658 = vst [vmem:[#allocation29_spill] sm:$0xff] %v4607_v50  ;;  %5659 = vst [vmem:[#allocation30_spill] sm:$0xff] %v4610_v51  ;;  %v4616_v54 = vld [vmem:[#allocation6 + $0x64] ss:$16 sps:$4 sm:$0xff]  }
 0x6bc   :  { %2927 = vtanh.f32 %v4529_v58  ;;  %5661 = vst [vmem:[#allocation13_spill] sm:$0xff] %v4616_v54 }
 0x6c6   :  { %v2928_v60 = vpop.eup %2927 }
 0x6c7   :  { %v2007_v61 = vmul.f32 %v2928_v60, %v2002_v24  ;;  %v4619_v24 = vld [vmem:[#allocation6 + $0x6c] ss:$16 sps:$4 sm:$0xff]   ;;  %v4622_v60 = vld [vmem:[#allocation6 + $0x60] ss:$16 sps:$4 sm:$0xff]  }
 0x6c8   :  { %5662 = vst [vmem:[#allocation69_spill] sm:$0xff] %v4619_v24  ;;  %5663 = vst [vmem:[#allocation70_spill] sm:$0xff] %v4622_v60 }
 0x6c9   :  { %v2008_v21 = vpack.c.bf16 %v2007_v61, %v2007_v61  ;;  %v4625_v61 = vld [vmem:[#allocation6 + $0x68] ss:$16 sps:$4 sm:$0xff]  }
 0x6ca   :  { %5664 = vst [vmem:[#allocation72_spill] sm:$0xff] %v4625_v61 }
 0x6cb   :  { %2043 = vmatmul.mubr.bf16.vlgmr.msra.gmra.mrb[44].mxu0 %v2008_v21  ;;  %2084 = vmatmul.mubr.bf16.vlgmr.msra.gmra.mrb[44].mxu1 %v2008_v21 }
 0x6cc   :  { %2098 = vmatpush1.bf16.msra.mxu0 %v4366_v10  ;;  %2139 = vmatpush1.bf16.msra.mxu1 %v4369_v33 }
 0x6cd   :  { %2099 = vmatprep.subr.bf16.mxu0 %v4372_v26  ;;  %2140 = vmatprep.subr.bf16.mxu1 %v4375_v44 }
 0x6ce   :  { %2129 = vmatprep.mubr.bf16.mxu0 %v5348_v53  ;;  %2170 = vmatprep.mubr.bf16.mxu1 %v5348_v53 }
 0x6d0   :  { %2100 = vmatpush1.bf16.msra.mxu0 %v4380_v40  ;;  %2141 = vmatpush1.bf16.msra.mxu1 %v4383_v4 }
 0x6d1   :  { %2101 = vmatprep.subr.bf16.mxu0 %v4386_v12  ;;  %2142 = vmatprep.subr.bf16.mxu1 %v4389_v39 }
 0x6d4   :  { %2102 = vmatpush1.bf16.msra.mxu0 %v4392_v37  ;;  %2143 = vmatpush1.bf16.msra.mxu1 %v4395_v42 }
 0x6d5   :  { %2103 = vmatprep.subr.bf16.mxu0 %v4398_v6  ;;  %2144 = vmatprep.subr.bf16.mxu1 %v4401_v14 }
 0x6d8   :  { %2104 = vmatpush1.bf16.msra.mxu0 %v4404_v28  ;;  %2145 = vmatpush1.bf16.msra.mxu1 %v4407_v13 }
 0x6d9   :  { %2105 = vmatprep.subr.bf16.mxu0 %v4410_v41  ;;  %2146 = vmatprep.subr.bf16.mxu1 %v4413_v19 }
 0x6dc   :  { %2106 = vmatpush1.bf16.msra.mxu0 %v4416_v9  ;;  %2147 = vmatpush1.bf16.msra.mxu1 %v4419_v57 }
 0x6dd   :  { %2107 = vmatprep.subr.bf16.mxu0 %v4422_v45  ;;  %2148 = vmatprep.subr.bf16.mxu1 %v4425_v8 }
 0x6e0   :  { %2108 = vmatpush1.bf16.msra.mxu0 %v4428_v43  ;;  %2149 = vmatpush1.bf16.msra.mxu1 %v4431_v30 }
 0x6e1   :  { %2109 = vmatprep.subr.bf16.mxu0 %v4556_v5  ;;  %2150 = vmatprep.subr.bf16.mxu1 %v4559_v22 }
 0x6e4   :  { %2110 = vmatpush1.bf16.msra.mxu0 %v4562_v20  ;;  %2151 = vmatpush1.bf16.msra.mxu1 %v4565_v27 }
 0x6e5   :  { %2111 = vmatprep.subr.bf16.mxu0 %v4568_v3  ;;  %2152 = vmatprep.subr.bf16.mxu1 %v4571_v7 }
 0x6e8   :  { %2112 = vmatpush1.bf16.msra.mxu0 %v4574_v15  ;;  %2153 = vmatpush1.bf16.msra.mxu1 %v4577_v25 }
 0x6e9   :  { %2221 = vmatprep.subr.bf16.mxu0 %v4580_v32  ;;  %2262 = vmatprep.subr.bf16.mxu1 %v4583_v36 }
 0x6eb   :  { %2130 = vmatmul.mubr.bf16.vlgmr.msra.gmra.mrb[48].mxu0 %v2008_v21  ;;  %2171 = vmatmul.mubr.bf16.vlgmr.msra.gmra.mrb[48].mxu1 %v2008_v21  ;;  %v4628_v21 = vld [vmem:[#allocation6 + $0x84] ss:$16 sps:$4 sm:$0xff]  }
 0x6ec   :  { %2222 = vmatpush1.bf16.msra.mxu0 %v4586_v52  ;;  %2263 = vmatpush1.bf16.msra.mxu1 %v4589_v35  ;;  %5665 = vst [vmem:[#allocation76_spill] sm:$0xff] %v4628_v21 }
 0x6ed   :  { %2223 = vmatprep.subr.bf16.mxu0 %v4592_v47  ;;  %2264 = vmatprep.subr.bf16.mxu1 %v4595_v0 }
 0x6f0   :  { %2224 = vmatpush1.bf16.msra.mxu0 %v4598_v34  ;;  %2265 = vmatpush1.bf16.msra.mxu1 %v4601_v59 }
 0x6f1   :  { %2225 = vmatprep.subr.bf16.mxu0 %v4604_v55  ;;  %2266 = vmatprep.subr.bf16.mxu1 %v4607_v50 }
 0x6f4   :  { %2226 = vmatpush1.bf16.msra.mxu0 %v4610_v51  ;;  %2267 = vmatpush1.bf16.msra.mxu1 %v4613_v62  ;;  %v4631_v62 = vld [vmem:[#allocation6 + $0x8c] ss:$16 sps:$4 sm:$0xff]  }
 0x6f5   :  { %2227 = vmatprep.subr.bf16.mxu0 %v4616_v54  ;;  %2268 = vmatprep.subr.bf16.mxu1 %v4619_v24  ;;  %5666 = vst [vmem:[#allocation77_spill] sm:$0xff] %v4631_v62  ;;  %v4634_v54 = vld [vmem:[#allocation6 + $0x80] ss:$16 sps:$4 sm:$0xff]   ;;  %v4637_v24 = vld [vmem:[#allocation6 + $0x88] ss:$16 sps:$4 sm:$0xff]  }
 0x6f6   :  { %5667 = vst [vmem:[#allocation31_spill] sm:$0xff] %v4634_v54  ;;  %5668 = vst [vmem:[#allocation32_spill] sm:$0xff] %v4637_v24 }
 0x6f8   :  { %2228 = vmatpush1.bf16.msra.mxu0 %v4622_v60  ;;  %2269 = vmatpush1.bf16.msra.mxu1 %v4625_v61  ;;  %v4640_v60 = vld [vmem:[#allocation6 + $0xa4] ss:$16 sps:$4 sm:$0xff]   ;;  %v4643_v61 = vld [vmem:[#allocation6 + $0xac] ss:$16 sps:$4 sm:$0xff]  }
 0x6f9   :  { %2229 = vmatprep.subr.bf16.mxu0 %v4628_v21  ;;  %2270 = vmatprep.subr.bf16.mxu1 %v4631_v62  ;;  %5669 = vst [vmem:[#allocation33_spill] sm:$0xff] %v4640_v60  ;;  %5670 = vst [vmem:[#allocation34_spill] sm:$0xff] %v4643_v61  ;;  %v4646_v21 = vld [vmem:[#allocation6 + $0xa0] ss:$16 sps:$4 sm:$0xff]   ;;  %v4649_v62 = vld [vmem:[#allocation6 + $0xa8] ss:$16 sps:$4 sm:$0xff]  }
 0x6fa   :  { %5671 = vst [vmem:[#allocation35_spill] sm:$0xff] %v4646_v21  ;;  %5672 = vst [vmem:[#allocation36_spill] sm:$0xff] %v4649_v62 }
 0x6fc   :  { %2230 = vmatpush1.bf16.msra.mxu0 %v4634_v54  ;;  %2271 = vmatpush1.bf16.msra.mxu1 %v4637_v24  ;;  %v4652_v54 = vld [vmem:[#allocation6 + $0xc4] ss:$16 sps:$4 sm:$0xff]   ;;  %v4655_v24 = vld [vmem:[#allocation6 + $0xcc] ss:$16 sps:$4 sm:$0xff]  }
 0x6fd   :  { %2231 = vmatprep.subr.bf16.mxu0 %v4640_v60  ;;  %2272 = vmatprep.subr.bf16.mxu1 %v4643_v61  ;;  %5673 = vst [vmem:[#allocation37_spill] sm:$0xff] %v4652_v54  ;;  %5674 = vst [vmem:[#allocation19_spill] sm:$0xff] %v4655_v24  ;;  %v4658_v60 = vld [vmem:[#allocation6 + $0xc0] ss:$16 sps:$4 sm:$0xff]   ;;  %v4661_v61 = vld [vmem:[#allocation6 + $0xc8] ss:$16 sps:$4 sm:$0xff]  }
 0x6fe   :  { %5675 = vst [vmem:[#allocation20_spill] sm:$0xff] %v4658_v60  ;;  %5676 = vst [vmem:[#allocation84_spill] sm:$0xff] %v4661_v61 }
 0x700   :  { %2232 = vmatpush1.bf16.msra.mxu0 %v4646_v21  ;;  %2273 = vmatpush1.bf16.msra.mxu1 %v4649_v62  ;;  %v4664_v21 = vld [vmem:[#allocation6 + $0xe4] ss:$16 sps:$4 sm:$0xff]   ;;  %v4667_v62 = vld [vmem:[#allocation6 + $0xec] ss:$16 sps:$4 sm:$0xff]  }
 0x701   :  { %2233 = vmatprep.subr.bf16.mxu0 %v4652_v54  ;;  %2274 = vmatprep.subr.bf16.mxu1 %v4655_v24  ;;  %5677 = vst [vmem:[#allocation38_spill] sm:$0xff] %v4664_v21  ;;  %5678 = vst [vmem:[#allocation39_spill] sm:$0xff] %v4667_v62  ;;  %v4670_v54 = vld [vmem:[#allocation6 + $0xe0] ss:$16 sps:$4 sm:$0xff]   ;;  %v4673_v24 = vld [vmem:[#allocation6 + $0xe8] ss:$16 sps:$4 sm:$0xff]  }
 0x702   :  { %5679 = vst [vmem:[#allocation40_spill] sm:$0xff] %v4670_v54  ;;  %5680 = vst [vmem:[#allocation41_spill] sm:$0xff] %v4673_v24 }
 0x704   :  { %2234 = vmatpush1.bf16.msra.mxu0 %v4658_v60  ;;  %2275 = vmatpush1.bf16.msra.mxu1 %v4661_v61  ;;  %v4676_v60 = vld [vmem:[#allocation6 + $0x104] ss:$16 sps:$4 sm:$0xff]   ;;  %v4679_v61 = vld [vmem:[#allocation6 + $0x10c] ss:$16 sps:$4 sm:$0xff]  }
 0x705   :  { %2235 = vmatprep.subr.bf16.mxu0 %v4664_v21  ;;  %2276 = vmatprep.subr.bf16.mxu1 %v4667_v62  ;;  %5681 = vst [vmem:[#allocation42_spill] sm:$0xff] %v4676_v60  ;;  %5682 = vst [vmem:[#allocation43_spill] sm:$0xff] %v4679_v61  ;;  %v4682_v21 = vld [vmem:[#allocation6 + $0x100] ss:$16 sps:$4 sm:$0xff]   ;;  %v4685_v62 = vld [vmem:[#allocation6 + $0x108] ss:$16 sps:$4 sm:$0xff]  }
 0x706   :  { %5683 = vst [vmem:[#allocation44_spill] sm:$0xff] %v4682_v21  ;;  %5684 = vst [vmem:[#allocation45_spill] sm:$0xff] %v4685_v62 }
 0x708   :  { %2236 = vmatpush1.bf16.msra.mxu0 %v4670_v54  ;;  %2277 = vmatpush1.bf16.msra.mxu1 %v4673_v24  ;;  %v4688_v54 = vld [vmem:[#allocation6 + $0x124] ss:$16 sps:$4 sm:$0xff]   ;;  %v4691_v24 = vld [vmem:[#allocation6 + $0x12c] ss:$16 sps:$4 sm:$0xff]  }
 0x709   :  { %2237 = vmatprep.subr.bf16.mxu0 %v4676_v60  ;;  %2278 = vmatprep.subr.bf16.mxu1 %v4679_v61  ;;  %5685 = vst [vmem:[#allocation46_spill] sm:$0xff] %v4688_v54  ;;  %5686 = vst [vmem:[#allocation47_spill] sm:$0xff] %v4691_v24  ;;  %v4694_v60 = vld [vmem:[#allocation6 + $0x120] ss:$16 sps:$4 sm:$0xff]   ;;  %v4697_v61 = vld [vmem:[#allocation6 + $0x128] ss:$16 sps:$4 sm:$0xff]  }
 0x70a   :  { %5687 = vst [vmem:[#allocation48_spill] sm:$0xff] %v4694_v60  ;;  %5688 = vst [vmem:[#allocation49_spill] sm:$0xff] %v4697_v61 }
 0x70c   :  { %2238 = vmatpush1.bf16.msra.mxu0 %v4682_v21  ;;  %2279 = vmatpush1.bf16.msra.mxu1 %v4685_v62  ;;  %v4700_v21 = vld [vmem:[#allocation6 + $0x144] ss:$16 sps:$4 sm:$0xff]   ;;  %v4703_v62 = vld [vmem:[#allocation6 + $0x14c] ss:$16 sps:$4 sm:$0xff]  }
 0x70d   :  { %2239 = vmatprep.subr.bf16.mxu0 %v4688_v54  ;;  %2280 = vmatprep.subr.bf16.mxu1 %v4691_v24  ;;  %5689 = vst [vmem:[#allocation50_spill] sm:$0xff] %v4700_v21  ;;  %5690 = vst [vmem:[#allocation51_spill] sm:$0xff] %v4703_v62  ;;  %v4706_v54 = vld [vmem:[#allocation6 + $0x140] ss:$16 sps:$4 sm:$0xff]   ;;  %v4709_v24 = vld [vmem:[#allocation6 + $0x148] ss:$16 sps:$4 sm:$0xff]  }
 0x70e   :  { %5691 = vst [vmem:[#allocation52_spill] sm:$0xff] %v4706_v54  ;;  %5692 = vst [vmem:[#allocation53_spill] sm:$0xff] %v4709_v24 }
 0x710   :  { %2240 = vmatpush1.bf16.msra.mxu0 %v4694_v60  ;;  %2281 = vmatpush1.bf16.msra.mxu1 %v4697_v61  ;;  %v4712_v60 = vld [vmem:[#allocation6 + $0x164] ss:$16 sps:$4 sm:$0xff]   ;;  %v4715_v61 = vld [vmem:[#allocation6 + $0x16c] ss:$16 sps:$4 sm:$0xff]  }
 0x711   :  { %2241 = vmatprep.subr.bf16.mxu0 %v4700_v21  ;;  %2282 = vmatprep.subr.bf16.mxu1 %v4703_v62  ;;  %5693 = vst [vmem:[#allocation54_spill] sm:$0xff] %v4712_v60  ;;  %5694 = vst [vmem:[#allocation55_spill] sm:$0xff] %v4715_v61  ;;  %v4718_v21 = vld [vmem:[#allocation6 + $0x160] ss:$16 sps:$4 sm:$0xff]   ;;  %v4721_v62 = vld [vmem:[#allocation6 + $0x168] ss:$16 sps:$4 sm:$0xff]  }
 0x712   :  { %5695 = vst [vmem:[#allocation56_spill] sm:$0xff] %v4718_v21  ;;  %5696 = vst [vmem:[#allocation57_spill] sm:$0xff] %v4721_v62 }
 0x714   :  { %2242 = vmatpush1.bf16.msra.mxu0 %v4706_v54  ;;  %2283 = vmatpush1.bf16.msra.mxu1 %v4709_v24  ;;  %v4724_v54 = vld [vmem:[#allocation6 + $0x184] ss:$16 sps:$4 sm:$0xff]   ;;  %v4727_v24 = vld [vmem:[#allocation6 + $0x18c] ss:$16 sps:$4 sm:$0xff]  }
 0x715   :  { %2243 = vmatprep.subr.bf16.mxu0 %v4712_v60  ;;  %2284 = vmatprep.subr.bf16.mxu1 %v4715_v61  ;;  %5697 = vst [vmem:[#allocation58_spill] sm:$0xff] %v4724_v54  ;;  %5698 = vst [vmem:[#allocation59_spill] sm:$0xff] %v4727_v24  ;;  %v4730_v60 = vld [vmem:[#allocation6 + $0x180] ss:$16 sps:$4 sm:$0xff]   ;;  %v4733_v61 = vld [vmem:[#allocation6 + $0x188] ss:$16 sps:$4 sm:$0xff]  }
 0x716   :  { %5699 = vst [vmem:[#allocation60_spill] sm:$0xff] %v4730_v60  ;;  %5700 = vst [vmem:[#allocation61_spill] sm:$0xff] %v4733_v61 }
 0x718   :  { %2244 = vmatpush1.bf16.msra.mxu0 %v4718_v21  ;;  %2285 = vmatpush1.bf16.msra.mxu1 %v4721_v62  ;;  %v4736_v21 = vld [vmem:[#allocation6 + $0x1a4] ss:$16 sps:$4 sm:$0xff]   ;;  %v4739_v62 = vld [vmem:[#allocation6 + $0x1ac] ss:$16 sps:$4 sm:$0xff]  }
 0x719   :  { %2245 = vmatprep.subr.bf16.mxu0 %v4724_v54  ;;  %2286 = vmatprep.subr.bf16.mxu1 %v4727_v24  ;;  %5701 = vst [vmem:[#allocation62_spill] sm:$0xff] %v4736_v21  ;;  %5702 = vst [vmem:[#allocation63_spill] sm:$0xff] %v4739_v62  ;;  %v4742_v54 = vld [vmem:[#allocation6 + $0x1a0] ss:$16 sps:$4 sm:$0xff]   ;;  %v4745_v24 = vld [vmem:[#allocation6 + $0x1a8] ss:$16 sps:$4 sm:$0xff]  }
 0x71a   :  { %5703 = vst [vmem:[#allocation64_spill] sm:$0xff] %v4742_v54  ;;  %5704 = vst [vmem:[#allocation65_spill] sm:$0xff] %v4745_v24 }
 0x71c   :  { %2246 = vmatpush1.bf16.msra.mxu0 %v4730_v60  ;;  %2287 = vmatpush1.bf16.msra.mxu1 %v4733_v61  ;;  %v4748_v60 = vld [vmem:[#allocation6 + $0x1c4] ss:$16 sps:$4 sm:$0xff]   ;;  %v4751_v61 = vld [vmem:[#allocation6 + $0x1cc] ss:$16 sps:$4 sm:$0xff]  }
 0x71d   :  { %2247 = vmatprep.subr.bf16.mxu0 %v4736_v21  ;;  %2288 = vmatprep.subr.bf16.mxu1 %v4739_v62  ;;  %5705 = vst [vmem:[#allocation66_spill] sm:$0xff] %v4748_v60  ;;  %5706 = vst [vmem:[#allocation67_spill] sm:$0xff] %v4751_v61  ;;  %v4754_v21 = vld [vmem:[#allocation6 + $0x1c0] ss:$16 sps:$4 sm:$0xff]   ;;  %v4757_v62 = vld [vmem:[#allocation6 + $0x1c8] ss:$16 sps:$4 sm:$0xff]  }
 0x71e   :  { %5707 = vst [vmem:[#allocation68_spill] sm:$0xff] %v4754_v21  ;;  %5708 = vst [vmem:[#allocation18_spill] sm:$0xff] %v4757_v62 }
 0x720   :  { %2248 = vmatpush1.bf16.msra.mxu0 %v4742_v54  ;;  %2289 = vmatpush1.bf16.msra.mxu1 %v4745_v24  ;;  %v4760_v54 = vld [vmem:[#allocation6 + $0x1e4] ss:$16 sps:$4 sm:$0xff]   ;;  %v4763_v24 = vld [vmem:[#allocation6 + $0x1ec] ss:$16 sps:$4 sm:$0xff]  }
 0x721   :  { %2249 = vmatprep.subr.bf16.mxu0 %v4748_v60  ;;  %2290 = vmatprep.subr.bf16.mxu1 %v4751_v61  ;;  %5709 = vst [vmem:[#allocation78_spill] sm:$0xff] %v4760_v54  ;;  %5710 = vst [vmem:[#allocation79_spill] sm:$0xff] %v4763_v24  ;;  %v4766_v60 = vld [vmem:[#allocation6 + $0x1e0] ss:$16 sps:$4 sm:$0xff]   ;;  %v4769_v61 = vld [vmem:[#allocation6 + $0x1e8] ss:$16 sps:$4 sm:$0xff]  }
 0x722   :  { %5711 = vst [vmem:[#allocation80_spill] sm:$0xff] %v4766_v60  ;;  %5712 = vst [vmem:[#allocation81_spill] sm:$0xff] %v4769_v61 }
 0x724   :  { %2250 = vmatpush1.bf16.msra.mxu0 %v4754_v21  ;;  %2291 = vmatpush1.bf16.msra.mxu1 %v4757_v62 }
 0x725   :  { %2251 = vmatprep.subr.bf16.mxu0 %v4760_v54  ;;  %2292 = vmatprep.subr.bf16.mxu1 %v4763_v24 }
 0x728   :  { %2252 = vmatpush1.bf16.msra.mxu0 %v4766_v60  ;;  %2293 = vmatpush1.bf16.msra.mxu1 %v4769_v61 }
 0x729   :  { %2308 = vmatprep.subr.bf16.mxu0 %v4506_v16  ;;  %2349 = vmatprep.subr.bf16.mxu1 %v4509_v17 }
 0x79e   :  { %v2044_v62 = vpop.f32.mrb[44].mxu0  ;;  %v2085_v21 = vpop.f32.mrb[44].mxu1 }
 0x79f   :  { %v2045_v54 = vadd.f32 %v2044_v62, %v5642_v31  ;;  %v2046_v51 = vpop.f32.mrb[45].mxu0  ;;  %v2087_v50 = vpop.f32.mrb[45].mxu1  ;;  %v2086_v61 = vadd.f32 %v2085_v21, %v5644_v48 }
 0x7a0   :  { %v2047_v24 = vadd.f32 %v2046_v51, %v5643_v2  ;;  %v2048_v55 = vpop.f32.mrb[46].mxu0  ;;  %v2089_v59 = vpop.f32.mrb[46].mxu1  ;;  %v2088_v16 = vadd.f32 %v2087_v50, %v5645_v63 }
 0x7a1   :  { %v2183_v34 = vmul.f32 0.5, %v2045_v54  ;;  %v2049_v60 = vpop.f32.mrb[47].mxu0  ;;  %v2090_v0 = vpop.f32.mrb[47].mxu1 }
 0x7a2   :  { %v2187_v47 = vmul.f32 0.5, %v2047_v24  ;;  %v2192_v17 = vmul.f32 0.5, %v2088_v16 }
 0x7a3   :  { %2929 = vtanh.f32 %v2183_v34  ;;  %v101_v34 = vpop.permute.xlu0 %100 }
 0x7a4   :  { %2931 = vtanh.f32 %v2187_v47  ;;  %v153_v50 = vmul.f32 %v5647_v46, %v101_v34  ;;  %v154_v60 = vmul.f32 %v5648_v18, %v101_v34 }
 0x7a5   :  { %2933 = vtanh.f32 %v2086_v61 }
 0x7a6   :  { %2935 = vtanh.f32 %v2192_v17  ;;  %v208_v16 = vadd.f32 %v3656_v56, %v154_v60 }
 0x7ad   :  { %v2930_v35 = vpop.eup %2929 }
 0x7ae   :  { %v2932_v62 = vpop.eup %2931  ;;  %v2185_v31 = vmul.f32 0.5, %v2930_v35  ;;  %v207_v35 = vadd.f32 %v5649_v38, %v153_v50 }
 0x7af   :  { %v2189_v52 = vmul.f32 0.5, %v2932_v62  ;;  %v2934_v55 = vpop.eup %2933 }
 0x7b0   :  { %v2186_v51 = vadd.f32 0.5, %v2185_v31  ;;  %v2936_v47 = vpop.eup %2935  ;;  %v155_v31 = vmul.f32 %v5650_v49, %v101_v34 }
 0x7b1   :  { %v2190_v59 = vadd.f32 0.5, %v2189_v52  ;;  %v2194_v61 = vmul.f32 0.5, %v2936_v47  ;;  %v156_v47 = vmul.f32 %v5419_v29, %v101_v34 }
 0x7b2   :  { %v2197_v54 = vmul.f32 %v2934_v55, %v2186_v51  ;;  %v209_v18 = vadd.f32 %v5418_v23, %v155_v31 }
 0x7b3   :  { %v2196_v0 = vmul.f32 %v2190_v59, %v4517_v11  ;;  %v2195_v51 = vadd.f32 0.5, %v2194_v61 }
 0x7b5   :  { %v4779_v24 = vadd.f32 %v2197_v54, %v2196_v0 }
 0x7b7   :  { %5713 = vst [vmem:[#allocation82_spill] sm:$0xff] %v4779_v24  ;;  %2937 = vtanh.f32 %v4779_v24 }
 0x7be   :  { %v2131_v21 = vpop.f32.mrb[48].mxu0  ;;  %v2172_v52 = vpop.f32.mrb[48].mxu1 }
 0x7bf   :  { %v2179_v11 = vadd.f32 %v2131_v21, %v207_v35  ;;  %v2133_v17 = vpop.f32.mrb[49].mxu0  ;;  %v2174_v62 = vpop.f32.mrb[49].mxu1  ;;  %v2181_v63 = vadd.f32 %v2172_v52, %v209_v18  ;;  %v210_v35 = vadd.f32 %v3670_v1, %v156_v47  ;;  %v5750_v47 = vld [vmem:[#allocation48_spill] sm:$0xff] }
 0x7c0   :  { %v2180_v55 = vadd.f32 %v2133_v17, %v208_v16  ;;  %v2135_v59 = vpop.f32.mrb[50].mxu0  ;;  %v2176_v54 = vpop.f32.mrb[50].mxu1 }
 0x7c1   :  { %v2938_v0 = vpop.eup %2937  ;;  %v2201_v46 = vmul.f32 0.5, %v2179_v11  ;;  %v2136_v50 = vpop.f32.mrb[51].mxu0  ;;  %v2182_v61 = vadd.f32 %v2174_v62, %v210_v35  ;;  %v5748_v54 = vld [vmem:[#allocation46_spill] sm:$0xff]  ;;  %v5753_v35 = vld [vmem:[#allocation51_spill] sm:$0xff] }
 0x7c2   :  { %v2177_v38 = vpop.f32.mrb[51].mxu1  ;;  %v2205_v49 = vmul.f32 0.5, %v2180_v55  ;;  %v2200_v24 = vmul.f32 %v2938_v0, %v2195_v51  ;;  %v5749_v0 = vld [vmem:[#allocation47_spill] sm:$0xff]  ;;  %v5751_v50 = vld [vmem:[#allocation49_spill] sm:$0xff] }
 0x7c3   :  { %2939 = vtanh.f32 %v2201_v46  ;;  %v2210_v21 = vmul.f32 0.5, %v2182_v61  ;;  %v5754_v61 = vld [vmem:[#allocation52_spill] sm:$0xff] }
 0x7c4   :  { %2941 = vtanh.f32 %v2205_v49  ;;  %v2220_v60 = vpack.c.bf16 %v2200_v24, %v2200_v24 }
 0x7c5   :  { %2943 = vtanh.f32 %v2181_v63 }
 0x7c6   :  { %2253 = vmatprep.mubr.bf16.mxu0 %v2220_v60  ;;  %2294 = vmatprep.mubr.bf16.mxu1 %v2220_v60  ;;  %2945 = vtanh.f32 %v2210_v21  ;;  %v5752_v60 = vld [vmem:[#allocation50_spill] sm:$0xff]  ;;  %v5755_v21 = vld [vmem:[#allocation53_spill] sm:$0xff] }
 0x7cd   :  { %v2940_v16 = vpop.eup %2939 }
 0x7ce   :  { %v2942_v11 = vpop.eup %2941  ;;  %v2203_v31 = vmul.f32 0.5, %v2940_v16  ;;  %v5756_v16 = vld [vmem:[#allocation54_spill] sm:$0xff] }
 0x7cf   :  { %v2207_v17 = vmul.f32 0.5, %v2942_v11  ;;  %v2944_v38 = vpop.eup %2943  ;;  %v5757_v11 = vld [vmem:[#allocation55_spill] sm:$0xff] }
 0x7d0   :  { %v2204_v34 = vadd.f32 0.5, %v2203_v31  ;;  %v2946_v49 = vpop.eup %2945  ;;  %v5758_v31 = vld [vmem:[#allocation56_spill] sm:$0xff] }
 0x7d1   :  { %v2208_v55 = vadd.f32 0.5, %v2207_v17  ;;  %v2212_v24 = vmul.f32 0.5, %v2946_v49  ;;  %v5759_v17 = vld [vmem:[#allocation57_spill] sm:$0xff]  ;;  %v5765_v49 = vld [vmem:[#allocation63_spill] sm:$0xff] }
 0x7d2   :  { %v2215_v51 = vmul.f32 %v2944_v38, %v2204_v34  ;;  %v5760_v34 = vld [vmem:[#allocation58_spill] sm:$0xff]  ;;  %v5761_v38 = vld [vmem:[#allocation59_spill] sm:$0xff] }
 0x7d3   :  { %v2214_v46 = vmul.f32 %v2208_v55, %v4529_v58  ;;  %v2213_v63 = vadd.f32 0.5, %v2212_v24  ;;  %v5737_v58 = vld [vmem:[#allocation19_spill] sm:$0xff]  ;;  %v5762_v55 = vld [vmem:[#allocation60_spill] sm:$0xff] }
 0x7d4   :  { %v5766_v24 = vld [vmem:[#allocation64_spill] sm:$0xff] }
 0x7d5   :  { %v4791_v18 = vadd.f32 %v2215_v51, %v2214_v46  ;;  %v5763_v51 = vld [vmem:[#allocation61_spill] sm:$0xff]  ;;  %v5764_v46 = vld [vmem:[#allocation62_spill] sm:$0xff] }
 0x7d7   :  { %2947 = vtanh.f32 %v4791_v18 }
 0x7e1   :  { %v2948_v52 = vpop.eup %2947 }
 0x7e2   :  { %v2218_v62 = vmul.f32 %v2948_v52, %v2213_v63  ;;  %v5767_v63 = vld [vmem:[#allocation65_spill] sm:$0xff]  ;;  %v5768_v52 = vld [vmem:[#allocation66_spill] sm:$0xff] }
 0x7e4   :  { %v2219_v59 = vpack.c.bf16 %v2218_v62, %v2218_v62  ;;  %v5769_v62 = vld [vmem:[#allocation67_spill] sm:$0xff] }
 0x7e6   :  { %2254 = vmatmul.mubr.bf16.vlgmr.msra.gmra.mrb[52].mxu0 %v2219_v59  ;;  %2295 = vmatmul.mubr.bf16.vlgmr.msra.gmra.mrb[52].mxu1 %v2219_v59 }
 0x7e7   :  { %2309 = vmatpush1.bf16.msra.mxu0 %v4366_v10  ;;  %2350 = vmatpush1.bf16.msra.mxu1 %v4369_v33  ;;  %v5715_v10 = vld [vmem:[#allocation23_spill] sm:$0xff]  ;;  %v5716_v33 = vld [vmem:[#allocation24_spill] sm:$0xff] }
 0x7e8   :  { %2310 = vmatprep.subr.bf16.mxu0 %v4372_v26  ;;  %2351 = vmatprep.subr.bf16.mxu1 %v4375_v44  ;;  %v5717_v26 = vld [vmem:[#allocation25_spill] sm:$0xff]  ;;  %v5718_v44 = vld [vmem:[#allocation26_spill] sm:$0xff] }
 0x7e9   :  { %2340 = vmatprep.mubr.bf16.mxu0 %v5348_v53  ;;  %2381 = vmatprep.mubr.bf16.mxu1 %v5348_v53  ;;  %v5714_v53 = vld [vmem:[#allocation22_spill] sm:$0xff] }
 0x7eb   :  { %2311 = vmatpush1.bf16.msra.mxu0 %v4380_v40  ;;  %2352 = vmatpush1.bf16.msra.mxu1 %v4383_v4  ;;  %v5719_v40 = vld [vmem:[#allocation27_spill] sm:$0xff]  ;;  %v5720_v4 = vld [vmem:[#allocation28_spill] sm:$0xff] }
 0x7ec   :  { %2312 = vmatprep.subr.bf16.mxu0 %v4386_v12  ;;  %2353 = vmatprep.subr.bf16.mxu1 %v4389_v39  ;;  %v5721_v12 = vld [vmem:[#allocation29_spill] sm:$0xff]  ;;  %v5722_v39 = vld [vmem:[#allocation30_spill] sm:$0xff] }
 0x7ef   :  { %2313 = vmatpush1.bf16.msra.mxu0 %v4392_v37  ;;  %2354 = vmatpush1.bf16.msra.mxu1 %v4395_v42  ;;  %v5723_v37 = vld [vmem:[#allocation12_spill] sm:$0xff]  ;;  %v5724_v42 = vld [vmem:[#allocation13_spill] sm:$0xff] }
 0x7f0   :  { %2314 = vmatprep.subr.bf16.mxu0 %v4398_v6  ;;  %2355 = vmatprep.subr.bf16.mxu1 %v4401_v14  ;;  %v5725_v6 = vld [vmem:[#allocation69_spill] sm:$0xff]  ;;  %v5726_v14 = vld [vmem:[#allocation70_spill] sm:$0xff] }
 0x7f3   :  { %2315 = vmatpush1.bf16.msra.mxu0 %v4404_v28  ;;  %2356 = vmatpush1.bf16.msra.mxu1 %v4407_v13  ;;  %v5727_v28 = vld [vmem:[#allocation72_spill] sm:$0xff] }
 0x7f4   :  { %2316 = vmatprep.subr.bf16.mxu0 %v4410_v41  ;;  %2357 = vmatprep.subr.bf16.mxu1 %v4413_v19  ;;  %v5728_v13 = vld [vmem:[#allocation76_spill] sm:$0xff]  ;;  %v5729_v41 = vld [vmem:[#allocation77_spill] sm:$0xff]  ;;  %v5730_v19 = vld [vmem:[#allocation31_spill] sm:$0xff] }
 0x7f7   :  { %2317 = vmatpush1.bf16.msra.mxu0 %v4416_v9  ;;  %2358 = vmatpush1.bf16.msra.mxu1 %v4419_v57  ;;  %v5731_v9 = vld [vmem:[#allocation32_spill] sm:$0xff]  ;;  %v5732_v57 = vld [vmem:[#allocation33_spill] sm:$0xff] }
 0x7f8   :  { %2318 = vmatprep.subr.bf16.mxu0 %v4422_v45  ;;  %2359 = vmatprep.subr.bf16.mxu1 %v4425_v8  ;;  %v5733_v45 = vld [vmem:[#allocation34_spill] sm:$0xff]  ;;  %v5734_v8 = vld [vmem:[#allocation35_spill] sm:$0xff] }
 0x7fb   :  { %2319 = vmatpush1.bf16.msra.mxu0 %v4428_v43  ;;  %2360 = vmatpush1.bf16.msra.mxu1 %v4431_v30  ;;  %v5735_v43 = vld [vmem:[#allocation36_spill] sm:$0xff]  ;;  %v5736_v30 = vld [vmem:[#allocation37_spill] sm:$0xff] }
 0x7fc   :  { %2320 = vmatprep.subr.bf16.mxu0 %v4556_v5  ;;  %2361 = vmatprep.subr.bf16.mxu1 %v4559_v22  ;;  %v5738_v5 = vld [vmem:[#allocation20_spill] sm:$0xff] }
 0x7fd   :  { %v5739_v22 = vld [vmem:[#allocation84_spill] sm:$0xff] }
 0x7ff   :  { %2321 = vmatpush1.bf16.msra.mxu0 %v4562_v20  ;;  %2362 = vmatpush1.bf16.msra.mxu1 %v4565_v27  ;;  %v5740_v20 = vld [vmem:[#allocation38_spill] sm:$0xff]  ;;  %v5741_v27 = vld [vmem:[#allocation39_spill] sm:$0xff] }
 0x800   :  { %2322 = vmatprep.subr.bf16.mxu0 %v4568_v3  ;;  %2363 = vmatprep.subr.bf16.mxu1 %v4571_v7  ;;  %v5742_v3 = vld [vmem:[#allocation40_spill] sm:$0xff]  ;;  %v5743_v7 = vld [vmem:[#allocation41_spill] sm:$0xff] }
 0x803   :  { %2323 = vmatpush1.bf16.msra.mxu0 %v4574_v15  ;;  %2364 = vmatpush1.bf16.msra.mxu1 %v4577_v25  ;;  %v5744_v15 = vld [vmem:[#allocation42_spill] sm:$0xff]  ;;  %v5745_v25 = vld [vmem:[#allocation43_spill] sm:$0xff] }
 0x804   :  { %2432 = vmatprep.subr.bf16.mxu0 %v4580_v32  ;;  %2473 = vmatprep.subr.bf16.mxu1 %v4583_v36  ;;  %v5746_v32 = vld [vmem:[#allocation44_spill] sm:$0xff]  ;;  %v5747_v36 = vld [vmem:[#allocation45_spill] sm:$0xff] }
 0x806   :  { %2341 = vmatmul.mubr.bf16.vlgmr.msra.gmra.mrb[56].mxu0 %v2219_v59  ;;  %2382 = vmatmul.mubr.bf16.vlgmr.msra.gmra.mrb[56].mxu1 %v2219_v59  ;;  %v5770_v59 = vld [vmem:[#allocation68_spill] sm:$0xff] }
 0x807   :  { %2433 = vmatpush1.bf16.msra.mxu0 %v5714_v53  ;;  %2474 = vmatpush1.bf16.msra.mxu1 %v5715_v10  ;;  %v5771_v53 = vld [vmem:[#allocation18_spill] sm:$0xff] }
 0x808   :  { %2434 = vmatprep.subr.bf16.mxu0 %v5716_v33  ;;  %2475 = vmatprep.subr.bf16.mxu1 %v5717_v26  ;;  %v5772_v10 = vld [vmem:[#allocation78_spill] sm:$0xff]  ;;  %v5773_v33 = vld [vmem:[#allocation79_spill] sm:$0xff]  ;;  %v5774_v26 = vld [vmem:[#allocation80_spill] sm:$0xff] }
 0x80b   :  { %2435 = vmatpush1.bf16.msra.mxu0 %v5718_v44  ;;  %2476 = vmatpush1.bf16.msra.mxu1 %v5719_v40  ;;  %v5775_v44 = vld [vmem:[#allocation81_spill] sm:$0xff] }
 0x80c   :  { %2436 = vmatprep.subr.bf16.mxu0 %v5720_v4  ;;  %2477 = vmatprep.subr.bf16.mxu1 %v5721_v12  ;;  %v5776_v12 = vld [vmem:[#allocation14_spill] sm:$0xff] }
 0x80f   :  { %2437 = vmatpush1.bf16.msra.mxu0 %v5722_v39  ;;  %2478 = vmatpush1.bf16.msra.mxu1 %v5723_v37 }
 0x810   :  { %2438 = vmatprep.subr.bf16.mxu0 %v5724_v42  ;;  %2479 = vmatprep.subr.bf16.mxu1 %v5725_v6 }
 0x813   :  { %2439 = vmatpush1.bf16.msra.mxu0 %v5726_v14  ;;  %2480 = vmatpush1.bf16.msra.mxu1 %v5727_v28 }
 0x814   :  { %2440 = vmatprep.subr.bf16.mxu0 %v5728_v13  ;;  %2481 = vmatprep.subr.bf16.mxu1 %v5729_v41 }
 0x817   :  { %2441 = vmatpush1.bf16.msra.mxu0 %v5730_v19  ;;  %2482 = vmatpush1.bf16.msra.mxu1 %v5731_v9 }
 0x818   :  { %2442 = vmatprep.subr.bf16.mxu0 %v5732_v57  ;;  %2483 = vmatprep.subr.bf16.mxu1 %v5733_v45  ;;  %v5777_v45 = vld [vmem:[#allocation17_spill] sm:$0xff] }
 0x81b   :  { %2443 = vmatpush1.bf16.msra.mxu0 %v5734_v8  ;;  %2484 = vmatpush1.bf16.msra.mxu1 %v5735_v43 }
 0x81c   :  { %2444 = vmatprep.subr.bf16.mxu0 %v5736_v30  ;;  %2485 = vmatprep.subr.bf16.mxu1 %v5737_v58 }
 0x81f   :  { %2445 = vmatpush1.bf16.msra.mxu0 %v5738_v5  ;;  %2486 = vmatpush1.bf16.msra.mxu1 %v5739_v22 }
 0x820   :  { %2446 = vmatprep.subr.bf16.mxu0 %v5740_v20  ;;  %2487 = vmatprep.subr.bf16.mxu1 %v5741_v27 }
 0x823   :  { %2447 = vmatpush1.bf16.msra.mxu0 %v5742_v3  ;;  %2488 = vmatpush1.bf16.msra.mxu1 %v5743_v7 }
 0x824   :  { %2448 = vmatprep.subr.bf16.mxu0 %v5744_v15  ;;  %2489 = vmatprep.subr.bf16.mxu1 %v5745_v25  ;;  %v5778_v15 = vld [vmem:[#allocation82_spill] sm:$0xff] }
 0x827   :  { %2449 = vmatpush1.bf16.msra.mxu0 %v5746_v32  ;;  %2490 = vmatpush1.bf16.msra.mxu1 %v5747_v36  ;;  %v106_v36 = vpop.permute.xlu1 %105 }
 0x828   :  { %2450 = vmatprep.subr.bf16.mxu0 %v5748_v54  ;;  %2491 = vmatprep.subr.bf16.mxu1 %v5749_v0  ;;  %v5779_v0 = vld [vmem:[#allocation71_spill] sm:$0xff] }
 0x82b   :  { %2451 = vmatpush1.bf16.msra.mxu0 %v5750_v47  ;;  %2492 = vmatpush1.bf16.msra.mxu1 %v5751_v50  ;;  %v157_v47 = vmul.f32 %v5779_v0, %v106_v36  ;;  %v5780_v50 = vld [vmem:[#allocation73_spill] sm:$0xff] }
 0x82c   :  { %2452 = vmatprep.subr.bf16.mxu0 %v5752_v60  ;;  %2493 = vmatprep.subr.bf16.mxu1 %v5753_v35  ;;  %v158_v60 = vmul.f32 %v5780_v50, %v106_v36 }
 0x82f   :  { %2453 = vmatpush1.bf16.msra.mxu0 %v5754_v61  ;;  %2494 = vmatpush1.bf16.msra.mxu1 %v5755_v21  ;;  %v5781_v61 = vld [vmem:[#allocation75_spill] sm:$0xff] }
 0x830   :  { %2454 = vmatprep.subr.bf16.mxu0 %v5756_v16  ;;  %2495 = vmatprep.subr.bf16.mxu1 %v5757_v11  ;;  %v159_v21 = vmul.f32 %v5781_v61, %v106_v36  ;;  %v5782_v16 = vld [vmem:[#allocation74_spill] sm:$0xff] }
 0x831   :  { %v211_v11 = vadd.f32 %v5782_v16, %v157_v47 }
 0x833   :  { %2455 = vmatpush1.bf16.msra.mxu0 %v5758_v31  ;;  %2496 = vmatpush1.bf16.msra.mxu1 %v5759_v17 }
 0x834   :  { %2456 = vmatprep.subr.bf16.mxu0 %v5760_v34  ;;  %2497 = vmatprep.subr.bf16.mxu1 %v5761_v38  ;;  %v212_v34 = vadd.f32 %v3656_v56, %v158_v60 }
 0x837   :  { %2457 = vmatpush1.bf16.msra.mxu0 %v5762_v55  ;;  %2498 = vmatpush1.bf16.msra.mxu1 %v5763_v51 }
 0x838   :  { %2458 = vmatprep.subr.bf16.mxu0 %v5764_v46  ;;  %2499 = vmatprep.subr.bf16.mxu1 %v5765_v49 }
 0x83b   :  { %2459 = vmatpush1.bf16.msra.mxu0 %v5766_v24  ;;  %2500 = vmatpush1.bf16.msra.mxu1 %v5767_v63 }
 0x83c   :  { %2460 = vmatprep.subr.bf16.mxu0 %v5768_v52  ;;  %2501 = vmatprep.subr.bf16.mxu1 %v5769_v62  ;;  %v160_v62 = vmul.f32 %v5419_v29, %v106_v36 }
 0x83f   :  { %2461 = vmatpush1.bf16.msra.mxu0 %v5770_v59  ;;  %2502 = vmatpush1.bf16.msra.mxu1 %v5771_v53  ;;  %v213_v53 = vadd.f32 %v5418_v23, %v159_v21 }
 0x840   :  { %2462 = vmatprep.subr.bf16.mxu0 %v5772_v10  ;;  %2503 = vmatprep.subr.bf16.mxu1 %v5773_v33 }
 0x843   :  { %2463 = vmatpush1.bf16.msra.mxu0 %v5774_v26  ;;  %2504 = vmatpush1.bf16.msra.mxu1 %v5775_v44 }
 0x8b9   :  { %v2255_v40 = vpop.f32.mrb[52].mxu0  ;;  %v2296_v4 = vpop.f32.mrb[52].mxu1 }
 0x8ba   :  { %v2256_v39 = vadd.f32 %v2255_v40, %v5776_v12  ;;  %v2257_v37 = vpop.f32.mrb[53].mxu0  ;;  %v2298_v42 = vpop.f32.mrb[53].mxu1  ;;  %v2297_v57 = vadd.f32 %v2296_v4, %v5644_v48  ;;  %v214_v4 = vadd.f32 %v3670_v1, %v160_v62 }
 0x8bb   :  { %v2258_v6 = vadd.f32 %v2257_v37, %v5643_v2  ;;  %v2259_v14 = vpop.f32.mrb[54].mxu0  ;;  %v2300_v28 = vpop.f32.mrb[54].mxu1  ;;  %v2299_v8 = vadd.f32 %v2298_v42, %v5777_v45 }
 0x8bc   :  { %v2394_v13 = vmul.f32 0.5, %v2256_v39  ;;  %v2260_v41 = vpop.f32.mrb[55].mxu0  ;;  %v2301_v19 = vpop.f32.mrb[55].mxu1 }
 0x8bd   :  { %v2398_v9 = vmul.f32 0.5, %v2258_v6  ;;  %v2403_v43 = vmul.f32 0.5, %v2299_v8 }
 0x8be   :  { %2949 = vtanh.f32 %v2394_v13 }
 0x8bf   :  { %2951 = vtanh.f32 %v2398_v9 }
 0x8c0   :  { %2953 = vtanh.f32 %v2297_v57 }
 0x8c1   :  { %2955 = vtanh.f32 %v2403_v43 }
 0x8c8   :  { %v2950_v30 = vpop.eup %2949 }
 0x8c9   :  { %v2952_v58 = vpop.eup %2951  ;;  %v2396_v5 = vmul.f32 0.5, %v2950_v30 }
 0x8ca   :  { %v2400_v22 = vmul.f32 0.5, %v2952_v58  ;;  %v2954_v27 = vpop.eup %2953 }
 0x8cb   :  { %v2397_v20 = vadd.f32 0.5, %v2396_v5  ;;  %v2956_v54 = vpop.eup %2955 }
 0x8cc   :  { %v2401_v3 = vadd.f32 0.5, %v2400_v22  ;;  %v2405_v35 = vmul.f32 0.5, %v2956_v54 }
 0x8cd   :  { %v2408_v7 = vmul.f32 %v2954_v27, %v2397_v20 }
 0x8ce   :  { %v2407_v25 = vmul.f32 %v2401_v3, %v5778_v15  ;;  %v2406_v46 = vadd.f32 0.5, %v2405_v35 }
 0x8d0   :  { %v4895_v32 = vadd.f32 %v2408_v7, %v2407_v25 }
 0x8d2   :  { %2957 = vtanh.f32 %v4895_v32 }
 0x8d9   :  { %v2342_v31 = vpop.f32.mrb[56].mxu0  ;;  %v2383_v17 = vpop.f32.mrb[56].mxu1 }
 0x8da   :  { %v2390_v38 = vadd.f32 %v2342_v31, %v211_v11  ;;  %v2344_v55 = vpop.f32.mrb[57].mxu0  ;;  %v2385_v51 = vpop.f32.mrb[57].mxu1  ;;  %v2392_v40 = vadd.f32 %v2383_v17, %v213_v53 }
 0x8db   :  { %v2391_v49 = vadd.f32 %v2344_v55, %v212_v34  ;;  %v2346_v24 = vpop.f32.mrb[58].mxu0  ;;  %v2387_v63 = vpop.f32.mrb[58].mxu1  ;;  %v2393_v39 = vadd.f32 %v2385_v51, %v214_v4 }
 0x8dc   :  { %v2958_v52 = vpop.eup %2957  ;;  %v2412_v59 = vmul.f32 0.5, %v2390_v38  ;;  %v2347_v10 = vpop.f32.mrb[59].mxu0  ;;  %v2665_v63 = vld [vmem:[%s4937_s7] ss:$0 sm:$0xff] }
 0x8dd   :  { %v2388_v33 = vpop.f32.mrb[59].mxu1  ;;  %v2416_v26 = vmul.f32 0.5, %v2391_v49  ;;  %v2411_v44 = vmul.f32 %v2958_v52, %v2406_v46  ;;  %v2421_v37 = vmul.f32 0.5, %v2393_v39 }
 0x8de   :  { %2959 = vtanh.f32 %v2412_v59 }
 0x8df   :  { %2961 = vtanh.f32 %v2416_v26  ;;  %v2431_v56 = vpack.c.bf16 %v2411_v44, %v2411_v44 }
 0x8e0   :  { %2963 = vtanh.f32 %v2392_v40 }
 0x8e1   :  { %2464 = vmatprep.mubr.bf16.mxu0 %v2431_v56  ;;  %2505 = vmatprep.mubr.bf16.mxu1 %v2431_v56  ;;  %2965 = vtanh.f32 %v2421_v37 }
 0x8e8   :  { %v2960_v42 = vpop.eup %2959 }
 0x8e9   :  { %v2962_v29 = vpop.eup %2961  ;;  %v2414_v6 = vmul.f32 0.5, %v2960_v42 }
 0x8ea   :  { %v2418_v14 = vmul.f32 0.5, %v2962_v29  ;;  %v2964_v28 = vpop.eup %2963 }
 0x8eb   :  { %v2415_v23 = vadd.f32 0.5, %v2414_v6  ;;  %v2966_v57 = vpop.eup %2965 }
 0x8ec   :  { %v2419_v13 = vadd.f32 0.5, %v2418_v14  ;;  %v2423_v1 = vmul.f32 0.5, %v2966_v57 }
 0x8ed   :  { %v2426_v41 = vmul.f32 %v2964_v28, %v2415_v23 }
 0x8ee   :  { %v2425_v19 = vmul.f32 %v2419_v13, %v4791_v18  ;;  %v2424_v8 = vadd.f32 0.5, %v2423_v1 }
 0x8f0   :  { %v2427_v9 = vadd.f32 %v2426_v41, %v2425_v19 }
 0x8f2   :  { %2967 = vtanh.f32 %v2427_v9 }
 0x8fc   :  { %v2968_v43 = vpop.eup %2967 }
 0x8fd   :  { %v2429_v30 = vmul.f32 %v2968_v43, %v2424_v8 }
 0x8ff   :  { %v2430_v58 = vpack.c.bf16 %v2429_v30, %v2429_v30 }
 0x901   :  { %2465 = vmatmul.mubr.bf16.vlgmr.msra.gmra.mrb[60].mxu0 %v2430_v58  ;;  %2506 = vmatmul.mubr.bf16.vlgmr.msra.gmra.mrb[60].mxu1 %v2430_v58 }
 0x9d4   :  { %v2466_v5 = vpop.f32.mrb[60].mxu0  ;;  %v2507_v22 = vpop.f32.mrb[60].mxu1 }
 0x9d5   :  { %v2467_v20 = vadd.f32 %v2466_v5, %v5776_v12  ;;  %v2468_v27 = vpop.f32.mrb[61].mxu0  ;;  %v2509_v3 = vpop.f32.mrb[61].mxu1  ;;  %v2508_v47 = vadd.f32 %v2507_v22, %v5644_v48 }
 0x9d6   :  { %v2469_v7 = vadd.f32 %v2468_v27, %v5643_v2  ;;  %v2470_v15 = vpop.f32.mrb[62].mxu0  ;;  %v2511_v18 = vpop.f32.mrb[62].mxu1  ;;  %v2510_v50 = vadd.f32 %v2509_v3, %v5777_v45  ;;  %v2664_v45 = vld [vmem:[%s4936_s6] ss:$0 sm:$0xff] }
 0x9d7   :  { %v2514_v25 = vmul.f32 0.5, %v2467_v20  ;;  %v2471_v36 = vpop.f32.mrb[63].mxu0  ;;  %v2512_v54 = vpop.f32.mrb[63].mxu1 }
 0x9d8   :  { %v2518_v0 = vmul.f32 0.5, %v2469_v7  ;;  %v2523_v60 = vmul.f32 0.5, %v2510_v50 }
 0x9d9   :  { %2969 = vtanh.f32 %v2514_v25 }
 0x9da   :  { %2971 = vtanh.f32 %v2518_v0 }
 0x9db   :  { %2973 = vtanh.f32 %v2508_v47 }
 0x9dc   :  { %2975 = vtanh.f32 %v2523_v60 }
 0x9e3   :  { %v2970_v35 = vpop.eup %2969 }
 0x9e4   :  { %v2972_v12 = vpop.eup %2971  ;;  %v2516_v61 = vmul.f32 0.5, %v2970_v35 }
 0x9e5   :  { %v2520_v21 = vmul.f32 0.5, %v2972_v12  ;;  %v2974_v16 = vpop.eup %2973 }
 0x9e6   :  { %v2517_v2 = vadd.f32 0.5, %v2516_v61  ;;  %v2976_v38 = vpop.eup %2975 }
 0x9e7   :  { %v2521_v11 = vadd.f32 0.5, %v2520_v21  ;;  %v2525_v48 = vmul.f32 0.5, %v2976_v38 }
 0x9e8   :  { %v2528_v31 = vmul.f32 %v2974_v16, %v2517_v2 }
 0x9e9   :  { %v2527_v17 = vmul.f32 %v2521_v11, %v4895_v32  ;;  %v2526_v55 = vadd.f32 0.5, %v2525_v48 }
 0x9eb   :  { %v2529_v34 = vadd.f32 %v2528_v31, %v2527_v17 }
 0x9ed   :  { %2977 = vtanh.f32 %v2529_v34 }
 0x9f7   :  { %v2978_v51 = vpop.eup %2977 }
 0x9f8   :  { %v2531_v46 = vmul.f32 %v2978_v51, %v2526_v55 }
 0x9fa   :  { %v2532_v49 = vmax.f32 %v2531_v46, 0.0 }
 0x9fc   :  { %v2540_v24 = vmul.f32 %v2664_v45, %v2532_v49 }
 0x9fe   :  { %2541 = vadd.xlane.f32.xlu0 %v2540_v24 }
 0xa8b   :  { %v2542_v32 = vpop.xlane.xlu0 %2541 }
 0xa8c   :  { %v2550_v52 = vadd.f32 %v2665_v63, %v2542_v32 }
 0xa8e   :  { %2551 = vst [vmem:[#allocation8] sm:$0xff] %v2550_v52 }
 0xa8f   :  { %3226 = shalt.err (!%p3223_p6)
}
 0xa90   :  { %s3227_s9 = scalar_lea.hbm %s4938_s8, 128 }
 0xa91   :  { %p3228_p7 = scmp.ne.s32.totalorder %s4938_s8, %s3227_s9  ;;  %p3231_p8 = scmp.lt.u32.totalorder %s3227_s9, %s4938_s8 }
 0xa93   :  { %p3233_p9 = pnand %p3231_p8, %p3228_p7 }
 0xa95   :  { %3236 = shalt.err (!%p3233_p9)
}
 0xa96   :  { %2561 = dma.vmem_to_hbm [thread:$0]  %s2559_s28, 128, %s4938_s8, [#allocation5]  }
 0xa97   :  { %3241 = dma.done.wait [#allocation5], 128  }
 0xa98   :  { %3242 = vsyncadd [#allocation5], 4294967168 }
 0xa99   :  { %2565 = vsyncpa [#allocation4], 1 }
 0xa9a   :  { %2566 = vsyncpa [#allocation7], 1 }
 0xa9b   :  { %2567 = vsyncpa [#allocation5], 1 }

</bundles_post_ra>
